<compile_context>
chip_gen: v5e
topology: v5e:2x2
jax: 0.10.0
libtpu: 0.0.40
codegen_flags: <defaults>
</compile_context>

<pallas_src>
import functools

import jax
import jax.numpy as jnp
from jax.experimental import pallas as pl
from jax.experimental.pallas import tpu as pltpu


def _mcloss_kernel(x_ref, y_ref, pos_exp_ref, pos_thr_ref, neg_thr_ref,
                   pos_ref, neg_ref, rowmax_sc, negacc_sc, *,
                   beta, tm, tn, lw):
    i = pl.program_id(0)
    j = pl.program_id(1)
    nj = pl.num_programs(1)
    n_slices = tn // lw

    # Initialize lane-dense per-row-block accumulators at the start of each j sweep.
    @pl.when(j == 0)
    def _():
        rowmax_sc[...] = jnp.full((tm, lw), -jnp.inf, dtype=jnp.float32)
        negacc_sc[...] = jnp.zeros((tm, lw), dtype=jnp.float32)

    # One (tm, tn) block of M = x @ y.T on the MXU: bf16 operands, f32 accumulation,
    # NT contraction (no transpose materialized anywhere).
    m_blk = jax.lax.dot_general(
        x_ref[...], y_ref[...],
        dimension_numbers=(((1,), (1,)), ((), ())),
        preferred_element_type=jnp.float32)                      # (tm, tn) f32

    thr = neg_thr_ref[0, 0]                                      # min(M_pos) - eps (SMEM scalar)

    row0 = i * tm
    col0 = j * tn
    # Does this block touch the global diagonal?  (tm and tn may differ.)
    touches_diag = jnp.logical_and(row0 < col0 + tn, col0 < row0 + tm)

    # Diagonal-touching blocks: mask out the diag cells from both the row max and
    # the negative-term sum.  TODO(synk): compute the exp in bf16 on v6e/v7x only
    # (EUP throughput); kept f32 here for generation-agnostic correctness.
    @pl.when(touches_diag)
    def _():
        row_ids = jax.lax.broadcasted_iota(jnp.int32, (tm, lw), 0) + row0
        for k in range(n_slices):
            m_sl = m_blk[:, k * lw:(k + 1) * lw]
            col_ids = (jax.lax.broadcasted_iota(jnp.int32, (tm, lw), 1)
                       + (col0 + k * lw))
            offdiag = row_ids != col_ids
            rowmax_sc[...] = jnp.maximum(rowmax_sc[...],
                                         jnp.where(offdiag, m_sl, -jnp.inf))
            valid = jnp.logical_and(offdiag, m_sl > thr)
            negacc_sc[...] += jnp.where(valid, jnp.exp(beta * m_sl), 0.0)

    # Off-diagonal blocks: plain max / plain threshold (no iota, no masks).
    @pl.when(jnp.logical_not(touches_diag))
    def _():
        for k in range(n_slices):
            m_sl = m_blk[:, k * lw:(k + 1) * lw]
            rowmax_sc[...] = jnp.maximum(rowmax_sc[...], m_sl)
            negacc_sc[...] += jnp.where(m_sl > thr, jnp.exp(beta * m_sl), 0.0)

    # After the full row sweep: one cross-lane reduce each, then emit per-row terms.
    # (Output blocks are resident across the 'arbitrary' j axis and written once here.)
    @pl.when(j == nj - 1)
    def _():
        row_max = jnp.max(rowmax_sc[...], axis=1, keepdims=True)           # (tm, 1)
        pos_ref[...] = jnp.where(pos_thr_ref[...] < row_max, pos_exp_ref[...], 0.0)
        neg_ref[...] = jnp.sum(negacc_sc[...], axis=1, keepdims=True)


def _pick_tiles(B, D, itemsize=2):
    """Choose (tm, tn) row/column blocks for the B x B similarity sweep."""
    def best(cands, limit):
        for t in cands:
            if t <= limit and B % t == 0:
                return t
        return None

    # Column block: 256 feeds the 256-wide MXU on v6e/v7x and is fine on v5e.
    tn = best((256, 128, 64, 32, 16, 8), B) or B

    # Row block: as tall as a conservative VMEM budget allows (y is re-streamed once
    # per row block -> intensity ~ tm FLOP/byte), but capped at 512 (v7x: 64 MiB VMEM)
    # and at B/2 so the 'parallel' i axis can shard across both v7x TensorCores.
    budget = 20 * 2 ** 20                                  # double-buffered bf16 tiles
    tm_fit = max(8, budget // max(1, 4 * D * itemsize))
    tm_cap = min(512, tm_fit, max(B // 2, 8))
    tm = best((512, 256, 128, 64, 32, 16, 8), min(tm_cap, B)) or B
    # TODO(synk): handle ragged B with in-kernel masking instead of one big block.
    # TODO(synk): for very large D (>= 4-8K), add a k grid axis over D with a
    # (tm, tn) f32 VMEM accumulator instead of keeping D unblocked.
    return tm, tn


def mc_loss(x, y, *, alpha=0.2, beta=3.1, lambd=1.5, epsilon=1.0,
            matmul_dtype=jnp.bfloat16):
    """Pallas TPU implementation of MCLoss.forward(x, y) -> scalar f32."""
    B, D = x.shape
    assert y.shape == (B, D)

    # bf16 operands hit the native MXU path on all generations (f32 operands force
    # the ~3x multi-pass emulation) and halve DMA / VMEM bytes.
    xq = x.astype(matmul_dtype)
    yq = y.astype(matmul_dtype)

    # O(B*D) f32 prepass on the same rounded operands the kernel consumes, so the
    # diagonal-derived thresholds are consistent with the kernel's MXU similarities.
    xf = xq.astype(jnp.float32)
    yf = yq.astype(jnp.float32)
    m_pos = jnp.sum(xf * yf, axis=1, keepdims=True)               # (B, 1) diag(M)
    pos_exp = jnp.exp(-alpha * m_pos)                             # exp(-a*M_pos), hoisted EUP work
    pos_thr = m_pos - epsilon                                     # compared vs running row max
    neg_thr = (jnp.min(m_pos) - epsilon).reshape(1, 1)            # scalar -> SMEM

    tm, tn = _pick_tiles(B, D, itemsize=jnp.dtype(matmul_dtype).itemsize)
    ni, nj = B // tm, B // tn
    lw = tn if tn <= 128 else 128                                 # lane-dense accumulator width

    kernel = functools.partial(_mcloss_kernel, beta=float(beta), tm=tm, tn=tn, lw=lw)

    in_bytes = B * D * jnp.dtype(matmul_dtype).itemsize
    cost = pl.CostEstimate(
        flops=2 * B * B * D,
        transcendentals=B * B,
        bytes_accessed=in_bytes + ni * in_bytes + 6 * B * 4)

    vmem_need = (2 * (tm + tn) * D * jnp.dtype(matmul_dtype).itemsize  # dbl-buffered x/y tiles
                 + 2 * tm * lw * 4                                     # lane-dense scratches
                 + 4 * tm * tn * 4                                     # live f32 block temporaries
                 + 4 * 2 * tm * 128 * 4)                               # (tm,1) blocks, lane-padded
    vmem_limit = int(min(64 * 2 ** 20, max(32 * 2 ** 20, 2 * vmem_need)))

    pos_rows, neg_rows = pl.pallas_call(
        kernel,
        out_shape=(jax.ShapeDtypeStruct((B, 1), jnp.float32),
                   jax.ShapeDtypeStruct((B, 1), jnp.float32)),
        grid_spec=pltpu.PrefetchScalarGridSpec(
            num_scalar_prefetch=0,
            grid=(ni, nj),
            in_specs=[
                pl.BlockSpec((tm, D), lambda i, j: (i, 0)),      # x rows (bf16)
                pl.BlockSpec((tn, D), lambda i, j: (j, 0)),      # y rows (bf16), NT matmul
                pl.BlockSpec((tm, 1), lambda i, j: (i, 0)),      # exp(-alpha*M_pos)
                pl.BlockSpec((tm, 1), lambda i, j: (i, 0)),      # M_pos - eps
                pl.BlockSpec(memory_space=pltpu.MemorySpace.SMEM),  # min(M_pos)-eps scalar
            ],
            out_specs=[
                pl.BlockSpec((tm, 1), lambda i, j: (i, 0)),      # per-row pos terms
                pl.BlockSpec((tm, 1), lambda i, j: (i, 0)),      # per-row neg sums
            ],
            scratch_shapes=[pltpu.VMEM((tm, lw), jnp.float32),   # lane-dense running row max
                            pltpu.VMEM((tm, lw), jnp.float32)],  # lane-dense running neg sum
        ),
        compiler_params=pltpu.CompilerParams(
            dimension_semantics=("parallel", "arbitrary"),
            vmem_limit_bytes=vmem_limit),
        cost_estimate=cost,
    )(xq, yq, pos_exp, pos_thr, neg_thr)

    # Fold the -lambd shift back in as scalar factors, then the tiny final reduction.
    pos_sum = jnp.exp(alpha * lambd) * jnp.sum(pos_rows)
    neg_sum = jnp.exp(-beta * lambd) * jnp.sum(neg_rows)
    pos_loss = (1.0 / B) * (1.0 / alpha) * jnp.log(1.0 + pos_sum)
    neg_loss = (1.0 / B) * (1.0 / beta) * jnp.log(1.0 + neg_sum)
    return pos_loss + neg_loss


def _mc_loss_ref(x, y, *, alpha=0.2, beta=3.1, lambd=1.5, epsilon=1.0):
    """Pure-JAX reference mirroring the PyTorch semantics (f32)."""
    x = x.astype(jnp.float32)
    y = y.astype(jnp.float32)
    B = x.shape[0]
    M = x @ y.T
    M_pos = jnp.diag(M)
    offdiag = ~jnp.eye(B, dtype=bool)
    row_max_neg = jnp.max(jnp.where(offdiag, M, -jnp.inf), axis=1)
    valid_pos = (M_pos - epsilon) < row_max_neg
    pos_sum = jnp.sum(jnp.where(valid_pos, jnp.exp(-alpha * (M_pos - lambd)), 0.0))
    valid_neg = offdiag & ((M + epsilon) > jnp.min(M_pos))
    neg_sum = jnp.sum(jnp.where(valid_neg, jnp.exp(beta * (M - lambd)), 0.0))
    pos_loss = (1.0 / B) * (1.0 / alpha) * jnp.log(1.0 + pos_sum)
    neg_loss = (1.0 / B) * (1.0 / beta) * jnp.log(1.0 + neg_sum)
    return pos_loss + neg_loss


if __name__ == "__main__":
    key = jax.random.PRNGKey(0)
    kx, ky = jax.random.split(key)
    # Small but multi-block shape: exercises diag and off-diag block paths, the
    # j-axis accumulation, and the lane-slice loop.
    B, D = 512, 128
    x = jax.random.normal(kx, (B, D), dtype=jnp.float32)
    y = jax.random.normal(ky, (B, D), dtype=jnp.float32)
    # L2-normalized embeddings, as typical for this loss (keeps exp(beta*M) bounded).
    x = x / jnp.linalg.norm(x, axis=-1, keepdims=True)
    y = y / jnp.linalg.norm(y, axis=-1, keepdims=True)

    loss = mc_loss(x, y)
    jax.block_until_ready(loss)

    # Tight check against the reference evaluated on the same bf16-rounded operands
    # (isolates kernel correctness from the intentional bf16 MXU precision choice).
    xq = x.astype(jnp.bfloat16).astype(jnp.float32)
    yq = y.astype(jnp.bfloat16).astype(jnp.float32)
    ref_q = _mc_loss_ref(xq, yq)
    assert jnp.allclose(loss, ref_q, atol=1e-4, rtol=1e-4), (loss, ref_q)

    # Looser check against the full-f32 reference (bf16 input rounding tolerance).
    ref_f32 = _mc_loss_ref(x, y)
    assert jnp.allclose(loss, ref_f32, atol=1e-2, rtol=1e-2), (loss, ref_f32)

    print("KERNEL_OK")
</pallas_src>

<mosaic_0001>
module attributes {stable_mosaic.version = 11 : i64} {
  func.func @_mcloss_kernel(%arg0: i32, %arg1: i32, %arg2: memref<256x128xbf16, #tpu.memory_space<vmem>>, %arg3: memref<256x128xbf16, #tpu.memory_space<vmem>>, %arg4: memref<256x1xf32, #tpu.memory_space<vmem>>, %arg5: memref<256x1xf32, #tpu.memory_space<vmem>>, %arg6: memref<1x1xf32, #tpu.memory_space<smem>>, %arg7: memref<256x1xf32, #tpu.memory_space<vmem>>, %arg8: memref<256x1xf32, #tpu.memory_space<vmem>>, %arg9: memref<256x128xf32, #tpu.memory_space<vmem>>, %arg10: memref<256x128xf32, #tpu.memory_space<vmem>>) attributes {dimension_semantics = [#tpu.dimension_semantics<parallel>, #tpu.dimension_semantics<arbitrary>], iteration_bounds = array<i64: 2, 2>, scalar_prefetch = 0 : i64, scratch_operands = 2 : i64, tpu.core_type = #tpu.core_type<tc>, window_params = [{transform_indices = @transform_0, window_bounds = array<i64: 256, 128>}, {transform_indices = @transform_1, window_bounds = array<i64: 256, 128>}, {transform_indices = @transform_2, window_bounds = array<i64: 256, 1>}, {transform_indices = @transform_3, window_bounds = array<i64: 256, 1>}, {transform_indices = @transform_4, window_bounds = array<i64: 1, 1>}, {transform_indices = @transform_5, window_bounds = array<i64: 256, 1>}, {transform_indices = @transform_6, window_bounds = array<i64: 256, 1>}]} {
    %c0_i32 = arith.constant 0 : i32
    %0 = arith.cmpi eq, %arg1, %c0_i32 : i32
    %1 = arith.extui %0 : i1 to i32
    %c0_i32_0 = arith.constant 0 : i32
    %2 = arith.cmpi ne, %1, %c0_i32_0 : i32
    scf.if %2 {
      %cst_12 = arith.constant 0xFF800000 : f32
      %22 = vector.broadcast %cst_12 : f32 to vector<256x128xf32>
      %c0_13 = arith.constant 0 : index
      %c0_14 = arith.constant 0 : index
      %23 = vector.load %arg9[%c0_13, %c0_14] : memref<256x128xf32, #tpu.memory_space<vmem>>, vector<256x128xf32>
      tpu.vector_store %arg9[%c0_13, %c0_14], %22 {strides = array<i32>} : memref<256x128xf32, #tpu.memory_space<vmem>>, vector<256x128xf32>,
      %cst_15 = arith.constant 0.000000e+00 : f32
      %24 = vector.broadcast %cst_15 : f32 to vector<256x128xf32>
      %c0_16 = arith.constant 0 : index
      %c0_17 = arith.constant 0 : index
      %25 = vector.load %arg10[%c0_16, %c0_17] : memref<256x128xf32, #tpu.memory_space<vmem>>, vector<256x128xf32>
      tpu.vector_store %arg10[%c0_16, %c0_17], %24 {strides = array<i32>} : memref<256x128xf32, #tpu.memory_space<vmem>>, vector<256x128xf32>,
    } else {
    }
    %c0 = arith.constant 0 : index
    %c0_1 = arith.constant 0 : index
    %3 = vector.load %arg2[%c0, %c0_1] : memref<256x128xbf16, #tpu.memory_space<vmem>>, vector<256x128xbf16>
    %c0_2 = arith.constant 0 : index
    %c0_3 = arith.constant 0 : index
    %4 = vector.load %arg3[%c0_2, %c0_3] : memref<256x128xbf16, #tpu.memory_space<vmem>>, vector<256x128xbf16>
    %cst = arith.constant dense<0.000000e+00> : vector<256x256xf32>
    %5 = tpu.matmul %3, %4, %cst {dimension_numbers = #tpu.dot_dimension_numbers<[1], [1], [0], [0], [0, 0, 1, 0], [], []>} : vector<256x128xbf16>, vector<256x128xbf16>, vector<256x256xf32> -> vector<256x256xf32>
    %c0_4 = arith.constant 0 : index
    %c0_5 = arith.constant 0 : index
    %6 = memref.load %arg6[%c0_4, %c0_5] : memref<1x1xf32, #tpu.memory_space<smem>>
    %c256_i32 = arith.constant 256 : i32
    %7 = arith.muli %arg0, %c256_i32 : i32
    %c256_i32_6 = arith.constant 256 : i32
    %8 = arith.muli %arg1, %c256_i32_6 : i32
    %c256_i32_7 = arith.constant 256 : i32
    %9 = arith.addi %8, %c256_i32_7 : i32
    %10 = arith.cmpi slt, %7, %9 : i32
    %c256_i32_8 = arith.constant 256 : i32
    %11 = arith.addi %7, %c256_i32_8 : i32
    %12 = arith.cmpi slt, %8, %11 : i32
    %13 = arith.andi %10, %12 : i1
    %14 = arith.extui %13 : i1 to i32
    %c0_i32_9 = arith.constant 0 : i32
    %15 = arith.cmpi ne, %14, %c0_i32_9 : i32
    scf.if %15 {
      %22 = tpu.iota {dimensions = array<i32: 0>} : vector<256x128xi32>
      %23 = vector.broadcast %7 : i32 to vector<256x128xi32>
      %24 = arith.addi %22, %23 : vector<256x128xi32>
      %25 = vector.extract_strided_slice %5 {offsets = [0, 0], sizes = [256, 128], strides = [1, 1]} : vector<256x256xf32> to vector<256x128xf32>
      %26 = tpu.iota {dimensions = array<i32: 1>} : vector<256x128xi32>
      %c0_i32_12 = arith.constant 0 : i32
      %27 = arith.addi %8, %c0_i32_12 : i32
      %28 = vector.broadcast %27 : i32 to vector<256x128xi32>
      %29 = arith.addi %26, %28 : vector<256x128xi32>
      %30 = arith.cmpi ne, %24, %29 : vector<256x128xi32>
      %c0_13 = arith.constant 0 : index
      %c0_14 = arith.constant 0 : index
      %31 = vector.load %arg9[%c0_13, %c0_14] : memref<256x128xf32, #tpu.memory_space<vmem>>, vector<256x128xf32>
      %cst_15 = arith.constant 0xFF800000 : f32
      %32 = vector.broadcast %cst_15 : f32 to vector<256x128xf32>
      %33 = arith.select %30, %25, %32 : vector<256x128xi1>, vector<256x128xf32>
      %34 = arith.maximumf %31, %33 : vector<256x128xf32>
      %c0_16 = arith.constant 0 : index
      %c0_17 = arith.constant 0 : index
      %35 = vector.load %arg9[%c0_16, %c0_17] : memref<256x128xf32, #tpu.memory_space<vmem>>, vector<256x128xf32>
      tpu.vector_store %arg9[%c0_16, %c0_17], %34 {strides = array<i32>} : memref<256x128xf32, #tpu.memory_space<vmem>>, vector<256x128xf32>,
      %36 = vector.broadcast %6 : f32 to vector<256x128xf32>
      %37 = arith.cmpf ogt, %25, %36 : vector<256x128xf32>
      %38 = arith.andi %30, %37 : vector<256x128xi1>
      %c0_18 = arith.constant 0 : index
      %c0_19 = arith.constant 0 : index
      %39 = vector.load %arg10[%c0_18, %c0_19] : memref<256x128xf32, #tpu.memory_space<vmem>>, vector<256x128xf32>
      %cst_20 = arith.constant 3.100000e+00 : f32
      %40 = vector.broadcast %cst_20 : f32 to vector<256x128xf32>
      %41 = arith.mulf %40, %25 : vector<256x128xf32>
      %42 = math.exp %41 : vector<256x128xf32>
      %cst_21 = arith.constant 0.000000e+00 : f32
      %43 = vector.broadcast %cst_21 : f32 to vector<256x128xf32>
      %44 = arith.select %38, %42, %43 : vector<256x128xi1>, vector<256x128xf32>
      %45 = arith.addf %39, %44 : vector<256x128xf32>
      %c0_22 = arith.constant 0 : index
      %c0_23 = arith.constant 0 : index
      %46 = vector.load %arg10[%c0_22, %c0_23] : memref<256x128xf32, #tpu.memory_space<vmem>>, vector<256x128xf32>
      tpu.vector_store %arg10[%c0_22, %c0_23], %45 {strides = array<i32>} : memref<256x128xf32, #tpu.memory_space<vmem>>, vector<256x128xf32>,
      %47 = vector.extract_strided_slice %5 {offsets = [0, 128], sizes = [256, 128], strides = [1, 1]} : vector<256x256xf32> to vector<256x128xf32>
      %48 = tpu.iota {dimensions = array<i32: 1>} : vector<256x128xi32>
      %c128_i32 = arith.constant 128 : i32
      %49 = arith.addi %8, %c128_i32 : i32
      %50 = vector.broadcast %49 : i32 to vector<256x128xi32>
      %51 = arith.addi %48, %50 : vector<256x128xi32>
      %52 = arith.cmpi ne, %24, %51 : vector<256x128xi32>
      %c0_24 = arith.constant 0 : index
      %c0_25 = arith.constant 0 : index
      %53 = vector.load %arg9[%c0_24, %c0_25] : memref<256x128xf32, #tpu.memory_space<vmem>>, vector<256x128xf32>
      %cst_26 = arith.constant 0xFF800000 : f32
      %54 = vector.broadcast %cst_26 : f32 to vector<256x128xf32>
      %55 = arith.select %52, %47, %54 : vector<256x128xi1>, vector<256x128xf32>
      %56 = arith.maximumf %53, %55 : vector<256x128xf32>
      %c0_27 = arith.constant 0 : index
      %c0_28 = arith.constant 0 : index
      %57 = vector.load %arg9[%c0_27, %c0_28] : memref<256x128xf32, #tpu.memory_space<vmem>>, vector<256x128xf32>
      tpu.vector_store %arg9[%c0_27, %c0_28], %56 {strides = array<i32>} : memref<256x128xf32, #tpu.memory_space<vmem>>, vector<256x128xf32>,
      %58 = vector.broadcast %6 : f32 to vector<256x128xf32>
      %59 = arith.cmpf ogt, %47, %58 : vector<256x128xf32>
      %60 = arith.andi %52, %59 : vector<256x128xi1>
      %c0_29 = arith.constant 0 : index
      %c0_30 = arith.constant 0 : index
      %61 = vector.load %arg10[%c0_29, %c0_30] : memref<256x128xf32, #tpu.memory_space<vmem>>, vector<256x128xf32>
      %cst_31 = arith.constant 3.100000e+00 : f32
      %62 = vector.broadcast %cst_31 : f32 to vector<256x128xf32>
      %63 = arith.mulf %62, %47 : vector<256x128xf32>
      %64 = math.exp %63 : vector<256x128xf32>
      %cst_32 = arith.constant 0.000000e+00 : f32
      %65 = vector.broadcast %cst_32 : f32 to vector<256x128xf32>
      %66 = arith.select %60, %64, %65 : vector<256x128xi1>, vector<256x128xf32>
      %67 = arith.addf %61, %66 : vector<256x128xf32>
      %c0_33 = arith.constant 0 : index
      %c0_34 = arith.constant 0 : index
      %68 = vector.load %arg10[%c0_33, %c0_34] : memref<256x128xf32, #tpu.memory_space<vmem>>, vector<256x128xf32>
      tpu.vector_store %arg10[%c0_33, %c0_34], %67 {strides = array<i32>} : memref<256x128xf32, #tpu.memory_space<vmem>>, vector<256x128xf32>,
    } else {
    }
    %true = arith.constant true
    %16 = arith.xori %13, %true : i1
    %17 = arith.extui %16 : i1 to i32
    %c0_i32_10 = arith.constant 0 : i32
    %18 = arith.cmpi ne, %17, %c0_i32_10 : i32
    scf.if %18 {
      %22 = vector.extract_strided_slice %5 {offsets = [0, 0], sizes = [256, 128], strides = [1, 1]} : vector<256x256xf32> to vector<256x128xf32>
      %c0_12 = arith.constant 0 : index
      %c0_13 = arith.constant 0 : index
      %23 = vector.load %arg9[%c0_12, %c0_13] : memref<256x128xf32, #tpu.memory_space<vmem>>, vector<256x128xf32>
      %24 = arith.maximumf %23, %22 : vector<256x128xf32>
      %c0_14 = arith.constant 0 : index
      %c0_15 = arith.constant 0 : index
      %25 = vector.load %arg9[%c0_14, %c0_15] : memref<256x128xf32, #tpu.memory_space<vmem>>, vector<256x128xf32>
      tpu.vector_store %arg9[%c0_14, %c0_15], %24 {strides = array<i32>} : memref<256x128xf32, #tpu.memory_space<vmem>>, vector<256x128xf32>,
      %c0_16 = arith.constant 0 : index
      %c0_17 = arith.constant 0 : index
      %26 = vector.load %arg10[%c0_16, %c0_17] : memref<256x128xf32, #tpu.memory_space<vmem>>, vector<256x128xf32>
      %27 = vector.broadcast %6 : f32 to vector<256x128xf32>
      %28 = arith.cmpf ogt, %22, %27 : vector<256x128xf32>
      %cst_18 = arith.constant 3.100000e+00 : f32
      %29 = vector.broadcast %cst_18 : f32 to vector<256x128xf32>
      %30 = arith.mulf %29, %22 : vector<256x128xf32>
      %31 = math.exp %30 : vector<256x128xf32>
      %cst_19 = arith.constant 0.000000e+00 : f32
      %32 = vector.broadcast %cst_19 : f32 to vector<256x128xf32>
      %33 = arith.select %28, %31, %32 : vector<256x128xi1>, vector<256x128xf32>
      %34 = arith.addf %26, %33 : vector<256x128xf32>
      %c0_20 = arith.constant 0 : index
      %c0_21 = arith.constant 0 : index
      %35 = vector.load %arg10[%c0_20, %c0_21] : memref<256x128xf32, #tpu.memory_space<vmem>>, vector<256x128xf32>
      tpu.vector_store %arg10[%c0_20, %c0_21], %34 {strides = array<i32>} : memref<256x128xf32, #tpu.memory_space<vmem>>, vector<256x128xf32>,
      %36 = vector.extract_strided_slice %5 {offsets = [0, 128], sizes = [256, 128], strides = [1, 1]} : vector<256x256xf32> to vector<256x128xf32>
      %c0_22 = arith.constant 0 : index
      %c0_23 = arith.constant 0 : index
      %37 = vector.load %arg9[%c0_22, %c0_23] : memref<256x128xf32, #tpu.memory_space<vmem>>, vector<256x128xf32>
      %38 = arith.maximumf %37, %36 : vector<256x128xf32>
      %c0_24 = arith.constant 0 : index
      %c0_25 = arith.constant 0 : index
      %39 = vector.load %arg9[%c0_24, %c0_25] : memref<256x128xf32, #tpu.memory_space<vmem>>, vector<256x128xf32>
      tpu.vector_store %arg9[%c0_24, %c0_25], %38 {strides = array<i32>} : memref<256x128xf32, #tpu.memory_space<vmem>>, vector<256x128xf32>,
      %c0_26 = arith.constant 0 : index
      %c0_27 = arith.constant 0 : index
      %40 = vector.load %arg10[%c0_26, %c0_27] : memref<256x128xf32, #tpu.memory_space<vmem>>, vector<256x128xf32>
      %41 = vector.broadcast %6 : f32 to vector<256x128xf32>
      %42 = arith.cmpf ogt, %36, %41 : vector<256x128xf32>
      %cst_28 = arith.constant 3.100000e+00 : f32
      %43 = vector.broadcast %cst_28 : f32 to vector<256x128xf32>
      %44 = arith.mulf %43, %36 : vector<256x128xf32>
      %45 = math.exp %44 : vector<256x128xf32>
      %cst_29 = arith.constant 0.000000e+00 : f32
      %46 = vector.broadcast %cst_29 : f32 to vector<256x128xf32>
      %47 = arith.select %42, %45, %46 : vector<256x128xi1>, vector<256x128xf32>
      %48 = arith.addf %40, %47 : vector<256x128xf32>
      %c0_30 = arith.constant 0 : index
      %c0_31 = arith.constant 0 : index
      %49 = vector.load %arg10[%c0_30, %c0_31] : memref<256x128xf32, #tpu.memory_space<vmem>>, vector<256x128xf32>
      tpu.vector_store %arg10[%c0_30, %c0_31], %48 {strides = array<i32>} : memref<256x128xf32, #tpu.memory_space<vmem>>, vector<256x128xf32>,
    } else {
    }
    %c1_i32 = arith.constant 1 : i32
    %19 = arith.cmpi eq, %arg1, %c1_i32 : i32
    %20 = arith.extui %19 : i1 to i32
    %c0_i32_11 = arith.constant 0 : i32
    %21 = arith.cmpi ne, %20, %c0_i32_11 : i32
    scf.if %21 {
      %c0_12 = arith.constant 0 : index
      %c0_13 = arith.constant 0 : index
      %22 = vector.load %arg9[%c0_12, %c0_13] : memref<256x128xf32, #tpu.memory_space<vmem>>, vector<256x128xf32>
      %cst_14 = arith.constant dense<0xFF800000> : vector<256xf32>
      %23 = vector.multi_reduction <maximumf>, %22, %cst_14 [1] : vector<256x128xf32> to vector<256xf32>
      %24 = vector.shape_cast %23 : vector<256xf32> to vector<256x1xf32>
      %c0_15 = arith.constant 0 : index
      %c0_16 = arith.constant 0 : index
      %25 = vector.load %arg5[%c0_15, %c0_16] : memref<256x1xf32, #tpu.memory_space<vmem>>, vector<256x1xf32>
      %26 = arith.cmpf olt, %25, %24 : vector<256x1xf32>
      %c0_17 = arith.constant 0 : index
      %c0_18 = arith.constant 0 : index
      %27 = vector.load %arg4[%c0_17, %c0_18] : memref<256x1xf32, #tpu.memory_space<vmem>>, vector<256x1xf32>
      %cst_19 = arith.constant 0.000000e+00 : f32
      %28 = vector.broadcast %cst_19 : f32 to vector<256x1xf32>
      %29 = arith.select %26, %27, %28 : vector<256x1xi1>, vector<256x1xf32>
      %c0_20 = arith.constant 0 : index
      %c0_21 = arith.constant 0 : index
      %30 = vector.load %arg7[%c0_20, %c0_21] : memref<256x1xf32, #tpu.memory_space<vmem>>, vector<256x1xf32>
      tpu.vector_store %arg7[%c0_20, %c0_21], %29 {strides = array<i32>} : memref<256x1xf32, #tpu.memory_space<vmem>>, vector<256x1xf32>,
      %c0_22 = arith.constant 0 : index
      %c0_23 = arith.constant 0 : index
      %31 = vector.load %arg10[%c0_22, %c0_23] : memref<256x128xf32, #tpu.memory_space<vmem>>, vector<256x128xf32>
      %cst_24 = arith.constant dense<0.000000e+00> : vector<256xf32>
      %32 = vector.multi_reduction <add>, %31, %cst_24 [1] : vector<256x128xf32> to vector<256xf32>
      %33 = vector.shape_cast %32 : vector<256xf32> to vector<256x1xf32>
      %c0_25 = arith.constant 0 : index
      %c0_26 = arith.constant 0 : index
      %34 = vector.load %arg8[%c0_25, %c0_26] : memref<256x1xf32, #tpu.memory_space<vmem>>, vector<256x1xf32>
      tpu.vector_store %arg8[%c0_25, %c0_26], %33 {strides = array<i32>} : memref<256x1xf32, #tpu.memory_space<vmem>>, vector<256x1xf32>,
    } else {
    }
    return
  }
  func.func @transform_0(%arg0: i32, %arg1: i32) -> (i32, i32) {
    %c0_i32 = arith.constant 0 : i32
    %c0_i32_0 = arith.constant 0 : i32
    return %arg0, %c0_i32 : i32, i32
  }
  func.func @transform_1(%arg0: i32, %arg1: i32) -> (i32, i32) {
    %c0_i32 = arith.constant 0 : i32
    %c0_i32_0 = arith.constant 0 : i32
    return %arg1, %c0_i32 : i32, i32
  }
  func.func @transform_2(%arg0: i32, %arg1: i32) -> (i32, i32) {
    %c0_i32 = arith.constant 0 : i32
    %c0_i32_0 = arith.constant 0 : i32
    return %arg0, %c0_i32 : i32, i32
  }
  func.func @transform_3(%arg0: i32, %arg1: i32) -> (i32, i32) {
    %c0_i32 = arith.constant 0 : i32
    %c0_i32_0 = arith.constant 0 : i32
    return %arg0, %c0_i32 : i32, i32
  }
  func.func @transform_4(%arg0: i32, %arg1: i32) -> (i32, i32) {
    %c0_i32 = arith.constant 0 : i32
    %c0_i32_0 = arith.constant 0 : i32
    %c0_i32_1 = arith.constant 0 : i32
    return %c0_i32, %c0_i32_0 : i32, i32
  }
  func.func @transform_5(%arg0: i32, %arg1: i32) -> (i32, i32) {
    %c0_i32 = arith.constant 0 : i32
    %c0_i32_0 = arith.constant 0 : i32
    return %arg0, %c0_i32 : i32, i32
  }
  func.func @transform_6(%arg0: i32, %arg1: i32) -> (i32, i32) {
    %c0_i32 = arith.constant 0 : i32
    %c0_i32_0 = arith.constant 0 : i32
    return %arg0, %c0_i32 : i32, i32
  }
}

</mosaic_0001>

<bundles_post_ra>
// kernel: tpu_custom_call.1
= control target key start
LH: loop header
LB: loop body
LE: loop exit
PB: predicated region body
PF: predicated region fallthrough
CT: control target
= control target key end

     0   :  { %s3643_s23 = smov 0   ;;  %s3645_s24 = smov 0   ;;  %s6727_s0 = inlined_call_operand.vmem [shape: bf16[512,128], index: 0, kind: input, shape index: {}]   ;;  %s6728_s1 = inlined_call_operand.vmem [shape: bf16[512,128], index: 1, kind: input, shape index: {}]   ;;  %s6729_s2 = inlined_call_operand.vmem [shape: f32[512,1], index: 2, kind: input, shape index: {}]   ;;  %s6730_s3 = inlined_call_operand.vmem [shape: f32[512,1], index: 3, kind: input, shape index: {}]   ;;  %s6731_s4 = inlined_call_operand.<no memory space> [shape: f32[1,1], index: 4, kind: input, shape index: {}]   ;;  %s6732_s5 = inlined_call_operand.vmem [shape: f32[512,1], index: 5, kind: output, shape index: {0}]   ;;  %s6733_s6 = inlined_call_operand.vmem [shape: f32[512,1], index: 6, kind: output, shape index: {1}]  }
   0x1   :  { %12 = sst [smem:[#allocation4]] %s6731_s4  ;;  %s3647_s25 = smov 0  }
   0x2   :  { %s3649_s26 = smov 0   ;;  %s3651_s27 = smov 0  }
   0x3 LB: > { %s27_s4 = sadd.s32 1, %s3593_s25  ;;  %s30_s28 = sadd.s32 1, %s3597_s26  ;;  %s3601_s27 = sphi %s3651_s27, %s18_s27   ;;  %s3597_s26 = sphi %s3649_s26, %s7882_s26   ;;  %s3593_s25 = sphi %s3647_s25, %s7881_s25   ;;  %s3589_s24 = sphi %s3645_s24, %s7880_s24   ;;  %s3585_s23 = sphi %s3643_s23, %s7879_s23  }
   0x4   : > { %p28_p0 = scmp.ge.s32.totalorder %s27_s4, 2  ;;  %p3070_p1 = scmp.ge.s32.totalorder %s3601_s27, 1 }
   0x5   : > { %p262_p2 = scmp.lt.s32.totalorder %s3601_s27, 5 }
   0x6   : > { %s7884_s4 = smov (%p28_p0, %s27_s4), 0  ;;  %s7886_s28 = smov (!%p28_p0, %s30_s28), %s3597_s26 }
   0x7   : > { %p263_p3 = pnand %p3070_p1, %p262_p2  ;;  %p32_p4 = scmp.ge.s32.totalorder %s7886_s28, 2 }
   0x9   : > { %s7888_s28 = smov (%p32_p4, %s7886_s28), 0  ;;  %266 = sbr.rel (%p263_p3) target bundleno = 1081 (0x439), region = 40 }
   0xe   : > { %s3071_s29 = sshll.u32 %s3589_s24, 5  ;;  %s3073_s30 = sshll.u32 %s3585_s23, 5 }
   0xf   : > { %p313_p5 = scmp.lt.s32.totalorder %s3071_s29, 63  ;;  %p319_p6 = scmp.lt.s32.totalorder %s3073_s30, 63 }
  0x10   : > { %p3083_p7 = scmp.ne.s32.totalorder %s3585_s23, 0 }
  0x11   : > { %s7890_s29 = smov (!%p313_p5, %s3071_s29), 63  ;;  %s7892_s30 = smov (!%p319_p6, %s3073_s30), 63 }
  0x12   : > { %s3072_s7 = sshll.u32 %s7890_s29, 2  ;;  %s3076_s8 = sshll.u32 %s7890_s29, 3 }
  0x13   : > { %s3682_s11 = scalar_lea.vmem %s6727_s0, %s3072_s7  ;;  %s3074_s12 = sshll.u32 %s7892_s30, 2 }
  0x14   : > { %s3687_s15 = scalar_lea.vmem %s6728_s1, %s3074_s12  ;;  %s3692_s18 = scalar_lea.vmem %s6729_s2, %s3076_s8 }
  0x15   : > { %s3697_s21 = scalar_lea.vmem %s6730_s3, %s3076_s8  ;;  %s3702_s7 = scalar_lea.vmem %s6732_s5, %s3076_s8 }
  0x16   : > { %s3707_s10 = scalar_lea.vmem %s6733_s6, %s3076_s8  ;;  %351 = sbr.rel (%p3083_p7) target bundleno = 92 (0x5c), region = 44 }
  0x1b   : > { %v3603_v0 = vmov -inf   ;;  %v3604_v1 = vmov 0.0  }
  0x1c   : > { %352 = vst [vmem:[#allocation2 + $0xb0] sm:$0xff] %v3603_v0 }
  0x1d   : > { %353 = vst [vmem:[#allocation2] sm:$0xff] %v3603_v0 }
  0x1e   : > { %354 = vst [vmem:[#allocation2 + $0xd8] sm:$0xff] %v3603_v0 }
  0x1f   : > { %355 = vst [vmem:[#allocation2 + $0x18] sm:$0xff] %v3603_v0 }
  0x20   : > { %356 = vst [vmem:[#allocation2 + $0x50] sm:$0xff] %v3603_v0 }
  0x21   : > { %357 = vst [vmem:[#allocation2 + $0x68] sm:$0xff] %v3603_v0 }
  0x22   : > { %358 = vst [vmem:[#allocation2 + $0x30] sm:$0xff] %v3603_v0 }
  0x23   : > { %359 = vst [vmem:[#allocation2 + $0x48] sm:$0xff] %v3603_v0 }
  0x24   : > { %360 = vst [vmem:[#allocation2 + $0x80] sm:$0xff] %v3603_v0 }
  0x25   : > { %361 = vst [vmem:[#allocation2 + $0x88] sm:$0xff] %v3603_v0 }
  0x26   : > { %362 = vst [vmem:[#allocation2 + $0xe8] sm:$0xff] %v3603_v0 }
  0x27   : > { %363 = vst [vmem:[#allocation2 + $0xb8] sm:$0xff] %v3603_v0 }
  0x28   : > { %364 = vst [vmem:[#allocation2 + $0x60] sm:$0xff] %v3603_v0 }
  0x29   : > { %365 = vst [vmem:[#allocation2 + $0xf0] sm:$0xff] %v3603_v0 }
  0x2a   : > { %366 = vst [vmem:[#allocation2 + $0x8] sm:$0xff] %v3603_v0 }
  0x2b   : > { %367 = vst [vmem:[#allocation2 + $0x78] sm:$0xff] %v3603_v0 }
  0x2c   : > { %368 = vst [vmem:[#allocation2 + $0x38] sm:$0xff] %v3603_v0 }
  0x2d   : > { %369 = vst [vmem:[#allocation2 + $0x58] sm:$0xff] %v3603_v0 }
  0x2e   : > { %370 = vst [vmem:[#allocation2 + $0x40] sm:$0xff] %v3603_v0 }
  0x2f   : > { %371 = vst [vmem:[#allocation2 + $0xc8] sm:$0xff] %v3603_v0 }
  0x30   : > { %372 = vst [vmem:[#allocation2 + $0xe0] sm:$0xff] %v3603_v0 }
  0x31   : > { %373 = vst [vmem:[#allocation2 + $0x90] sm:$0xff] %v3603_v0 }
  0x32   : > { %374 = vst [vmem:[#allocation2 + $0x70] sm:$0xff] %v3603_v0 }
  0x33   : > { %375 = vst [vmem:[#allocation2 + $0xc0] sm:$0xff] %v3603_v0 }
  0x34   : > { %376 = vst [vmem:[#allocation2 + $0xa8] sm:$0xff] %v3603_v0 }
  0x35   : > { %377 = vst [vmem:[#allocation2 + $0xd0] sm:$0xff] %v3603_v0 }
  0x36   : > { %378 = vst [vmem:[#allocation2 + $0x10] sm:$0xff] %v3603_v0 }
  0x37   : > { %379 = vst [vmem:[#allocation2 + $0x28] sm:$0xff] %v3603_v0 }
  0x38   : > { %380 = vst [vmem:[#allocation2 + $0xa0] sm:$0xff] %v3603_v0 }
  0x39   : > { %381 = vst [vmem:[#allocation2 + $0xf8] sm:$0xff] %v3603_v0 }
  0x3a   : > { %382 = vst [vmem:[#allocation2 + $0x20] sm:$0xff] %v3603_v0 }
  0x3b   : > { %383 = vst [vmem:[#allocation2 + $0x98] sm:$0xff] %v3603_v0 }
  0x3c   : > { %384 = vst [vmem:[#allocation3 + $0x80] sm:$0xff] %v3604_v1 }
  0x3d   : > { %385 = vst [vmem:[#allocation3 + $0xc8] sm:$0xff] %v3604_v1 }
  0x3e   : > { %386 = vst [vmem:[#allocation3 + $0xe8] sm:$0xff] %v3604_v1 }
  0x3f   : > { %387 = vst [vmem:[#allocation3 + $0x78] sm:$0xff] %v3604_v1 }
  0x40   : > { %388 = vst [vmem:[#allocation3 + $0x8] sm:$0xff] %v3604_v1 }
  0x41   : > { %389 = vst [vmem:[#allocation3 + $0x90] sm:$0xff] %v3604_v1 }
  0x42   : > { %390 = vst [vmem:[#allocation3 + $0x58] sm:$0xff] %v3604_v1 }
  0x43   : > { %391 = vst [vmem:[#allocation3 + $0xa8] sm:$0xff] %v3604_v1 }
  0x44   : > { %392 = vst [vmem:[#allocation3 + $0xd0] sm:$0xff] %v3604_v1 }
  0x45   : > { %393 = vst [vmem:[#allocation3 + $0xb0] sm:$0xff] %v3604_v1 }
  0x46   : > { %394 = vst [vmem:[#allocation3 + $0x38] sm:$0xff] %v3604_v1 }
  0x47   : > { %395 = vst [vmem:[#allocation3 + $0x40] sm:$0xff] %v3604_v1 }
  0x48   : > { %396 = vst [vmem:[#allocation3 + $0xe0] sm:$0xff] %v3604_v1 }
  0x49   : > { %397 = vst [vmem:[#allocation3 + $0x60] sm:$0xff] %v3604_v1 }
  0x4a   : > { %398 = vst [vmem:[#allocation3 + $0x18] sm:$0xff] %v3604_v1 }
  0x4b   : > { %399 = vst [vmem:[#allocation3 + $0x68] sm:$0xff] %v3604_v1 }
  0x4c   : > { %400 = vst [vmem:[#allocation3 + $0x10] sm:$0xff] %v3604_v1 }
  0x4d   : > { %401 = vst [vmem:[#allocation3 + $0x70] sm:$0xff] %v3604_v1 }
  0x4e   : > { %402 = vst [vmem:[#allocation3 + $0x50] sm:$0xff] %v3604_v1 }
  0x4f   : > { %403 = vst [vmem:[#allocation3 + $0xa0] sm:$0xff] %v3604_v1 }
  0x50   : > { %404 = vst [vmem:[#allocation3 + $0xd8] sm:$0xff] %v3604_v1 }
  0x51   : > { %405 = vst [vmem:[#allocation3 + $0x30] sm:$0xff] %v3604_v1 }
  0x52   : > { %406 = vst [vmem:[#allocation3 + $0x20] sm:$0xff] %v3604_v1 }
  0x53   : > { %407 = vst [vmem:[#allocation3 + $0xf0] sm:$0xff] %v3604_v1 }
  0x54   : > { %408 = vst [vmem:[#allocation3 + $0x88] sm:$0xff] %v3604_v1 }
  0x55   : > { %409 = vst [vmem:[#allocation3 + $0x48] sm:$0xff] %v3604_v1 }
  0x56   : > { %410 = vst [vmem:[#allocation3 + $0xf8] sm:$0xff] %v3604_v1 }
  0x57   : > { %411 = vst [vmem:[#allocation3 + $0xc0] sm:$0xff] %v3604_v1 }
  0x58   : > { %412 = vst [vmem:[#allocation3 + $0xb8] sm:$0xff] %v3604_v1 }
  0x59   : > { %413 = vst [vmem:[#allocation3] sm:$0xff] %v3604_v1 }
  0x5a   : > { %414 = vst [vmem:[#allocation3 + $0x28] sm:$0xff] %v3604_v1 }
  0x5b   : > { %415 = vst [vmem:[#allocation3 + $0x98] sm:$0xff] %v3604_v1 }
  0x5c PF: > { %v3240_v2 = vld [vmem:[%s3687_s15 + $0x38] sm:$0xff]  ;;  %v3239_v4 = vld [vmem:[%s3687_s15 + $0x30] sm:$0xff]  ;;  %v3238_v6 = vld [vmem:[%s3687_s15 + $0x28] sm:$0xff]  ;;  %s3743_s8 = sshll.u32 %s3589_s24, 8  ;;  %s3746_s12 = sshll.u32 %s3585_s23, 8 }
  0x5d   : > { %v3248_v3 = vld [vmem:[%s3687_s15 + $0x78] sm:$0xff]  ;;  %672 = vmatpush.bf16.xpose.msra.mxu0 %v3240_v2  ;;  %3249 = vmatpush.bf16.xpose.msra.mxu2 %v3240_v2  ;;  %v3247_v5 = vld [vmem:[%s3687_s15 + $0x70] sm:$0xff]  ;;  %v3246_v7 = vld [vmem:[%s3687_s15 + $0x68] sm:$0xff]  ;;  %s853_s13 = sadd.s32 256, %s3746_s12  ;;  %s855_s14 = sadd.s32 256, %s3743_s8 }
  0x5e   : > { %761 = vmatpush.bf16.xpose.msra.mxu1 %v3248_v3  ;;  %3257 = vmatpush.bf16.xpose.msra.mxu3 %v3248_v3  ;;  %v3237_v8 = vld [vmem:[%s3687_s15 + $0x20] sm:$0xff]  ;;  %v3236_v10 = vld [vmem:[%s3687_s15 + $0x18] sm:$0xff]  ;;  %v3235_v12 = vld [vmem:[%s3687_s15 + $0x10] sm:$0xff]  ;;  %p3751_p8 = scmp.lt.s32.totalorder %s3743_s8, %s853_s13  ;;  %p3756_p9 = scmp.lt.s32.totalorder %s3746_s12, %s855_s14 }
  0x5f   : > { %v3245_v9 = vld [vmem:[%s3687_s15 + $0x60] sm:$0xff]  ;;  %v3244_v11 = vld [vmem:[%s3687_s15 + $0x58] sm:$0xff]  ;;  %v3243_v13 = vld [vmem:[%s3687_s15 + $0x50] sm:$0xff]  ;;  %s3760_s24 = sld [smem:[#allocation4]] }
  0x60   : > { %v3234_v14 = vld [vmem:[%s3687_s15 + $0x8] sm:$0xff]  ;;  %v3233_v16 = vld [vmem:[%s3687_s15] sm:$0xff]  ;;  %v3219_v22 = vld [vmem:[%s3682_s11 + $0x10] sm:$0xff]  ;;  %p857_p10 = pnand %p3756_p9, %p3751_p8 }
  0x61   : > { %v3242_v15 = vld [vmem:[%s3687_s15 + $0x48] sm:$0xff]  ;;  %v3241_v17 = vld [vmem:[%s3687_s15 + $0x40] sm:$0xff]  ;;  %v3227_v23 = vld [vmem:[%s3682_s11 + $0x50] sm:$0xff] }
  0x62   : > { %v3217_v18 = vld [vmem:[%s3682_s11] sm:$0xff]  ;;  %v3218_v20 = vld [vmem:[%s3682_s11 + $0x8] sm:$0xff]  ;;  %v3220_v24 = vld [vmem:[%s3682_s11 + $0x18] sm:$0xff] }
  0x63   : > { %v3225_v19 = vld [vmem:[%s3682_s11 + $0x40] sm:$0xff]  ;;  %v3226_v21 = vld [vmem:[%s3682_s11 + $0x48] sm:$0xff]  ;;  %v3228_v25 = vld [vmem:[%s3682_s11 + $0x58] sm:$0xff] }
  0x64   : > { %v3221_v26 = vld [vmem:[%s3682_s11 + $0x20] sm:$0xff]  ;;  %v3222_v28 = vld [vmem:[%s3682_s11 + $0x28] sm:$0xff]  ;;  %v3223_v30 = vld [vmem:[%s3682_s11 + $0x30] sm:$0xff] }
  0x65   : > { %673 = vmatpush.bf16.xpose.msra.mxu0 %v3239_v4  ;;  %3250 = vmatpush.bf16.xpose.msra.mxu2 %v3239_v4  ;;  %v3229_v27 = vld [vmem:[%s3682_s11 + $0x60] sm:$0xff]  ;;  %v3230_v29 = vld [vmem:[%s3682_s11 + $0x68] sm:$0xff]  ;;  %v3231_v31 = vld [vmem:[%s3682_s11 + $0x70] sm:$0xff] }
  0x66   : > { %762 = vmatpush.bf16.xpose.msra.mxu1 %v3247_v5  ;;  %3258 = vmatpush.bf16.xpose.msra.mxu3 %v3247_v5  ;;  %v3224_v32 = vld [vmem:[%s3682_s11 + $0x38] sm:$0xff] }
  0x67   : > { %v3232_v33 = vld [vmem:[%s3682_s11 + $0x78] sm:$0xff] }
  0x6d   : > { %674 = vmatpush.bf16.xpose.msra.mxu0 %v3238_v6  ;;  %3251 = vmatpush.bf16.xpose.msra.mxu2 %v3238_v6 }
  0x6e   : > { %763 = vmatpush.bf16.xpose.msra.mxu1 %v3246_v7  ;;  %3259 = vmatpush.bf16.xpose.msra.mxu3 %v3246_v7 }
  0x75   : > { %675 = vmatpush.bf16.xpose.msra.mxu0 %v3237_v8  ;;  %3252 = vmatpush.bf16.xpose.msra.mxu2 %v3237_v8 }
  0x76   : > { %764 = vmatpush.bf16.xpose.msra.mxu1 %v3245_v9  ;;  %3260 = vmatpush.bf16.xpose.msra.mxu3 %v3245_v9 }
  0x7d   : > { %676 = vmatpush.bf16.xpose.msra.mxu0 %v3236_v10  ;;  %3253 = vmatpush.bf16.xpose.msra.mxu2 %v3236_v10 }
  0x7e   : > { %765 = vmatpush.bf16.xpose.msra.mxu1 %v3244_v11  ;;  %3261 = vmatpush.bf16.xpose.msra.mxu3 %v3244_v11 }
  0x85   : > { %677 = vmatpush.bf16.xpose.msra.mxu0 %v3235_v12  ;;  %3254 = vmatpush.bf16.xpose.msra.mxu2 %v3235_v12 }
  0x86   : > { %766 = vmatpush.bf16.xpose.msra.mxu1 %v3243_v13  ;;  %3262 = vmatpush.bf16.xpose.msra.mxu3 %v3243_v13 }
  0x8d   : > { %678 = vmatpush.bf16.xpose.msra.mxu0 %v3234_v14  ;;  %3255 = vmatpush.bf16.xpose.msra.mxu2 %v3234_v14 }
  0x8e   : > { %767 = vmatpush.bf16.xpose.msra.mxu1 %v3242_v15  ;;  %3263 = vmatpush.bf16.xpose.msra.mxu3 %v3242_v15 }
  0x95   : > { %679 = vmatpush.bf16.xpose.msra.mxu0 %v3233_v16  ;;  %3256 = vmatpush.bf16.xpose.msra.mxu2 %v3233_v16 }
  0x96   : > { %768 = vmatpush.bf16.xpose.msra.mxu1 %v3241_v17  ;;  %3264 = vmatpush.bf16.xpose.msra.mxu3 %v3241_v17 }
  0x9c   : > { %680 = vmatmul.bf16.vlgmr.msra.gmra.mxu0 %v3217_v18  ;;  %720 = vmatmul.bf16.vlgmr.msra.gmra.mxu2 %v3225_v19 }
  0x9d   : > { %769 = vmatmul.bf16.vlgmr.msra.gmra.mxu1 %v3217_v18  ;;  %809 = vmatmul.bf16.vlgmr.msra.gmra.mxu3 %v3225_v19 }
  0xac   : > { %685 = vmatmul.bf16.gmra.mxu0 %v3218_v20  ;;  %725 = vmatmul.bf16.gmra.mxu2 %v3226_v21 }
  0xad   : > { %774 = vmatmul.bf16.gmra.mxu1 %v3218_v20  ;;  %814 = vmatmul.bf16.gmra.mxu3 %v3226_v21 }
  0xbc   : > { %690 = vmatmul.bf16.gmra.mxu0 %v3219_v22  ;;  %730 = vmatmul.bf16.gmra.mxu2 %v3227_v23 }
  0xbd   : > { %779 = vmatmul.bf16.gmra.mxu1 %v3219_v22  ;;  %819 = vmatmul.bf16.gmra.mxu3 %v3227_v23 }
  0xcc   : > { %695 = vmatmul.bf16.gmra.mxu0 %v3220_v24  ;;  %735 = vmatmul.bf16.gmra.mxu2 %v3228_v25 }
  0xcd   : > { %784 = vmatmul.bf16.gmra.mxu1 %v3220_v24  ;;  %824 = vmatmul.bf16.gmra.mxu3 %v3228_v25 }
  0xdc   : > { %700 = vmatmul.bf16.gmra.mxu0 %v3221_v26  ;;  %740 = vmatmul.bf16.gmra.mxu2 %v3229_v27 }
  0xdd   : > { %789 = vmatmul.bf16.gmra.mxu1 %v3221_v26  ;;  %829 = vmatmul.bf16.gmra.mxu3 %v3229_v27 }
  0xec   : > { %705 = vmatmul.bf16.gmra.mxu0 %v3222_v28  ;;  %745 = vmatmul.bf16.gmra.mxu2 %v3230_v29 }
  0xed   : > { %794 = vmatmul.bf16.gmra.mxu1 %v3222_v28  ;;  %834 = vmatmul.bf16.gmra.mxu3 %v3230_v29 }
  0xfc   : > { %710 = vmatmul.bf16.gmra.mxu0 %v3223_v30  ;;  %750 = vmatmul.bf16.gmra.mxu2 %v3231_v31 }
  0xfd   : > { %799 = vmatmul.bf16.gmra.mxu1 %v3223_v30  ;;  %839 = vmatmul.bf16.gmra.mxu3 %v3231_v31 }
 0x10c   : > { %715 = vmatmul.bf16.gmra.mxu0 %v3224_v32  ;;  %755 = vmatmul.bf16.gmra.mxu2 %v3232_v33 }
 0x10d   : > { %804 = vmatmul.bf16.gmra.mxu1 %v3224_v32  ;;  %844 = vmatmul.bf16.gmra.mxu3 %v3232_v33 }
 0x119   : > { %v3766_v34 = vpop.f32.mrf.mxu0 }
 0x11a   : > { %7083 = vst [vmem:[#allocation5_spill] sm:$0xff] %v3766_v34  ;;  %v3768_v35 = vpop.f32.mrf.mxu1 }
 0x11b   : > { %7084 = vst [vmem:[#allocation6_spill] sm:$0xff] %v3768_v35 }
 0x11f   : > { %v3770_v36 = vpop.f32.mrf.mxu2 }
 0x120   : > { %7085 = vst [vmem:[#allocation7_spill] sm:$0xff] %v3770_v36  ;;  %v3772_v37 = vpop.f32.mrf.mxu3 }
 0x121   : > { %7086 = vst [vmem:[#allocation8_spill] sm:$0xff] %v3772_v37  ;;  %v3774_v38 = vpop.f32.mrf.mxu0 }
 0x122   : > { %7087 = vst [vmem:[#allocation9_spill] sm:$0xff] %v3774_v38  ;;  %v3776_v39 = vpop.f32.mrf.mxu1 }
 0x123   : > { %7088 = vst [vmem:[#allocation10_spill] sm:$0xff] %v3776_v39 }
 0x127   : > { %v3778_v40 = vpop.f32.mrf.mxu2 }
 0x128   : > { %7089 = vst [vmem:[#allocation11_spill] sm:$0xff] %v3778_v40  ;;  %v3780_v41 = vpop.f32.mrf.mxu3 }
 0x129   : > { %7090 = vst [vmem:[#allocation12_spill] sm:$0xff] %v3780_v41  ;;  %v3782_v42 = vpop.f32.mrf.mxu0 }
 0x12a   : > { %7091 = vst [vmem:[#allocation13_spill] sm:$0xff] %v3782_v42  ;;  %v3784_v43 = vpop.f32.mrf.mxu1 }
 0x12b   : > { %7092 = vst [vmem:[#allocation14_spill] sm:$0xff] %v3784_v43 }
 0x12f   : > { %v3786_v44 = vpop.f32.mrf.mxu2 }
 0x130   : > { %7093 = vst [vmem:[#allocation15_spill] sm:$0xff] %v3786_v44  ;;  %v3788_v45 = vpop.f32.mrf.mxu3 }
 0x131   : > { %7094 = vst [vmem:[#allocation16_spill] sm:$0xff] %v3788_v45  ;;  %v3790_v46 = vpop.f32.mrf.mxu0 }
 0x132   : > { %7095 = vst [vmem:[#allocation17_spill] sm:$0xff] %v3790_v46  ;;  %v3792_v47 = vpop.f32.mrf.mxu1 }
 0x133   : > { %7096 = vst [vmem:[#allocation18_spill] sm:$0xff] %v3792_v47 }
 0x137   : > { %v3794_v48 = vpop.f32.mrf.mxu2 }
 0x138   : > { %7097 = vst [vmem:[#allocation19_spill] sm:$0xff] %v3794_v48  ;;  %v3796_v49 = vpop.f32.mrf.mxu3 }
 0x139   : > { %7098 = vst [vmem:[#allocation20_spill] sm:$0xff] %v3796_v49  ;;  %v3798_v50 = vpop.f32.mrf.mxu0 }
 0x13a   : > { %7099 = vst [vmem:[#allocation21_spill] sm:$0xff] %v3798_v50  ;;  %v3800_v51 = vpop.f32.mrf.mxu1 }
 0x13b   : > { %7100 = vst [vmem:[#allocation22_spill] sm:$0xff] %v3800_v51 }
 0x13f   : > { %v3802_v52 = vpop.f32.mrf.mxu2 }
 0x140   : > { %7101 = vst [vmem:[#allocation23_spill] sm:$0xff] %v3802_v52  ;;  %v3804_v53 = vpop.f32.mrf.mxu3 }
 0x141   : > { %7102 = vst [vmem:[#allocation24_spill] sm:$0xff] %v3804_v53  ;;  %v3806_v54 = vpop.f32.mrf.mxu0 }
 0x142   : > { %7103 = vst [vmem:[#allocation25_spill] sm:$0xff] %v3806_v54  ;;  %v3808_v55 = vpop.f32.mrf.mxu1 }
 0x143   : > { %7104 = vst [vmem:[#allocation26_spill] sm:$0xff] %v3808_v55 }
 0x147   : > { %v3810_v56 = vpop.f32.mrf.mxu2 }
 0x148   : > { %7105 = vst [vmem:[#allocation27_spill] sm:$0xff] %v3810_v56  ;;  %v3812_v57 = vpop.f32.mrf.mxu3 }
 0x149   : > { %7106 = vst [vmem:[#allocation28_spill] sm:$0xff] %v3812_v57  ;;  %v3814_v58 = vpop.f32.mrf.mxu0 }
 0x14a   : > { %7107 = vst [vmem:[#allocation29_spill] sm:$0xff] %v3814_v58  ;;  %v3816_v59 = vpop.f32.mrf.mxu1 }
 0x14b   : > { %7108 = vst [vmem:[#allocation30_spill] sm:$0xff] %v3816_v59 }
 0x14f   : > { %v3818_v60 = vpop.f32.mrf.mxu2 }
 0x150   : > { %7109 = vst [vmem:[#allocation31_spill] sm:$0xff] %v3818_v60  ;;  %v3820_v61 = vpop.f32.mrf.mxu3 }
 0x151   : > { %7110 = vst [vmem:[#allocation32_spill] sm:$0xff] %v3820_v61  ;;  %v3822_v62 = vpop.f32.mrf.mxu0 }
 0x152   : > { %7111 = vst [vmem:[#allocation33_spill] sm:$0xff] %v3822_v62  ;;  %v3824_v63 = vpop.f32.mrf.mxu1 }
 0x153   : > { %7112 = vst [vmem:[#allocation34_spill] sm:$0xff] %v3824_v63 }
 0x157   : > { %v3826_v0 = vpop.f32.mrf.mxu2 }
 0x158   : > { %7113 = vst [vmem:[#allocation35_spill] sm:$0xff] %v3826_v0  ;;  %v3828_v1 = vpop.f32.mrf.mxu3 }
 0x159   : > { %7114 = vst [vmem:[#allocation36_spill] sm:$0xff] %v3828_v1  ;;  %v3830_v2 = vpop.f32.mrf.mxu0 }
 0x15a   : > { %7115 = vst [vmem:[#allocation37_spill] sm:$0xff] %v3830_v2  ;;  %v3832_v3 = vpop.f32.mrf.mxu1 }
 0x15b   : > { %7116 = vst [vmem:[#allocation38_spill] sm:$0xff] %v3832_v3 }
 0x15f   : > { %v3834_v4 = vpop.f32.mrf.mxu2 }
 0x160   : > { %7117 = vst [vmem:[#allocation39_spill] sm:$0xff] %v3834_v4  ;;  %v3836_v5 = vpop.f32.mrf.mxu3 }
 0x161   : > { %7118 = vst [vmem:[#allocation40_spill] sm:$0xff] %v3836_v5  ;;  %v3838_v6 = vpop.f32.mrf.mxu0 }
 0x162   : > { %7119 = vst [vmem:[#allocation41_spill] sm:$0xff] %v3838_v6  ;;  %v3840_v7 = vpop.f32.mrf.mxu1 }
 0x163   : > { %7120 = vst [vmem:[#allocation42_spill] sm:$0xff] %v3840_v7 }
 0x167   : > { %v3842_v8 = vpop.f32.mrf.mxu2 }
 0x168   : > { %7121 = vst [vmem:[#allocation43_spill] sm:$0xff] %v3842_v8  ;;  %v3844_v9 = vpop.f32.mrf.mxu3 }
 0x169   : > { %7122 = vst [vmem:[#allocation44_spill] sm:$0xff] %v3844_v9  ;;  %v3846_v10 = vpop.f32.mrf.mxu0 }
 0x16a   : > { %7123 = vst [vmem:[#allocation45_spill] sm:$0xff] %v3846_v10  ;;  %v3848_v11 = vpop.f32.mrf.mxu1 }
 0x16b   : > { %7124 = vst [vmem:[#allocation46_spill] sm:$0xff] %v3848_v11 }
 0x16f   : > { %v3850_v12 = vpop.f32.mrf.mxu2 }
 0x170   : > { %7125 = vst [vmem:[#allocation47_spill] sm:$0xff] %v3850_v12  ;;  %v3852_v13 = vpop.f32.mrf.mxu3 }
 0x171   : > { %7126 = vst [vmem:[#allocation48_spill] sm:$0xff] %v3852_v13  ;;  %v3854_v14 = vpop.f32.mrf.mxu0 }
 0x172   : > { %7127 = vst [vmem:[#allocation49_spill] sm:$0xff] %v3854_v14  ;;  %v3856_v15 = vpop.f32.mrf.mxu1 }
 0x173   : > { %7128 = vst [vmem:[#allocation50_spill] sm:$0xff] %v3856_v15 }
 0x177   : > { %v3858_v16 = vpop.f32.mrf.mxu2 }
 0x178   : > { %7129 = vst [vmem:[#allocation51_spill] sm:$0xff] %v3858_v16  ;;  %v3860_v17 = vpop.f32.mrf.mxu3 }
 0x179   : > { %7130 = vst [vmem:[#allocation52_spill] sm:$0xff] %v3860_v17  ;;  %v3862_v18 = vpop.f32.mrf.mxu0 }
 0x17a   : > { %7131 = vst [vmem:[#allocation53_spill] sm:$0xff] %v3862_v18  ;;  %v3864_v19 = vpop.f32.mrf.mxu1 }
 0x17b   : > { %7132 = vst [vmem:[#allocation54_spill] sm:$0xff] %v3864_v19 }
 0x17f   : > { %v3866_v20 = vpop.f32.mrf.mxu2 }
 0x180   : > { %7133 = vst [vmem:[#allocation55_spill] sm:$0xff] %v3866_v20  ;;  %v3868_v21 = vpop.f32.mrf.mxu3 }
 0x181   : > { %7134 = vst [vmem:[#allocation56_spill] sm:$0xff] %v3868_v21  ;;  %v3870_v22 = vpop.f32.mrf.mxu0 }
 0x182   : > { %7135 = vst [vmem:[#allocation57_spill] sm:$0xff] %v3870_v22  ;;  %v3872_v23 = vpop.f32.mrf.mxu1 }
 0x183   : > { %7136 = vst [vmem:[#allocation58_spill] sm:$0xff] %v3872_v23 }
 0x187   : > { %v3874_v24 = vpop.f32.mrf.mxu2 }
 0x188   : > { %7137 = vst [vmem:[#allocation59_spill] sm:$0xff] %v3874_v24  ;;  %v3876_v25 = vpop.f32.mrf.mxu3 }
 0x189   : > { %7138 = vst [vmem:[#allocation60_spill] sm:$0xff] %v3876_v25  ;;  %v3878_v26 = vpop.f32.mrf.mxu0 }
 0x18a   : > { %7139 = vst [vmem:[#allocation61_spill] sm:$0xff] %v3878_v26  ;;  %v3880_v27 = vpop.f32.mrf.mxu1 }
 0x18b   : > { %7140 = vst [vmem:[#allocation62_spill] sm:$0xff] %v3880_v27 }
 0x18f   : > { %v3882_v28 = vpop.f32.mrf.mxu2 }
 0x190   : > { %7141 = vst [vmem:[#allocation63_spill] sm:$0xff] %v3882_v28  ;;  %v3884_v29 = vpop.f32.mrf.mxu3 }
 0x191   : > { %7142 = vst [vmem:[#allocation64_spill] sm:$0xff] %v3884_v29  ;;  %v3886_v30 = vpop.f32.mrf.mxu0 }
 0x192   : > { %7143 = vst [vmem:[#allocation65_spill] sm:$0xff] %v3886_v30  ;;  %v3888_v31 = vpop.f32.mrf.mxu1 }
 0x193   : > { %7144 = vst [vmem:[#allocation66_spill] sm:$0xff] %v3888_v31 }
 0x195   : > { %860 = sbr.rel (%p857_p10) target bundleno = 645 (0x285), region = 48 }
 0x197   : > { %v3890_v32 = vpop.f32.mrf.mxu2 }
 0x198   : > { %7145 = vst [vmem:[#allocation67_spill] sm:$0xff] %v3890_v32  ;;  %v3892_v33 = vpop.f32.mrf.mxu3 }
 0x199   : > { %7146 = vst [vmem:[#allocation68_spill] sm:$0xff] %v3892_v33 }
 0x19a   : > { %v861_v25 = vlaneseq  ;;  %v3904_v17 = vstv %s3743_s8  ;;  %v929_v13 = vstv %s3746_s12  ;;  %v3964_v19 = vld [vmem:[#allocation2 + $0xb0] sm:$0xff]  ;;  %v3977_v3 = vld [vmem:[#allocation2] sm:$0xff]  ;;  %v3979_v63 = vld [vmem:[#allocation2 + $0xd8] sm:$0xff]  ;;  %s1380_s16 = sadd.s32 128, %s3746_s12 }
 0x19b   : > { %7155 = vst [vmem:[#allocation77_spill] sm:$0xff] %v3964_v19  ;;  %v3987_v59 = vld [vmem:[#allocation2 + $0x18] sm:$0xff]  ;;  %v4003_v51 = vld [vmem:[#allocation2 + $0x50] sm:$0xff] }
 0x19c   : > { %v3899_v21 = vshrl.u32 %v861_v25, 7  ;;  %v3901_v29 = vand.u32 127, %v861_v25  ;;  %7158 = vst [vmem:[#allocation80_spill] sm:$0xff] %v3977_v3  ;;  %v4054_v39 = vld [vmem:[#allocation2 + $0x30] sm:$0xff]  ;;  %v4108_v19 = vld [vmem:[#allocation2 + $0xb8] sm:$0xff] }
 0x19d   : > { %7159 = vst [vmem:[#allocation81_spill] sm:$0xff] %v3979_v63  ;;  %v4076_v63 = vld [vmem:[#allocation2 + $0x80] sm:$0xff] }
 0x19e   : > { %7147 = vst [vmem:[#allocation69_spill] sm:$0xff] %v3901_v29  ;;  %v863_v9 = vadd.s32 8, %v3899_v21  ;;  %v864_v33 = vadd.s32 16, %v3899_v21  ;;  %v865_v5 = vadd.s32 24, %v3899_v21  ;;  %v866_v1 = vadd.s32 32, %v3899_v21 }
 0x19f   : > { %v3913_v61 = vadd.s32 %v3904_v17, %v3899_v21  ;;  %v3916_v57 = vadd.s32 %v929_v13, %v3901_v29  ;;  %v867_v49 = vadd.s32 40, %v3899_v21  ;;  %v868_v45 = vadd.s32 48, %v3899_v21  ;;  %7161 = vst [vmem:[#allocation83_spill] sm:$0xff] %v3987_v59 }
 0x1a0   : > { %v3919_v25 = vadd.s32 %v3904_v17, %v863_v9  ;;  %v3922_v53 = vadd.s32 %v3904_v17, %v864_v33  ;;  %v3927_v41 = vadd.s32 %v3904_v17, %v865_v5  ;;  %v3930_v37 = vadd.s32 %v3904_v17, %v866_v1  ;;  %7164 = vst [vmem:[#allocation86_spill] sm:$0xff] %v4003_v51 }
 0x1a1   : > { %7148 = vst [vmem:[#allocation70_spill] sm:$0xff] %v3916_v57  ;;  %v869_v31 = vadd.s32 56, %v3899_v21  ;;  %v1188_v13 = vmul.f32 3.1, %v3766_v34  ;;  %vm931_vm0 = vcmp.ne.s32.totalorder %v3913_v61, %v3916_v57  ;;  %v3941_v9 = vadd.s32 %v3904_v17, %v867_v49 }
 0x1a2   : > { %7149 = vst [vmem:[#allocation71_spill] sm:$0xff] %v3927_v41  ;;  %vm932_vm1 = vcmp.ne.s32.totalorder %v3919_v25, %v3916_v57  ;;  %vm933_vm2 = vcmp.ne.s32.totalorder %v3922_v53, %v3916_v57  ;;  %v3944_v5 = vadd.s32 %v3904_v17, %v868_v45  ;;  %vm934_vm3 = vcmp.ne.s32.totalorder %v3927_v41, %v3916_v57 }
 0x1a3   : > { %7150 = vst [vmem:[#allocation72_spill] sm:$0xff] %v3930_v37  ;;  %vm935_vm4 = vcmp.ne.s32.totalorder %v3930_v37, %v3916_v57  ;;  %v3951_v1 = vadd.s32 %v3904_v17, %v869_v31  ;;  %v870_v33 = vadd.s32 64, %v3899_v21  ;;  %v3958_v49 = vsel %vm931_vm0, %v3766_v34, -inf }
 0x1a4   : > { %7151 = vst [vmem:[#allocation73_spill] sm:$0xff] %v3941_v9  ;;  %v871_v45 = vadd.s32 72, %v3899_v21  ;;  %v872_v27 = vadd.s32 80, %v3899_v21  ;;  %v3962_v23 = vmul.f32 1.442695, %v1188_v13  ;;  %v3970_v31 = vsel %vm932_vm1, %v3774_v38, -inf }
 0x1a5   : > { %7152 = vst [vmem:[#allocation74_spill] sm:$0xff] %v3944_v5  ;;  %v3973_v15 = vadd.s32 %v3904_v17, %v870_v33  ;;  %v873_v11 = vadd.s32 88, %v3899_v21  ;;  %v874_v7 = vadd.s32 96, %v3899_v21  ;;  %v3985_v13 = vsel %vm933_vm2, %v3782_v42, -inf }
 0x1a6   : > { %7153 = vst [vmem:[#allocation75_spill] sm:$0xff] %v3951_v1  ;;  %v3993_v33 = vsel %vm934_vm3, %v3790_v46, -inf  ;;  %v3999_v55 = vsel %vm935_vm4, %v3798_v50, -inf  ;;  %vm936_vm5 = vcmp.ne.s32.totalorder %v3941_v9, %v3916_v57  ;;  %vm937_vm6 = vcmp.ne.s32.totalorder %v3944_v5, %v3916_v57  ;;  %v4100_v5 = vld [vmem:[#allocation2 + $0xe8] sm:$0xff] }
 0x1a7   : > { %7154 = vst [vmem:[#allocation76_spill] sm:$0xff] %v3958_v49  ;;  %vm938_vm7 = vcmp.ne.s32.totalorder %v3951_v1, %v3916_v57  ;;  %v4010_v47 = vadd.s32 %v3904_v17, %v871_v45  ;;  %v4013_v43 = vadd.s32 %v3904_v17, %v872_v27  ;;  %vm6874_vm8 = vcmp.ne.s32.totalorder %v3973_v15, %v3916_v57  ;;  %v4052_v27 = vld [vmem:[#allocation2 + $0x68] sm:$0xff] }
 0x1a8   : > { %7156 = vst [vmem:[#allocation78_spill] sm:$0xff] %v3970_v31  ;;  %v4020_v35 = vadd.s32 %v3904_v17, %v873_v11  ;;  %v875_v29 = vadd.s32 104, %v3899_v21  ;;  %v4030_v41 = vadd.s32 %v3904_v17, %v874_v7  ;;  %v4038_v11 = vsel %vm936_vm5, %v3806_v54, -inf }
 0x1a9   : > { %7157 = vst [vmem:[#allocation79_spill] sm:$0xff] %v3973_v15  ;;  %v4044_v45 = vsel %vm937_vm6, %v3814_v58, -inf  ;;  %v4050_v7 = vsel %vm938_vm7, %v3822_v62, -inf  ;;  %v4060_v37 = vsel %vm6874_vm8, %v3830_v2, -inf  ;;  %vm6873_vm9 = vcmp.ne.s32.totalorder %v4010_v47, %v3916_v57  ;;  %v4089_v15 = vld [vmem:[#allocation2 + $0x88] sm:$0xff] }
 0x1aa   : > { %7160 = vst [vmem:[#allocation82_spill] sm:$0xff] %v3985_v13  ;;  %vm6831_vm10 = vcmp.ne.s32.totalorder %v4013_v43, %v3916_v57  ;;  %vm6829_vm11 = vcmp.ne.s32.totalorder %v4020_v35, %v3916_v57  ;;  %v4070_v51 = vadd.s32 %v3904_v17, %v875_v29  ;;  %v878_v59 = vadd.s32 128, %v3899_v21  ;;  %v4074_v13 = vld [vmem:[#allocation2 + $0x48] sm:$0xff] }
 0x1ab   : > { %7162 = vst [vmem:[#allocation84_spill] sm:$0xff] %v3993_v33  ;;  %v877_v33 = vadd.s32 120, %v3899_v21  ;;  %vm6828_vm12 = vcmp.ne.s32.totalorder %v4030_v41, %v3916_v57  ;;  %v879_v3 = vadd.s32 136, %v3899_v21  ;;  %v880_v49 = vadd.s32 144, %v3899_v21 }
 0x1ac   : > { %7163 = vst [vmem:[#allocation85_spill] sm:$0xff] %v3999_v55  ;;  %v876_v55 = vadd.s32 112, %v3899_v21  ;;  %v4095_v1 = vsel %vm6873_vm9, %v3838_v6, -inf  ;;  %v4106_v29 = vsel %vm6831_vm10, %v3846_v10, -inf  ;;  %vm6872_vm13 = vcmp.ne.s32.totalorder %v4070_v51, %v3916_v57 }
 0x1ad   : > { %7165 = vst [vmem:[#allocation87_spill] sm:$0xff] %v4010_v47  ;;  %v890_v47 = vadd.s32 224, %v3899_v21  ;;  %3307 = vpow2.f32 %v3962_v23  ;;  %v1195_v23 = vmul.f32 3.1, %v3822_v62 }
 0x1ae   : > { %7166 = vst [vmem:[#allocation88_spill] sm:$0xff] %v4013_v43  ;;  %v4081_v31 = vadd.s32 %v3904_v17, %v876_v55  ;;  %v4098_v55 = vadd.s32 %v3904_v17, %v877_v33  ;;  %v4120_v33 = vadd.s32 %v3904_v17, %v879_v3  ;;  %v4126_v43 = vld [vmem:[#allocation2 + $0x60] sm:$0xff]  ;;  %v884_v3 = vadd.s32 176, %v3899_v21 }
 0x1af   : > { %7167 = vst [vmem:[#allocation89_spill] sm:$0xff] %v4020_v35  ;;  %v4132_v35 = vsel %vm6828_vm12, %v3862_v18, -inf }
 0x1b0   : > { %7168 = vst [vmem:[#allocation90_spill] sm:$0xff] %v4030_v41  ;;  %vm6871_vm14 = vcmp.ne.s32.totalorder %v4081_v31, %v3916_v57  ;;  %vm6870_vm15 = vcmp.ne.s32.totalorder %v4098_v55, %v3916_v57 }
 0x1b1   : > { %7169 = vst [vmem:[#allocation91_spill] sm:$0xff] %v4038_v11  ;;  %v4168_v11 = vsel %vm6871_vm14, %v3878_v26, -inf }
 0x1b2   : > { %7170 = vst [vmem:[#allocation92_spill] sm:$0xff] %v4044_v45  ;;  %v4114_v45 = vsel %vm6829_vm11, %v3854_v14, -inf  ;;  %vm6868_vm11 = vcmp.ne.s32.totalorder %v4120_v33, %v3916_v57 }
 0x1b3   : > { %7171 = vst [vmem:[#allocation93_spill] sm:$0xff] %v4050_v7 }
 0x1b4   : > { %7172 = vst [vmem:[#allocation94_spill] sm:$0xff] %v4052_v27  ;;  %v881_v27 = vadd.s32 152, %v3899_v21 }
 0x1b5   : > { %7173 = vst [vmem:[#allocation95_spill] sm:$0xff] %v4054_v39  ;;  %v4117_v39 = vadd.s32 %v3904_v17, %v878_v59  ;;  %v4135_v59 = vadd.s32 %v3904_v17, %v880_v49  ;;  %v882_v49 = vadd.s32 160, %v3899_v21 }
 0x1b6   : > { %7174 = vst [vmem:[#allocation96_spill] sm:$0xff] %v4060_v37  ;;  %v4162_v37 = vsel %vm6872_vm13, %v3870_v22, -inf }
 0x1b7   : > { %7175 = vst [vmem:[#allocation97_spill] sm:$0xff] %v4070_v51  ;;  %vm6869_vm12 = vcmp.ne.s32.totalorder %v4117_v39, %v3916_v57  ;;  %vm6867_vm10 = vcmp.ne.s32.totalorder %v4135_v59, %v3916_v57  ;;  %v4210_v51 = vld [vmem:[#allocation2 + $0x40] sm:$0xff] }
 0x1b8   : > { %7176 = vst [vmem:[#allocation98_spill] sm:$0xff] %v4074_v13  ;;  %v4196_v7 = vsel %vm6869_vm12, %v3770_v36, -inf  ;;  %v4205_v13 = vadd.s32 %v3904_v17, %v882_v49 }
 0x1b9   : > { %7177 = vst [vmem:[#allocation99_spill] sm:$0xff] %v4076_v63  ;;  %v4190_v63 = vld [vmem:[#allocation2 + $0x38] sm:$0xff] }
 0x1ba   : > { %7178 = vst [vmem:[#allocation100_spill] sm:$0xff] %v4081_v31  ;;  %v4208_v31 = vld [vmem:[#allocation2 + $0x58] sm:$0xff] }
 0x1bb   : > { %7179 = vst [vmem:[#allocation101_spill] sm:$0xff] %v4089_v15  ;;  %v4188_v15 = vld [vmem:[#allocation2 + $0x78] sm:$0xff] }
 0x1bc   : > { %7180 = vst [vmem:[#allocation102_spill] sm:$0xff] %v4095_v1  ;;  %v883_v1 = vadd.s32 168, %v3899_v21 }
 0x1bd   : > { %7181 = vst [vmem:[#allocation103_spill] sm:$0xff] %v4098_v55  ;;  %v887_v55 = vadd.s32 200, %v3899_v21 }
 0x1be   : > { %7182 = vst [vmem:[#allocation104_spill] sm:$0xff] %v4100_v5  ;;  %v886_v5 = vadd.s32 192, %v3899_v21  ;;  %v4219_v41 = vadd.s32 %v3904_v17, %v883_v1  ;;  %v4267_v1 = vld [vmem:[#allocation2 + $0xc8] sm:$0xff] }
 0x1bf   : > { %7183 = vst [vmem:[#allocation105_spill] sm:$0xff] %v4106_v29  ;;  %v885_v29 = vadd.s32 184, %v3899_v21 }
 0x1c0   : > { %7184 = vst [vmem:[#allocation106_spill] sm:$0xff] %v4108_v19  ;;  %v4184_v19 = vadd.s32 %v3904_v17, %v881_v27  ;;  %v4202_v27 = vsel %vm6868_vm11, %v3778_v40, -inf  ;;  %v4232_v36 = vadd.s32 %v3904_v17, %v886_v5  ;;  %vm6879_vm11 = vcmp.ne.s32.totalorder %v4205_v13, %v3916_v57 }
 0x1c1   : > { %7185 = vst [vmem:[#allocation107_spill] sm:$0xff] %v4114_v45  ;;  %v4181_v45 = vsel %vm6870_vm15, %v3886_v30, -inf  ;;  %v4225_v49 = vadd.s32 %v3904_v17, %v885_v29  ;;  %v4240_v29 = vadd.s32 %v3904_v17, %v887_v55  ;;  %vm952_vm12 = vcmp.ne.s32.totalorder %v4219_v41, %v3916_v57 }
 0x1c2   : > { %7186 = vst [vmem:[#allocation108_spill] sm:$0xff] %v4117_v39  ;;  %v4216_v39 = vsel %vm6867_vm10, %v3786_v44, -inf  ;;  %v889_v44 = vadd.s32 216, %v3899_v21  ;;  %vm950_vm10 = vcmp.ne.s32.totalorder %v4184_v19, %v3916_v57  ;;  %vm6908_vm13 = vcmp.ne.s32.totalorder %v4232_v36, %v3916_v57 }
 0x1c3   : > { %7187 = vst [vmem:[#allocation109_spill] sm:$0xff] %v4120_v33  ;;  %v4222_v33 = vadd.s32 %v3904_v17, %v884_v3  ;;  %vm6920_vm14 = vcmp.ne.s32.totalorder %v4225_v49, %v3916_v57  ;;  %v891_v3 = vadd.s32 232, %v3899_v21  ;;  %v4273_v40 = vsel %vm950_vm10, %v3794_v48, -inf }
 0x1c4   : > { %7188 = vst [vmem:[#allocation110_spill] sm:$0xff] %v4126_v43  ;;  %v4175_v43 = vld [vmem:[#allocation2 + $0x8] sm:$0xff]  ;;  %v4263_v5 = vadd.s32 %v3904_v17, %v889_v44  ;;  %vm6906_vm9 = vcmp.ne.s32.totalorder %v4240_v29, %v3916_v57  ;;  %v4285_v44 = vld [vmem:[#allocation2 + $0xe0] sm:$0xff] }
 0x1c5   : > { %7189 = vst [vmem:[#allocation111_spill] sm:$0xff] %v4132_v35  ;;  %v4173_v35 = vld [vmem:[#allocation2 + $0xf0] sm:$0xff]  ;;  %vm953_vm15 = vcmp.ne.s32.totalorder %v4222_v33, %v3916_v57 }
 0x1c6   : > { %7190 = vst [vmem:[#allocation112_spill] sm:$0xff] %v4135_v59  ;;  %v888_v59 = vadd.s32 208, %v3899_v21 }
 0x1c7   : > { %7191 = vst [vmem:[#allocation113_spill] sm:$0xff] %v4162_v37 }
 0x1c8   : > { %7192 = vst [vmem:[#allocation114_spill] sm:$0xff] %v4168_v11  ;;  %v4258_v55 = vadd.s32 %v3904_v17, %v888_v59  ;;  %v4279_v59 = vsel %vm6879_vm11, %v3802_v52, -inf  ;;  %vm6904_vm11 = vcmp.ne.s32.totalorder %v4263_v5, %v3916_v57  ;;  %v4322_v11 = vsel %vm6908_vm13, %v3834_v4, -inf }
 0x1c9   : > { %7193 = vst [vmem:[#allocation115_spill] sm:$0xff] %v4173_v35  ;;  %v4328_v35 = vld [vmem:[#allocation2 + $0xd0] sm:$0xff] }
 0x1ca   : > { %7194 = vst [vmem:[#allocation116_spill] sm:$0xff] %v4175_v43  ;;  %vm6900_vm8 = vcmp.ne.s32.totalorder %v4258_v55, %v3916_v57  ;;  %v892_v43 = vadd.s32 240, %v3899_v21 }
 0x1cb   : > { %7195 = vst [vmem:[#allocation117_spill] sm:$0xff] %v4181_v45  ;;  %v4314_v45 = vsel %vm6920_vm14, %v3826_v0, -inf }
 0x1cc   : > { %7196 = vst [vmem:[#allocation118_spill] sm:$0xff] %v4184_v19 }
 0x1cd   : > { %7197 = vst [vmem:[#allocation119_spill] sm:$0xff] %v4188_v15  ;;  %v4316_v15 = vld [vmem:[#allocation2 + $0xa8] sm:$0xff] }
 0x1ce   : > { %7198 = vst [vmem:[#allocation120_spill] sm:$0xff] %v4190_v63  ;;  %v4308_v63 = vld [vmem:[#allocation2 + $0xc0] sm:$0xff] }
 0x1cf   : > { %7199 = vst [vmem:[#allocation121_spill] sm:$0xff] %v4196_v7  ;;  %v4306_v7 = vadd.s32 %v3904_v17, %v890_v47  ;;  %v893_v47 = vadd.s32 248, %v3899_v21  ;;  %v4345_v21 = vadd.s32 %v3904_v17, %v891_v3  ;;  %v1189_v3 = vmul.f32 3.1, %v3774_v38 }
 0x1d0   : > { %7200 = vst [vmem:[#allocation122_spill] sm:$0xff] %v4202_v27  ;;  %v4295_v27 = vld [vmem:[#allocation2 + $0x70] sm:$0xff] }
 0x1d1   : > { %7201 = vst [vmem:[#allocation123_spill] sm:$0xff] %v4205_v13  ;;  %v1222_v37 = vmul.f32 1.442695, %v1189_v3 }
 0x1d2   : > { %7202 = vst [vmem:[#allocation124_spill] sm:$0xff] %v4208_v31  ;;  %v4301_v31 = vsel %vm953_vm15, %v3818_v60, -inf }
 0x1d3   : > { %7203 = vst [vmem:[#allocation125_spill] sm:$0xff] %v4210_v51  ;;  %v4293_v51 = vsel %vm952_vm12, %v3810_v56, -inf  ;;  %3309 = vpow2.f32 %v1222_v37 }
 0x1d4   : > { %7204 = vst [vmem:[#allocation126_spill] sm:$0xff] %v4216_v39  ;;  %v4287_v39 = vld [vmem:[#allocation2 + $0x90] sm:$0xff] }
 0x1d5   : > { %7205 = vst [vmem:[#allocation127_spill] sm:$0xff] %v4219_v41 }
 0x1d6   : > { %7206 = vst [vmem:[#allocation128_spill] sm:$0xff] %v4222_v33  ;;  %v4336_v33 = vld [vmem:[#allocation2 + $0x10] sm:$0xff] }
 0x1d7   : > { %7207 = vst [vmem:[#allocation129_spill] sm:$0xff] %v4225_v49  ;;  %v4334_v49 = vsel %vm6906_vm9, %v3842_v8, -inf }
 0x1d8   : > { %7208 = vst [vmem:[#allocation130_spill] sm:$0xff] %v4232_v36  ;;  %v4342_v36 = vsel %vm6900_vm8, %v3850_v12, -inf  ;;  %vm6914_vm8 = vcmp.ne.s32.totalorder %v4306_v7, %v3916_v57 }
 0x1d9   : > { %7209 = vst [vmem:[#allocation131_spill] sm:$0xff] %v4240_v29  ;;  %v4353_v29 = vld [vmem:[#allocation2 + $0x28] sm:$0xff] }
 0x1da   : > { %7210 = vst [vmem:[#allocation132_spill] sm:$0xff] %v4258_v55  ;;  %v4359_v55 = vsel %vm6904_vm11, %v3858_v16, -inf  ;;  %vm6917_vm11 = vcmp.ne.s32.totalorder %v4345_v21, %v3916_v57 }
 0x1db   : > { %7211 = vst [vmem:[#allocation133_spill] sm:$0xff] %v4263_v5 }
 0x1dc   : > { %7212 = vst [vmem:[#allocation134_spill] sm:$0xff] %v4267_v1  ;;  %v4386_v1 = vld [vmem:[#allocation2 + $0xa0] sm:$0xff] }
 0x1dd   : > { %7213 = vst [vmem:[#allocation135_spill] sm:$0xff] %v4273_v40  ;;  %v4368_v40 = vstv %s3760_s24 }
 0x1de   : > { %7214 = vst [vmem:[#allocation136_spill] sm:$0xff] %v4279_v59  ;;  %vm1092_vm9 = vcmp.gt.f32.partialorder %v3766_v34, %v4368_v40  ;;  %vm1094_vm14 = vcmp.gt.f32.partialorder %v3782_v42, %v4368_v40  ;;  %v1164_v59 = vld [vmem:[#allocation3 + $0xd0] sm:$0xff] }
 0x1df   : > { %7215 = vst [vmem:[#allocation137_spill] sm:$0xff] %v4287_v39 }
 0x1e0   : > { %7216 = vst [vmem:[#allocation138_spill] sm:$0xff] %v4293_v51  ;;  %v4378_v51 = vadd.s32 %v3904_v17, %v893_v47  ;;  %v1192_v47 = vmul.f32 3.1, %v3798_v50 }
 0x1e1   : > { %7217 = vst [vmem:[#allocation139_spill] sm:$0xff] %v4295_v27  ;;  %v4375_v27 = vadd.s32 %v3904_v17, %v892_v43  ;;  %v4392_v43 = vsel %vm6914_vm8, %v3866_v20, -inf  ;;  %v1191_v17 = vmul.f32 3.1, %v3790_v46 }
 0x1e2   : > { %7218 = vst [vmem:[#allocation140_spill] sm:$0xff] %v4301_v31  ;;  %vm6924_vm8 = vcmp.ne.s32.totalorder %v4378_v51, %v3916_v57 }
 0x1e3   : > { %7219 = vst [vmem:[#allocation141_spill] sm:$0xff] %v4306_v7  ;;  %vm6919_vm13 = vcmp.ne.s32.totalorder %v4375_v27, %v3916_v57 }
 0x1e4   : > { %7220 = vst [vmem:[#allocation142_spill] sm:$0xff] %v4308_v63  ;;  %v4421_v37 = vsel %vm6919_vm13, %v3882_v28, -inf  ;;  %vm4436_vm13 = vmand %vm931_vm0, %vm1092_vm9  ;;  %vm1095_vm0 = vcmp.gt.f32.partialorder %v3790_v46, %v4368_v40  ;;  %v7250_v46 = vld [vmem:[#allocation72_spill] sm:$0xff] }
 0x1e5   : > { %7221 = vst [vmem:[#allocation143_spill] sm:$0xff] %v4314_v45 }
 0x1e6   : > { %7222 = vst [vmem:[#allocation144_spill] sm:$0xff] %v4316_v15  ;;  %v3308_v15 = vpop.eup %3307 }
 0x1e7   : > { %7223 = vst [vmem:[#allocation145_spill] sm:$0xff] %v4322_v11  ;;  %v1190_v11 = vmul.f32 3.1, %v3782_v42  ;;  %v3310_v34 = vpop.eup %3309  ;;  %v7264_v42 = vld [vmem:[#allocation79_spill] sm:$0xff] }
 0x1e8   : > { %7224 = vst [vmem:[#allocation146_spill] sm:$0xff] %v4328_v35 }
 0x1e9   : > { %7225 = vst [vmem:[#allocation147_spill] sm:$0xff] %v4334_v49  ;;  %v1224_v31 = vmul.f32 1.442695, %v1190_v11  ;;  %v4407_v49 = vsel %vm6917_vm11, %v3874_v24, -inf  ;;  %v4410_v11 = vld [vmem:[#allocation2 + $0xf8] sm:$0xff]  ;;  %vm1093_vm11 = vcmp.gt.f32.partialorder %v3774_v38, %v4368_v40  ;;  %v7256_v38 = vld [vmem:[#allocation74_spill] sm:$0xff] }
 0x1ea   : > { %7226 = vst [vmem:[#allocation148_spill] sm:$0xff] %v4336_v33  ;;  %v1194_v33 = vmul.f32 3.1, %v3814_v58  ;;  %vm4462_vm9 = vmand %vm932_vm1, %vm1093_vm11  ;;  %vm1097_vm11 = vcmp.gt.f32.partialorder %v3806_v54, %v4368_v40 }
 0x1eb   : > { %7227 = vst [vmem:[#allocation149_spill] sm:$0xff] %v4342_v36  ;;  %v1228_v36 = vmul.f32 1.442695, %v1192_v47  ;;  %3311 = vpow2.f32 %v1224_v31  ;;  %v1199_v47 = vmul.f32 3.1, %v3854_v14  ;;  %vm4477_vm1 = vmand %vm933_vm2, %vm1094_vm14  ;;  %vm1098_vm2 = vcmp.gt.f32.partialorder %v3814_v58, %v4368_v40  ;;  %v1159_v58 = vld [vmem:[#allocation3 + $0x78] sm:$0xff] }
 0x1ec   : > { %7228 = vst [vmem:[#allocation150_spill] sm:$0xff] %v4345_v21  ;;  %v1232_v3 = vmul.f32 1.442695, %v1194_v33  ;;  %v4423_v21 = vld [vmem:[#allocation2 + $0x20] sm:$0xff]  ;;  %v1197_v33 = vmul.f32 3.1, %v3838_v6  ;;  %vm1099_vm14 = vcmp.gt.f32.partialorder %v3822_v62, %v4368_v40 }
 0x1ed   : > { %7229 = vst [vmem:[#allocation151_spill] sm:$0xff] %v4353_v29  ;;  %v1226_v29 = vmul.f32 1.442695, %v1191_v17  ;;  %v1196_v17 = vmul.f32 3.1, %v3830_v2 }
 0x1ee   : > { %7230 = vst [vmem:[#allocation152_spill] sm:$0xff] %v4359_v55  ;;  %v1193_v55 = vmul.f32 3.1, %v3806_v54  ;;  %v1203_v62 = vmul.f32 3.1, %v3886_v30 }
 0x1ef   : > { %7231 = vst [vmem:[#allocation153_spill] sm:$0xff] %v4375_v27  ;;  %3313 = vpow2.f32 %v1226_v29  ;;  %v1236_v31 = vmul.f32 1.442695, %v1196_v17  ;;  %v4449_v17 = vsel %vm6924_vm8, %v3890_v32, -inf  ;;  %vm1096_vm8 = vcmp.gt.f32.partialorder %v3798_v50, %v4368_v40  ;;  %v7260_v27 = vld [vmem:[#allocation75_spill] sm:$0xff] }
 0x1f0   : > { %7232 = vst [vmem:[#allocation154_spill] sm:$0xff] %v4378_v51  ;;  %v1230_v35 = vmul.f32 1.442695, %v1193_v55  ;;  %v1234_v55 = vmul.f32 1.442695, %v1195_v23  ;;  %3315 = vpow2.f32 %v1228_v36  ;;  %v4443_v23 = vld [vmem:[#allocation2 + $0x98] sm:$0xff] }
 0x1f1   : > { %7233 = vst [vmem:[#allocation155_spill] sm:$0xff] %v4386_v1  ;;  %v1198_v36 = vmul.f32 3.1, %v3846_v10  ;;  %v1285_v29 = vsel %vm4462_vm9, %v3310_v34, 0.0  ;;  %v1158_v34 = vld [vmem:[#allocation3 + $0xe8] sm:$0xff]  ;;  %vm4536_vm9 = vmand %vm937_vm6, %vm1098_vm2 }
 0x1f2   : > { %7234 = vst [vmem:[#allocation156_spill] sm:$0xff] %v4392_v43  ;;  %3317 = vpow2.f32 %v1230_v35  ;;  %v1156_v43 = vld [vmem:[#allocation3 + $0x80] sm:$0xff]  ;;  %v1284_v35 = vsel %vm4436_vm13, %v3308_v15, 0.0  ;;  %v7247_v15 = vld [vmem:[#allocation71_spill] sm:$0xff]  ;;  %vm4491_vm13 = vmand %vm934_vm3, %vm1095_vm0  ;;  %vm1100_vm0 = vcmp.gt.f32.partialorder %v3830_v2, %v4368_v40 }
 0x1f3   : > { %7235 = vst [vmem:[#allocation157_spill] sm:$0xff] %v4407_v49  ;;  %3319 = vpow2.f32 %v1232_v3  ;;  %v1200_v3 = vmul.f32 3.1, %v3862_v18  ;;  %vm4507_vm3 = vmand %vm935_vm4, %vm1096_vm8  ;;  %v4514_v51 = vadd.f32 %v1284_v35, %v1156_v43  ;;  %vm1101_vm8 = vcmp.gt.f32.partialorder %v3838_v6, %v4368_v40 }
 0x1f4   : > { %7236 = vst [vmem:[#allocation158_spill] sm:$0xff] %v4410_v11  ;;  %3321 = vpow2.f32 %v1234_v55  ;;  %v3312_v11 = vpop.eup %3311  ;;  %v1238_v55 = vmul.f32 1.442695, %v1197_v33  ;;  %vm4524_vm4 = vmand %vm936_vm5, %vm1097_vm11  ;;  %vm1102_vm5 = vcmp.gt.f32.partialorder %v3846_v10, %v4368_v40  ;;  %v1202_v35 = vmul.f32 3.1, %v3878_v26 }
 0x1f5   : > { %7237 = vst [vmem:[#allocation159_spill] sm:$0xff] %v4421_v37  ;;  %3323 = vpow2.f32 %v1236_v31  ;;  %v3314_v37 = vpop.eup %3313  ;;  %v1240_v31 = vmul.f32 1.442695, %v1198_v36  ;;  %v1201_v36 = vmul.f32 3.1, %v3870_v22  ;;  %v1286_v49 = vsel %vm4477_vm1, %v3312_v11, 0.0  ;;  %vm4555_vm6 = vmand %vm938_vm7, %vm1099_vm14 }
 0x1f6   : > { %7238 = vst [vmem:[#allocation160_spill] sm:$0xff] %v4423_v21  ;;  %v3316_v33 = vpop.eup %3315  ;;  %v1157_v21 = vld [vmem:[#allocation3 + $0xc8] sm:$0xff]  ;;  %3325 = vpow2.f32 %v1238_v55  ;;  %vm1103_vm1 = vcmp.gt.f32.partialorder %v3854_v14, %v4368_v40  ;;  %vm1104_vm11 = vcmp.gt.f32.partialorder %v3862_v18, %v4368_v40  ;;  %vm1105_vm7 = vcmp.gt.f32.partialorder %v3870_v22, %v4368_v40  ;;  %v1167_v14 = vld [vmem:[#allocation3 + $0x40] sm:$0xff] }
 0x1f7   : > { %7241 = vst [vmem:[#allocation161_spill] sm:$0xff] %v4443_v23  ;;  %v1242_v23 = vmul.f32 1.442695, %v1199_v47  ;;  %v1244_v47 = vmul.f32 1.442695, %v1200_v3  ;;  %v4545_v54 = vadd.f32 %v1285_v29, %v1157_v21  ;;  %3327 = vpow2.f32 %v1240_v31 }
 0x1f8   : > { %7242 = vst [vmem:[#allocation162_spill] sm:$0xff] %v4449_v17  ;;  %v3318_v1 = vpop.eup %3317  ;;  %v4561_v29 = vadd.f32 %v1286_v49, %v1158_v34  ;;  %v1246_v31 = vmul.f32 1.442695, %v1201_v36  ;;  %v1288_v34 = vsel %vm4507_vm3, %v3316_v33, 0.0  ;;  %v1161_v49 = vld [vmem:[#allocation3 + $0x90] sm:$0xff]  ;;  %v1163_v36 = vld [vmem:[#allocation3 + $0xa8] sm:$0xff]  ;;  %vm1106_vm14 = vcmp.gt.f32.partialorder %v3878_v26, %v4368_v40 }
 0x1f9   : > { %7253 = vst [vmem:[#allocation163_spill] sm:$0xff] %v4514_v51  ;;  %v3320_v43 = vpop.eup %3319  ;;  %v1287_v51 = vsel %vm4491_vm13, %v3314_v37, 0.0  ;;  %vm7265_vm13 = vcmp.ne.s32.totalorder %v7264_v42, %v3916_v57  ;;  %3329 = vpow2.f32 %v1242_v23  ;;  %v1289_v2 = vsel %vm4524_vm4, %v3318_v1, 0.0  ;;  %v1162_v23 = vld [vmem:[#allocation3 + $0x58] sm:$0xff] }
 0x1fa   : > { %v3322_v3 = vpop.eup %3321  ;;  %7259 = vst [vmem:[#allocation74_spill] sm:$0xff] %v4545_v54  ;;  %vm4569_vm2 = vmand %vm7265_vm13, %vm1100_vm0  ;;  %v1160_v54 = vld [vmem:[#allocation3 + $0x8] sm:$0xff]  ;;  %3331 = vpow2.f32 %v1244_v47  ;;  %v4581_v63 = vadd.f32 %v1287_v51, %v1159_v58  ;;  %v1290_v39 = vsel %vm4536_vm9, %v3320_v43, 0.0  ;;  %v1248_v17 = vmul.f32 1.442695, %v1202_v35  ;;  %v7270_v47 = vld [vmem:[#allocation11_spill] sm:$0xff] }
 0x1fb   : > { %v3324_v21 = vpop.eup %3323  ;;  %7263 = vst [vmem:[#allocation75_spill] sm:$0xff] %v4561_v29  ;;  %v7268_v29 = vld [vmem:[#allocation7_spill] sm:$0xff]  ;;  %v1291_v33 = vsel %vm4555_vm6, %v3322_v3, 0.0  ;;  %v1250_v1 = vmul.f32 1.442695, %v1203_v62  ;;  %v4594_v11 = vadd.f32 %v1289_v2, %v1161_v49  ;;  %vm1107_vm4 = vcmp.gt.f32.partialorder %v3886_v30, %v4368_v40  ;;  %v7294_v49 = vld [vmem:[#allocation97_spill] sm:$0xff] }
 0x1fc   : > { %v1204_v45 = vmul.f32 3.1, %v7268_v29  ;;  %7269 = vst [vmem:[#allocation79_spill] sm:$0xff] %v4581_v63  ;;  %v1292_v50 = vsel %vm4569_vm2, %v3324_v21, 0.0  ;;  %v1205_v51 = vmul.f32 3.1, %v7270_v47  ;;  %v3326_v58 = vpop.eup %3325  ;;  %v4592_v63 = vadd.f32 %v1288_v34, %v1160_v54 }
 0x1fd   : > { %7272 = vst [vmem:[#allocation165_spill] sm:$0xff] %v4594_v11  ;;  %v7273_v43 = vld [vmem:[#allocation87_spill] sm:$0xff]  ;;  %v3328_v3 = vpop.eup %3327  ;;  %v4608_v55 = vadd.f32 %v1290_v39, %v1162_v23  ;;  %v7278_v54 = vld [vmem:[#allocation88_spill] sm:$0xff]  ;;  %3333 = vpow2.f32 %v1246_v31  ;;  %v4624_v39 = vadd.f32 %v1292_v50, %v1164_v59  ;;  %v7284_v34 = vld [vmem:[#allocation89_spill] sm:$0xff]  ;;  %v1208_v18 = vmul.f32 3.1, %v3802_v52 }
 0x1fe   : > { %7271 = vst [vmem:[#allocation164_spill] sm:$0xff] %v4592_v63  ;;  %vm7274_vm3 = vcmp.ne.s32.totalorder %v7273_v43, %v3916_v57  ;;  %v1252_v62 = vmul.f32 1.442695, %v1204_v45  ;;  %vm7279_vm9 = vcmp.ne.s32.totalorder %v7278_v54, %v3916_v57  ;;  %v1254_v21 = vmul.f32 1.442695, %v1205_v51  ;;  %v7288_v31 = vld [vmem:[#allocation15_spill] sm:$0xff] }
 0x1ff   : > { %vm4602_vm0 = vmand %vm7274_vm3, %vm1101_vm8  ;;  %7277 = vst [vmem:[#allocation87_spill] sm:$0xff] %v4608_v55  ;;  %vm1108_vm8 = vcmp.gt.f32.partialorder %v7268_v29, %v4368_v40  ;;  %v3330_v37 = vpop.eup %3329  ;;  %v4622_v45 = vadd.f32 %v1291_v33, %v1163_v36  ;;  %vm7285_vm13 = vcmp.ne.s32.totalorder %v7284_v34, %v3916_v57  ;;  %3335 = vpow2.f32 %v1248_v17  ;;  %v1165_v51 = vld [vmem:[#allocation3 + $0xb0] sm:$0xff]  ;;  %v7289_v59 = vld [vmem:[#allocation90_spill] sm:$0xff] }
 0x200   : > { %vm4616_vm6 = vmand %vm7279_vm9, %vm1102_vm5  ;;  %7283 = vst [vmem:[#allocation167_spill] sm:$0xff] %v4624_v39  ;;  %v1206_v23 = vmul.f32 3.1, %v7288_v31  ;;  %v3332_v10 = vpop.eup %3331  ;;  %v1293_v36 = vsel %vm4602_vm0, %v3326_v58, 0.0  ;;  %vm7290_vm2 = vcmp.ne.s32.totalorder %v7289_v59, %v3916_v57  ;;  %3337 = vpow2.f32 %v1250_v1  ;;  %v1166_v50 = vld [vmem:[#allocation3 + $0x38] sm:$0xff]  ;;  %v7313_v29 = vld [vmem:[#allocation109_spill] sm:$0xff] }
 0x201   : > { %7282 = vst [vmem:[#allocation166_spill] sm:$0xff] %v4622_v45  ;;  %vm4632_vm5 = vmand %vm7285_vm13, %vm1103_vm1  ;;  %vm1109_vm1 = vcmp.gt.f32.partialorder %v7270_v47, %v4368_v40  ;;  %v1207_v17 = vmul.f32 3.1, %v3794_v48  ;;  %v1294_v58 = vsel %vm4616_vm6, %v3328_v3, 0.0  ;;  %3339 = vpow2.f32 %v1252_v62  ;;  %v1168_v45 = vld [vmem:[#allocation3 + $0xe0] sm:$0xff] }
 0x202   : > { %vm4645_vm3 = vmand %vm7290_vm2, %vm1104_vm11  ;;  %v1256_v35 = vmul.f32 1.442695, %v1206_v23  ;;  %v1295_v6 = vsel %vm4632_vm5, %v3330_v37, 0.0  ;;  %3341 = vpow2.f32 %v1254_v21  ;;  %v1209_v1 = vmul.f32 3.1, %v3810_v56  ;;  %v1170_v21 = vld [vmem:[#allocation3 + $0x18] sm:$0xff] }
 0x203   : > { %v1258_v39 = vmul.f32 1.442695, %v1207_v17  ;;  %v1296_v55 = vsel %vm4645_vm3, %v3332_v10, 0.0  ;;  %v1260_v11 = vmul.f32 1.442695, %v1208_v18  ;;  %v3334_v62 = vpop.eup %3333  ;;  %v4661_v2 = vadd.f32 %v1293_v36, %v1165_v51  ;;  %v7299_v51 = vld [vmem:[#allocation100_spill] sm:$0xff] }
 0x204   : > { %3343 = vpow2.f32 %v1256_v35  ;;  %v1210_v3 = vmul.f32 3.1, %v3818_v60  ;;  %vm7295_vm11 = vcmp.ne.s32.totalorder %v7294_v49, %v3916_v57  ;;  %v1262_v37 = vmul.f32 1.442695, %v1209_v1 }
 0x205   : > { %7293 = vst [vmem:[#allocation168_spill] sm:$0xff] %v4661_v2  ;;  %vm4669_vm0 = vmand %vm7295_vm11, %vm1105_vm7  ;;  %3345 = vpow2.f32 %v1258_v39  ;;  %v1211_v10 = vmul.f32 3.1, %v3826_v0  ;;  %v3336_v18 = vpop.eup %3335  ;;  %v4674_v23 = vadd.f32 %v1294_v58, %v1166_v50  ;;  %vm7300_vm9 = vcmp.ne.s32.totalorder %v7299_v51, %v3916_v57  ;;  %v7305_v58 = vld [vmem:[#allocation103_spill] sm:$0xff] }
 0x206   : > { %vm4682_vm6 = vmand %vm7300_vm9, %vm1106_vm14  ;;  %vm1110_vm7 = vcmp.gt.f32.partialorder %v7288_v31, %v4368_v40  ;;  %3347 = vpow2.f32 %v1260_v11  ;;  %v1264_v39 = vmul.f32 1.442695, %v1210_v3  ;;  %v3338_v33 = vpop.eup %3337  ;;  %v4688_v17 = vadd.f32 %v1295_v6, %v1167_v14  ;;  %v7309_v6 = vld [vmem:[#allocation108_spill] sm:$0xff]  ;;  %v1169_v3 = vld [vmem:[#allocation3 + $0x60] sm:$0xff] }
 0x207   : > { %7298 = vst [vmem:[#allocation169_spill] sm:$0xff] %v4674_v23  ;;  %v4690_v50 = vadd.f32 %v1296_v55, %v1168_v45  ;;  %vm7306_vm13 = vcmp.ne.s32.totalorder %v7305_v58, %v3916_v57  ;;  %3349 = vpow2.f32 %v1262_v37  ;;  %v1266_v1 = vmul.f32 1.442695, %v1211_v10  ;;  %v3340_v26 = vpop.eup %3339  ;;  %v1172_v23 = vld [vmem:[#allocation3 + $0x10] sm:$0xff]  ;;  %v1178_v31 = vld [vmem:[#allocation3 + $0x20] sm:$0xff] }
 0x208   : > { %7303 = vst [vmem:[#allocation100_spill] sm:$0xff] %v4688_v17  ;;  %vm4698_vm14 = vmand %vm7306_vm13, %vm1107_vm4  ;;  %v1297_v11 = vsel %vm4669_vm0, %v3334_v62, 0.0  ;;  %vm7310_vm5 = vcmp.ne.s32.totalorder %v7309_v6, %v3916_v57  ;;  %vm1111_vm4 = vcmp.gt.f32.partialorder %v3794_v48, %v4368_v40  ;;  %3351 = vpow2.f32 %v1264_v39  ;;  %v3342_v45 = vpop.eup %3341  ;;  %v7317_v39 = vld [vmem:[#allocation112_spill] sm:$0xff] }
 0x209   : > { %7304 = vst [vmem:[#allocation170_spill] sm:$0xff] %v4690_v50  ;;  %vm4710_vm2 = vmand %vm7310_vm5, %vm1108_vm8  ;;  %v1212_v55 = vmul.f32 3.1, %v3834_v4  ;;  %v1298_v62 = vsel %vm4682_vm6, %v3336_v18, 0.0  ;;  %vm7314_vm8 = vcmp.ne.s32.totalorder %v7313_v29, %v3916_v57  ;;  %vm1112_vm11 = vcmp.gt.f32.partialorder %v3802_v52, %v4368_v40  ;;  %v1171_v18 = vld [vmem:[#allocation3 + $0x68] sm:$0xff] }
 0x20a   : > { %vm4725_vm3 = vmand %vm7314_vm8, %vm1109_vm1  ;;  %vm1113_vm0 = vcmp.gt.f32.partialorder %v3810_v56, %v4368_v40  ;;  %v1213_v10 = vmul.f32 3.1, %v3842_v8  ;;  %v3344_v36 = vpop.eup %3343  ;;  %v1299_v47 = vsel %vm4698_vm14, %v3338_v33, 0.0  ;;  %vm7318_vm1 = vcmp.ne.s32.totalorder %v7317_v39, %v3916_v57 }
 0x20b   : > { %vm4742_vm9 = vmand %vm7318_vm1, %vm1110_vm7  ;;  %3353 = vpow2.f32 %v1266_v1  ;;  %v1268_v22 = vmul.f32 1.442695, %v1212_v55  ;;  %v1214_v50 = vmul.f32 3.1, %v3850_v12  ;;  %v3346_v17 = vpop.eup %3345  ;;  %v1300_v35 = vsel %vm4710_vm2, %v3340_v26, 0.0  ;;  %v7360_v26 = vld [vmem:[#allocation10_spill] sm:$0xff] }
 0x20c   : > { %vm4755_vm6 = vmand %vm950_vm10, %vm1111_vm4  ;;  %vm1114_vm7 = vcmp.gt.f32.partialorder %v3818_v60, %v4368_v40  ;;  %v1270_v33 = vmul.f32 1.442695, %v1213_v10  ;;  %v1215_v1 = vmul.f32 3.1, %v3858_v16  ;;  %v3348_v55 = vpop.eup %3347  ;;  %v4762_v2 = vadd.f32 %v1297_v11, %v1169_v3  ;;  %v1173_v3 = vld [vmem:[#allocation3 + $0x70] sm:$0xff] }
 0x20d   : > { %vm7324_vm13 = vcmp.ne.s32.totalorder %v4205_v13, %v3916_v57  ;;  %3355 = vpow2.f32 %v1268_v22  ;;  %v1272_v14 = vmul.f32 1.442695, %v1214_v50  ;;  %v1216_v10 = vmul.f32 3.1, %v3866_v20  ;;  %v3350_v48 = vpop.eup %3349  ;;  %vm4787_vm10 = vmand %vm952_vm12, %vm1113_vm0 }
 0x20e   : > { %7323 = vst [vmem:[#allocation103_spill] sm:$0xff] %v4762_v2  ;;  %vm4770_vm14 = vmand %vm7324_vm13, %vm1112_vm11  ;;  %v4775_v63 = vadd.f32 %v1298_v62, %v1170_v21  ;;  %v4777_v11 = vadd.f32 %v1299_v47, %v1171_v18  ;;  %v1301_v52 = vsel %vm4725_vm3, %v3342_v45, 0.0  ;;  %vm1115_vm5 = vcmp.gt.f32.partialorder %v3826_v0, %v4368_v40  ;;  %v3352_v50 = vpop.eup %3351  ;;  %v7332_v45 = vld [vmem:[#allocation128_spill] sm:$0xff]  ;;  %v1175_v18 = vld [vmem:[#allocation3 + $0xa0] sm:$0xff] }
 0x20f   : > { %v4793_v21 = vadd.f32 %v1300_v35, %v1172_v23  ;;  %vm4801_vm2 = vmand %vm953_vm15, %vm1114_vm7  ;;  %vm1116_vm12 = vcmp.gt.f32.partialorder %v3834_v4, %v4368_v40  ;;  %vm1117_vm4 = vcmp.gt.f32.partialorder %v3842_v8, %v4368_v40  ;;  %3357 = vpow2.f32 %v1270_v33  ;;  %v1174_v23 = vld [vmem:[#allocation3 + $0x50] sm:$0xff]  ;;  %v7336_v33 = vld [vmem:[#allocation129_spill] sm:$0xff] }
 0x210   : > { %7327 = vst [vmem:[#allocation108_spill] sm:$0xff] %v4775_v63  ;;  %v1302_v37 = vsel %vm4742_vm9, %v3344_v36, 0.0  ;;  %v1303_v47 = vsel %vm4755_vm6, %v3346_v17, 0.0  ;;  %3359 = vpow2.f32 %v1272_v14  ;;  %v1274_v35 = vmul.f32 1.442695, %v1215_v1  ;;  %v1179_v4 = vld [vmem:[#allocation3 + $0xf0] sm:$0xff] }
 0x211   : > { %7328 = vst [vmem:[#allocation171_spill] sm:$0xff] %v4777_v11  ;;  %v3354_v60 = vpop.eup %3353  ;;  %v4814_v56 = vadd.f32 %v1301_v52, %v1173_v3  ;;  %v1304_v11 = vsel %vm4770_vm14, %v3348_v55, 0.0  ;;  %vm7337_vm15 = vcmp.ne.s32.totalorder %v7336_v33, %v3916_v57  ;;  %vm1118_vm3 = vcmp.gt.f32.partialorder %v3850_v12, %v4368_v40  ;;  %v1177_v52 = vld [vmem:[#allocation3 + $0x30] sm:$0xff]  ;;  %v7340_v55 = vld [vmem:[#allocation130_spill] sm:$0xff]  ;;  %v7362_v12 = vld [vmem:[#allocation77_spill] sm:$0xff] }
 0x212   : > { %7331 = vst [vmem:[#allocation172_spill] sm:$0xff] %v4793_v21  ;;  %v1176_v21 = vld [vmem:[#allocation3 + $0xd8] sm:$0xff]  ;;  %vm4824_vm8 = vmand %vm7337_vm15, %vm1115_vm5  ;;  %v1276_v17 = vmul.f32 1.442695, %v1216_v10  ;;  %v1305_v36 = vsel %vm4787_vm10, %v3350_v48, 0.0  ;;  %v1306_v1 = vsel %vm4801_vm2, %v3352_v50, 0.0  ;;  %vm7341_vm11 = vcmp.ne.s32.totalorder %v7340_v55, %v3916_v57 }
 0x213   : > { %7335 = vst [vmem:[#allocation173_spill] sm:$0xff] %v4814_v56  ;;  %vm4840_vm0 = vmand %vm7341_vm11, %vm1116_vm12  ;;  %vm1119_vm1 = vcmp.gt.f32.partialorder %v3858_v16, %v4368_v40  ;;  %v1217_v14 = vmul.f32 3.1, %v3874_v24  ;;  %v3356_v48 = vpop.eup %3355  ;;  %v4847_v10 = vadd.f32 %v1302_v37, %v1174_v23  ;;  %v4849_v3 = vadd.f32 %v1303_v47, %v1175_v18  ;;  %v7347_v56 = vld [vmem:[#allocation69_spill] sm:$0xff]  ;;  %v1180_v37 = vld [vmem:[#allocation3 + $0x88] sm:$0xff] }
 0x214   : > { %v1218_v22 = vmul.f32 3.1, %v3882_v28  ;;  %v1381_v50 = vstv %s1380_s16  ;;  %v4852_v62 = vadd.f32 %v1304_v11, %v1176_v21  ;;  %v1307_v0 = vsel %vm4824_vm8, %v3354_v60, 0.0  ;;  %v7350_v11 = vld [vmem:[#allocation131_spill] sm:$0xff]  ;;  %v7354_v21 = vld [vmem:[#allocation132_spill] sm:$0xff]  ;;  %v7388_v28 = vld [vmem:[#allocation94_spill] sm:$0xff] }
 0x215   : > { %7344 = vst [vmem:[#allocation174_spill] sm:$0xff] %v4847_v10  ;;  %3361 = vpow2.f32 %v1274_v35  ;;  %v4857_v63 = vadd.s32 %v1381_v50, %v7347_v56  ;;  %v3358_v2 = vpop.eup %3357  ;;  %v4859_v24 = vadd.f32 %v1305_v36, %v1177_v52  ;;  %v4861_v23 = vadd.f32 %v1306_v1, %v1178_v31  ;;  %v7358_v52 = vld [vmem:[#allocation6_spill] sm:$0xff]  ;;  %v7363_v8 = vld [vmem:[#allocation76_spill] sm:$0xff] }
 0x216   : > { %7345 = vst [vmem:[#allocation175_spill] sm:$0xff] %v4849_v3  ;;  %v1308_v18 = vsel %vm4840_vm0, %v3356_v48, 0.0  ;;  %vm7351_vm9 = vcmp.ne.s32.totalorder %v7350_v11, %v3916_v57  ;;  %3363 = vpow2.f32 %v1276_v17  ;;  %v3360_v56 = vpop.eup %3359  ;;  %vm7355_vm7 = vcmp.ne.s32.totalorder %v7354_v21, %v3916_v57  ;;  %v7378_v10 = vld [vmem:[#allocation22_spill] sm:$0xff] }
 0x217   : > { %7346 = vst [vmem:[#allocation176_spill] sm:$0xff] %v4852_v62  ;;  %vm4871_vm6 = vmand %vm7351_vm9, %vm1117_vm4  ;;  %v1278_v35 = vmul.f32 1.442695, %v1217_v14  ;;  %v1219_v30 = vmul.f32 3.1, %v3890_v32  ;;  %vm1383_vm14 = vcmp.ne.s32.totalorder %v3913_v61, %v4857_v63  ;;  %v4891_v17 = vadd.f32 %v1307_v0, %v1179_v4 }
 0x218   : > { %7348 = vst [vmem:[#allocation69_spill] sm:$0xff] %v4859_v24  ;;  %vm4881_vm13 = vmand %vm7355_vm7, %vm1118_vm3  ;;  %v4889_v36 = vmul.f32 3.1, %v7358_v52  ;;  %v1280_v31 = vmul.f32 1.442695, %v1218_v22  ;;  %v1447_v1 = vsel %vm1383_vm14, %v7358_v52, -inf  ;;  %v4900_v14 = vadd.f32 %v1308_v18, %v1180_v37 }
 0x219   : > { %7349 = vst [vmem:[#allocation177_spill] sm:$0xff] %v4861_v23  ;;  %v4898_v48 = vmul.f32 3.1, %v7360_v26  ;;  %v1309_v50 = vsel %vm4871_vm6, %v3358_v2, 0.0  ;;  %v7364_v23 = vmax.f32 %v7362_v12, %v7363_v8  ;;  %vm1384_vm10 = vcmp.ne.s32.totalorder %v3919_v25, %v4857_v63  ;;  %v1181_v8 = vld [vmem:[#allocation3 + $0x48] sm:$0xff]  ;;  %v7366_v12 = vld [vmem:[#allocation80_spill] sm:$0xff] }
 0x21a   : > { %7359 = vst [vmem:[#allocation178_spill] sm:$0xff] %v4891_v17  ;;  %v1310_v0 = vsel %vm4881_vm13, %v3360_v56, 0.0  ;;  %v1448_v4 = vsel %vm1384_vm10, %v7360_v26, -inf  ;;  %vm1385_vm5 = vcmp.ne.s32.totalorder %v3922_v53, %v4857_v63  ;;  %vm1386_vm2 = vcmp.ne.s32.totalorder %v7247_v15, %v4857_v63  ;;  %v7367_v22 = vld [vmem:[#allocation78_spill] sm:$0xff] }
 0x21b   : > { %7361 = vst [vmem:[#allocation179_spill] sm:$0xff] %v4900_v14  ;;  %v1479_v24 = vmax.f32 %v7364_v23, %v1447_v1  ;;  %v4919_v2 = vpop.eup %3361  ;;  %v7368_v23 = vmax.f32 %v7366_v12, %v7367_v22  ;;  %v7369_v18 = vld [vmem:[#allocation14_spill] sm:$0xff]  ;;  %vm1387_vm12 = vcmp.ne.s32.totalorder %v7250_v46, %v4857_v63  ;;  %v7372_v14 = vld [vmem:[#allocation81_spill] sm:$0xff]  ;;  %v7375_v22 = vld [vmem:[#allocation83_spill] sm:$0xff]  ;;  %vm7052_vm4 = vcmp.ne.s32.totalorder %v3941_v9, %v4857_v63 }
 0x21c   : > { %7365 = vst [vmem:[#allocation77_spill] sm:$0xff] %v4919_v2  ;;  %v1449_v60 = vsel %vm1385_vm5, %v7369_v18, -inf  ;;  %v7370_v56 = vld [vmem:[#allocation18_spill] sm:$0xff]  ;;  %v4934_v1 = vpop.eup %3363  ;;  %v1451_v32 = vsel %vm1387_vm12, %v7378_v10, -inf  ;;  %vm7379_vm15 = vcmp.ne.s32.totalorder %v4263_v5, %v3916_v57  ;;  %vm1120_vm3 = vcmp.gt.f32.partialorder %v3866_v20, %v4368_v40  ;;  %v7389_v46 = vld [vmem:[#allocation91_spill] sm:$0xff] }
 0x21d   : > { %1511 = vst [vmem:[#allocation2 + $0xb0] sm:$0xff] %v1479_v24  ;;  %v1480_v37 = vmax.f32 %v7368_v23, %v1448_v4  ;;  %v1450_v47 = vsel %vm1386_vm2, %v7370_v56, -inf  ;;  %v1182_v24 = vld [vmem:[#allocation3 + $0xf8] sm:$0xff]  ;;  %v7373_v17 = vld [vmem:[#allocation82_spill] sm:$0xff]  ;;  %vm4954_vm8 = vmand %vm7379_vm15, %vm1119_vm1  ;;  %3365 = vpow2.f32 %v1278_v35  ;;  %vm7051_vm11 = vcmp.ne.s32.totalorder %v7256_v38, %v4857_v63 }
 0x21e   : > { %7371 = vst [vmem:[#allocation76_spill] sm:$0xff] %v4934_v1  ;;  %v7374_v12 = vmax.f32 %v7372_v14, %v7373_v17  ;;  %v7376_v23 = vld [vmem:[#allocation84_spill] sm:$0xff]  ;;  %v7380_v17 = vmov 0  ;;  %v7384_v14 = vld [vmem:[#allocation85_spill] sm:$0xff]  ;;  %v1282_v16 = vmul.f32 1.442695, %v1219_v30  ;;  %v7390_v35 = vmax.f32 %v7388_v28, %v7389_v46 }
 0x21f   : > { %v7377_v62 = vmax.f32 %v7375_v22, %v7376_v23  ;;  %v7381_v17 = vsel %vm4954_vm8, 4294967295, %v7380_v17  ;;  %1512 = vst [vmem:[#allocation2] sm:$0xff] %v1480_v37  ;;  %v4969_v23 = vadd.f32 %v1309_v50, %v1181_v8  ;;  %v7391_v15 = vld [vmem:[#allocation30_spill] sm:$0xff]  ;;  %3367 = vpow2.f32 %v1280_v31 }
 0x220   : > { %v1481_v4 = vmax.f32 %v7374_v12, %v1449_v60  ;;  %7382 = vst [vmem:[#allocation80_spill] sm:$0xff] %v7381_v17  ;;  %v7386_v12 = vld [vmem:[#allocation26_spill] sm:$0xff]  ;;  %vm7050_vm0 = vcmp.ne.s32.totalorder %v7260_v27, %v4857_v63  ;;  %vm7049_vm1 = vcmp.ne.s32.totalorder %v7264_v42, %v4857_v63  ;;  %vm7012_vm9 = vcmp.ne.s32.totalorder %v7273_v43, %v4857_v63 }
 0x221   : > { %v1482_v3 = vmax.f32 %v7377_v62, %v1450_v47  ;;  %v7383_v62 = vld [vmem:[#allocation86_spill] sm:$0xff]  ;;  %v1452_v22 = vsel %vm7052_vm4, %v7386_v12, -inf  ;;  %7387 = vst [vmem:[#allocation78_spill] sm:$0xff] %v4969_v23  ;;  %vm7009_vm6 = vcmp.ne.s32.totalorder %v7278_v54, %v4857_v63  ;;  %vm7000_vm7 = vcmp.ne.s32.totalorder %v7284_v34, %v4857_v63 }
 0x222   : > { %v7385_v60 = vmax.f32 %v7383_v62, %v7384_v14  ;;  %1513 = vst [vmem:[#allocation2 + $0xd8] sm:$0xff] %v1481_v4  ;;  %v1484_v37 = vmax.f32 %v7390_v35, %v1452_v22  ;;  %v4978_v62 = vadd.f32 %v1310_v0, %v1182_v24  ;;  %v7393_v14 = vld [vmem:[#allocation95_spill] sm:$0xff]  ;;  %v7396_v28 = vld [vmem:[#allocation34_spill] sm:$0xff]  ;;  %v7403_v35 = vld [vmem:[#allocation96_spill] sm:$0xff]  ;;  %vm7008_vm13 = vcmp.ne.s32.totalorder %v7289_v59, %v4857_v63 }
 0x223   : > { %1514 = vst [vmem:[#allocation2 + $0x18] sm:$0xff] %v1482_v3  ;;  %v1454_v30 = vsel %vm7050_vm0, %v7396_v28, -inf  ;;  %v7398_v3 = vld [vmem:[#allocation93_spill] sm:$0xff]  ;;  %v7400_v8 = vld [vmem:[#allocation38_spill] sm:$0xff]  ;;  %v7402_v22 = vld [vmem:[#allocation99_spill] sm:$0xff]  ;;  %v5021_v46 = vpop.eup %3365  ;;  %vm7004_vm15 = vcmp.ne.s32.totalorder %v7294_v49, %v4857_v63  ;;  %3369 = vpow2.f32 %v1282_v16 }
 0x224   : > { %v1483_v47 = vmax.f32 %v7385_v60, %v1451_v32  ;;  %v1453_v32 = vsel %vm7051_vm11, %v7391_v15, -inf  ;;  %7392 = vst [vmem:[#allocation81_spill] sm:$0xff] %v4978_v62  ;;  %v7394_v60 = vld [vmem:[#allocation92_spill] sm:$0xff]  ;;  %v1455_v24 = vsel %vm7049_vm1, %v7400_v8, -inf  ;;  %v7401_v4 = vld [vmem:[#allocation42_spill] sm:$0xff]  ;;  %v7411_v62 = vld [vmem:[#allocation105_spill] sm:$0xff]  ;;  %vm1548_vm1 = vcmp.gt.f32.partialorder %v7386_v12, %v4368_v40 }
 0x225   : > { %v7395_v9 = vmax.f32 %v7393_v14, %v7394_v60  ;;  %1516 = vst [vmem:[#allocation2 + $0x68] sm:$0xff] %v1484_v37  ;;  %v7404_v37 = vmax.f32 %v7402_v22, %v7403_v35  ;;  %v7405_v14 = vld [vmem:[#allocation101_spill] sm:$0xff]  ;;  %v7406_v60 = vld [vmem:[#allocation102_spill] sm:$0xff]  ;;  %v7427_v59 = vld [vmem:[#allocation116_spill] sm:$0xff]  ;;  %vm1551_vm0 = vcmp.gt.f32.partialorder %v7400_v8, %v4368_v40 }
 0x226   : > { %1515 = vst [vmem:[#allocation2 + $0x50] sm:$0xff] %v1483_v47  ;;  %v1456_v47 = vsel %vm7012_vm9, %v7401_v4, -inf  ;;  %v7414_v35 = vld [vmem:[#allocation106_spill] sm:$0xff] }
 0x227   : > { %v1485_v50 = vmax.f32 %v7395_v9, %v1453_v32  ;;  %v7397_v9 = vld [vmem:[#allocation98_spill] sm:$0xff]  ;;  %v1487_v32 = vmax.f32 %v7404_v37, %v1455_v24  ;;  %7409 = vst [vmem:[#allocation82_spill] sm:$0xff] %v5021_v46  ;;  %v7415_v37 = vld [vmem:[#allocation107_spill] sm:$0xff] }
 0x228   : > { %v7399_v31 = vmax.f32 %v7397_v9, %v7398_v3  ;;  %v7408_v3 = vld [vmem:[#allocation46_spill] sm:$0xff] }
 0x229   : > { %1517 = vst [vmem:[#allocation2 + $0x30] sm:$0xff] %v1485_v50  ;;  %v7410_v50 = vld [vmem:[#allocation104_spill] sm:$0xff]  ;;  %v7413_v24 = vld [vmem:[#allocation50_spill] sm:$0xff] }
 0x22a   : > { %v1486_v0 = vmax.f32 %v7399_v31, %v1454_v30  ;;  %v7407_v30 = vmax.f32 %v7405_v14, %v7406_v60  ;;  %v1457_v31 = vsel %vm7009_vm6, %v7408_v3, -inf  ;;  %v7412_v23 = vmax.f32 %v7410_v50, %v7411_v62  ;;  %1519 = vst [vmem:[#allocation2 + $0x80] sm:$0xff] %v1487_v32  ;;  %v7417_v60 = vld [vmem:[#allocation54_spill] sm:$0xff]  ;;  %v7421_v50 = vld [vmem:[#allocation111_spill] sm:$0xff] }
 0x22b   : > { %v7416_v14 = vmax.f32 %v7414_v35, %v7415_v37  ;;  %v7418_v62 = vld [vmem:[#allocation58_spill] sm:$0xff]  ;;  %v7423_v37 = vld [vmem:[#allocation115_spill] sm:$0xff]  ;;  %vm7013_vm6 = vcmp.ne.s32.totalorder %v7313_v29, %v4857_v63  ;;  %v7447_v29 = vld [vmem:[#allocation20_spill] sm:$0xff] }
 0x22c   : > { %v1488_v9 = vmax.f32 %v7407_v30, %v1456_v47  ;;  %1518 = vst [vmem:[#allocation2 + $0x48] sm:$0xff] %v1486_v0  ;;  %v1489_v22 = vmax.f32 %v7412_v23, %v1457_v31  ;;  %v1458_v47 = vsel %vm7000_vm7, %v7413_v24, -inf  ;;  %v1459_v23 = vsel %vm7008_vm13, %v7417_v60, -inf  ;;  %v5047_v31 = vpop.eup %3367  ;;  %v7420_v32 = vld [vmem:[#allocation110_spill] sm:$0xff] }
 0x22d   : > { %v1490_v0 = vmax.f32 %v7416_v14, %v1458_v47  ;;  %v1460_v30 = vsel %vm7004_vm15, %v7418_v62, -inf  ;;  %vm7011_vm7 = vcmp.ne.s32.totalorder %v7299_v51, %v4857_v63  ;;  %7419 = vst [vmem:[#allocation83_spill] sm:$0xff] %v5047_v31  ;;  %v7422_v35 = vmax.f32 %v7420_v32, %v7421_v50  ;;  %v7424_v14 = vld [vmem:[#allocation113_spill] sm:$0xff]  ;;  %v7426_v46 = vld [vmem:[#allocation62_spill] sm:$0xff]  ;;  %v7434_v50 = vld [vmem:[#allocation8_spill] sm:$0xff] }
 0x22e   : > { %1520 = vst [vmem:[#allocation2 + $0x88] sm:$0xff] %v1488_v9  ;;  %v7425_v2 = vmax.f32 %v7423_v37, %v7424_v14  ;;  %v1461_v49 = vsel %vm7011_vm7, %v7426_v46, -inf  ;;  %vm7010_vm15 = vcmp.ne.s32.totalorder %v7305_v58, %v4857_v63  ;;  %v7428_v31 = vld [vmem:[#allocation114_spill] sm:$0xff]  ;;  %vm7048_vm13 = vcmp.ne.s32.totalorder %v7309_v6, %v4857_v63  ;;  %v7441_v37 = vld [vmem:[#allocation121_spill] sm:$0xff] }
 0x22f   : > { %v1491_v47 = vmax.f32 %v7422_v35, %v1459_v23  ;;  %1521 = vst [vmem:[#allocation2 + $0xe8] sm:$0xff] %v1489_v22  ;;  %v7429_v9 = vmax.f32 %v7427_v59, %v7428_v31  ;;  %v7430_v54 = vld [vmem:[#allocation66_spill] sm:$0xff]  ;;  %v1463_v59 = vsel %vm7048_vm13, %v7434_v50, -inf  ;;  %vm7436_vm7 = vcmp.ne.s32.totalorder %v4306_v7, %v3916_v57  ;;  %v7440_v35 = vld [vmem:[#allocation120_spill] sm:$0xff] }
 0x230   : > { %v1492_v17 = vmax.f32 %v7425_v2, %v1460_v30  ;;  %v1462_v23 = vsel %vm7010_vm15, %v7430_v54, -inf  ;;  %1522 = vst [vmem:[#allocation2 + $0xb8] sm:$0xff] %v1490_v0  ;;  %v7431_v2 = vld [vmem:[#allocation119_spill] sm:$0xff]  ;;  %v7432_v30 = vld [vmem:[#allocation117_spill] sm:$0xff]  ;;  %vm7026_vm15 = vcmp.ne.s32.totalorder %v7317_v39, %v4857_v63  ;;  %vm5091_vm9 = vmand %vm7436_vm7, %vm1120_vm3  ;;  %v7437_v0 = vmov 0 }
 0x231   : > { %v1493_v34 = vmax.f32 %v7429_v9, %v1461_v49  ;;  %v7433_v32 = vmax.f32 %v7431_v2, %v7432_v30  ;;  %v7435_v49 = vld [vmem:[#allocation12_spill] sm:$0xff]  ;;  %v7438_v0 = vsel %vm5091_vm9, 4294967295, %v7437_v0  ;;  %1523 = vst [vmem:[#allocation2 + $0x60] sm:$0xff] %v1491_v47  ;;  %v7442_v14 = vmax.f32 %v7440_v35, %v7441_v37  ;;  %v7448_v47 = vld [vmem:[#allocation125_spill] sm:$0xff]  ;;  %v7503_v39 = vld [vmem:[#allocation162_spill] sm:$0xff] }
 0x232   : > { %v1464_v31 = vsel %vm7013_vm6, %v7435_v49, -inf  ;;  %7439 = vst [vmem:[#allocation84_spill] sm:$0xff] %v7438_v0  ;;  %vm7019_vm6 = vcmp.ne.s32.totalorder %v4184_v19, %v4857_v63  ;;  %v7444_v30 = vld [vmem:[#allocation124_spill] sm:$0xff]  ;;  %vm7025_vm3 = vcmp.ne.s32.totalorder %v4205_v13, %v4857_v63  ;;  %vm7020_vm7 = vcmp.ne.s32.totalorder %v4219_v41, %v4857_v63 }
 0x233   : > { %v1494_v22 = vmax.f32 %v7433_v32, %v1462_v23  ;;  %v1495_v9 = vmax.f32 %v7442_v14, %v1463_v59  ;;  %v7443_v23 = vld [vmem:[#allocation16_spill] sm:$0xff]  ;;  %1524 = vst [vmem:[#allocation2 + $0xf0] sm:$0xff] %v1492_v17  ;;  %v7445_v32 = vld [vmem:[#allocation122_spill] sm:$0xff]  ;;  %v1466_v16 = vsel %vm7019_vm6, %v7447_v29, -inf  ;;  %vm7035_vm6 = vcmp.ne.s32.totalorder %v7332_v45, %v4857_v63 }
 0x234   : > { %v1465_v2 = vsel %vm7026_vm15, %v7443_v23, -inf  ;;  %v7446_v20 = vmax.f32 %v7444_v30, %v7445_v32  ;;  %1525 = vst [vmem:[#allocation2 + $0x8] sm:$0xff] %v1493_v34  ;;  %v7449_v59 = vld [vmem:[#allocation126_spill] sm:$0xff]  ;;  %v7451_v37 = vld [vmem:[#allocation24_spill] sm:$0xff]  ;;  %vm7032_vm15 = vcmp.ne.s32.totalorder %v7350_v11, %v4857_v63  ;;  %vm1547_vm13 = vcmp.gt.f32.partialorder %v7378_v10, %v4368_v40 }
 0x235   : > { %v7450_v35 = vmax.f32 %v7448_v47, %v7449_v59  ;;  %1526 = vst [vmem:[#allocation2 + $0x78] sm:$0xff] %v1494_v22  ;;  %v7453_v30 = vld [vmem:[#allocation134_spill] sm:$0xff]  ;;  %v7456_v59 = vld [vmem:[#allocation32_spill] sm:$0xff] }
 0x236   : > { %v1496_v57 = vmax.f32 %v7446_v20, %v1464_v31  ;;  %v1467_v20 = vsel %vm7025_vm3, %v7451_v37, -inf  ;;  %v7452_v31 = vld [vmem:[#allocation28_spill] sm:$0xff]  ;;  %1527 = vst [vmem:[#allocation2 + $0x38] sm:$0xff] %v1495_v9  ;;  %vm7034_vm3 = vcmp.ne.s32.totalorder %v7340_v55, %v4857_v63 }
 0x237   : > { %v1497_v17 = vmax.f32 %v7450_v35, %v1465_v2  ;;  %v1468_v14 = vsel %vm7020_vm7, %v7452_v31, -inf  ;;  %v7454_v2 = vld [vmem:[#allocation135_spill] sm:$0xff]  ;;  %v1469_v35 = vsel %vm7035_vm6, %v7456_v59, -inf  ;;  %vm7027_vm7 = vcmp.ne.s32.totalorder %v7336_v33, %v4857_v63  ;;  %v7457_v41 = vld [vmem:[#allocation136_spill] sm:$0xff] }
 0x238   : > { %v7455_v32 = vmax.f32 %v7453_v30, %v7454_v2  ;;  %v7458_v13 = vmax.f32 %v4285_v44, %v7457_v41  ;;  %v7459_v0 = vld [vmem:[#allocation36_spill] sm:$0xff]  ;;  %1528 = vst [vmem:[#allocation2 + $0x58] sm:$0xff] %v1496_v57  ;;  %v7461_v30 = vld [vmem:[#allocation138_spill] sm:$0xff]  ;;  %v7466_v57 = vld [vmem:[#allocation139_spill] sm:$0xff] }
 0x239   : > { %v1470_v22 = vsel %vm7027_vm7, %v7459_v0, -inf  ;;  %vm7047_vm7 = vcmp.ne.s32.totalorder %v7354_v21, %v4857_v63  ;;  %1529 = vst [vmem:[#allocation2 + $0x40] sm:$0xff] %v1497_v17  ;;  %v7467_v34 = vld [vmem:[#allocation140_spill] sm:$0xff] }
 0x23a   : > { %v1498_v47 = vmax.f32 %v7455_v32, %v1466_v16  ;;  %v1499_v19 = vmax.f32 %v7458_v13, %v1467_v20  ;;  %v7460_v16 = vld [vmem:[#allocation137_spill] sm:$0xff]  ;;  %v7463_v32 = vld [vmem:[#allocation40_spill] sm:$0xff]  ;;  %v5164_v20 = vpop.eup %3369 }
 0x23b   : > { %v7462_v2 = vmax.f32 %v7460_v16, %v7461_v30  ;;  %v1471_v41 = vsel %vm7034_vm3, %v7463_v32, -inf  ;;  %v7464_v13 = vld [vmem:[#allocation44_spill] sm:$0xff]  ;;  %7465 = vst [vmem:[#allocation86_spill] sm:$0xff] %v5164_v20  ;;  %v7468_v16 = vmax.f32 %v7466_v57, %v7467_v34  ;;  %v7469_v30 = vld [vmem:[#allocation142_spill] sm:$0xff]  ;;  %v7474_v20 = vld [vmem:[#allocation145_spill] sm:$0xff]  ;;  %vm7046_vm3 = vcmp.ne.s32.totalorder %v4306_v7, %v4857_v63 }
 0x23c   : > { %v1472_v44 = vsel %vm7032_vm15, %v7464_v13, -inf  ;;  %v7472_v33 = vld [vmem:[#allocation48_spill] sm:$0xff]  ;;  %vm7036_vm15 = vcmp.ne.s32.totalorder %v4263_v5, %v4857_v63  ;;  %1530 = vst [vmem:[#allocation2 + $0xc8] sm:$0xff] %v1498_v47 }
 0x23d   : > { %v1500_v9 = vmax.f32 %v7462_v2, %v1468_v14  ;;  %v1501_v14 = vmax.f32 %v7468_v16, %v1469_v35  ;;  %v7470_v2 = vld [vmem:[#allocation143_spill] sm:$0xff]  ;;  %v1473_v11 = vsel %vm7047_vm7, %v7472_v33, -inf  ;;  %v7473_v45 = vld [vmem:[#allocation144_spill] sm:$0xff]  ;;  %1531 = vst [vmem:[#allocation2 + $0xe0] sm:$0xff] %v1499_v19  ;;  %v7478_v35 = vld [vmem:[#allocation146_spill] sm:$0xff]  ;;  %vm1546_vm7 = vcmp.gt.f32.partialorder %v7370_v56, %v4368_v40 }
 0x23e   : > { %v7471_v1 = vmax.f32 %v7469_v30, %v7470_v2  ;;  %v7475_v17 = vmax.f32 %v7473_v45, %v7474_v20  ;;  %v7476_v32 = vld [vmem:[#allocation52_spill] sm:$0xff]  ;;  %v7483_v30 = vld [vmem:[#allocation153_spill] sm:$0xff]  ;;  %v7495_v33 = vld [vmem:[#allocation158_spill] sm:$0xff] }
 0x23f   : > { %v1474_v34 = vsel %vm7036_vm15, %v7476_v32, -inf  ;;  %v7481_v16 = vld [vmem:[#allocation56_spill] sm:$0xff]  ;;  %vm7044_vm15 = vcmp.ne.s32.totalorder %v7483_v30, %v4857_v63  ;;  %1532 = vst [vmem:[#allocation2 + $0x90] sm:$0xff] %v1500_v9  ;;  %v7485_v19 = vld [vmem:[#allocation149_spill] sm:$0xff] }
 0x240   : > { %v1502_v55 = vmax.f32 %v7471_v1, %v1470_v22  ;;  %v1503_v13 = vmax.f32 %v7475_v17, %v1471_v41  ;;  %v7477_v1 = vld [vmem:[#allocation150_spill] sm:$0xff]  ;;  %v7479_v22 = vld [vmem:[#allocation147_spill] sm:$0xff]  ;;  %v1475_v45 = vsel %vm7046_vm3, %v7481_v16, -inf  ;;  %v7482_v41 = vld [vmem:[#allocation60_spill] sm:$0xff]  ;;  %1533 = vst [vmem:[#allocation2 + $0x70] sm:$0xff] %v1501_v14  ;;  %vm1545_vm3 = vcmp.gt.f32.partialorder %v7369_v18, %v4368_v40 }
 0x241   : > { %vm7040_vm6 = vcmp.ne.s32.totalorder %v7477_v1, %v4857_v63  ;;  %v7480_v57 = vmax.f32 %v7478_v35, %v7479_v22  ;;  %v7484_v2 = vld [vmem:[#allocation148_spill] sm:$0xff]  ;;  %v7487_v35 = vld [vmem:[#allocation151_spill] sm:$0xff]  ;;  %v7491_v16 = vld [vmem:[#allocation154_spill] sm:$0xff] }
 0x242   : > { %v1476_v20 = vsel %vm7040_vm6, %v7482_v41, -inf  ;;  %v7486_v17 = vmax.f32 %v7484_v2, %v7485_v19  ;;  %v7490_v21 = vld [vmem:[#allocation64_spill] sm:$0xff]  ;;  %vm7045_vm6 = vcmp.ne.s32.totalorder %v7491_v16, %v4857_v63  ;;  %v7492_v41 = vld [vmem:[#allocation155_spill] sm:$0xff]  ;;  %v7496_v2 = vld [vmem:[#allocation157_spill] sm:$0xff]  ;;  %1534 = vst [vmem:[#allocation2 + $0xc0] sm:$0xff] %v1502_v55 }
 0x243   : > { %v1504_v47 = vmax.f32 %v7480_v57, %v1472_v44  ;;  %v7488_v44 = vld [vmem:[#allocation152_spill] sm:$0xff]  ;;  %v1477_v7 = vsel %vm7044_vm15, %v7490_v21, -inf  ;;  %v7502_v30 = vld [vmem:[#allocation161_spill] sm:$0xff]  ;;  %vm1543_vm15 = vcmp.gt.f32.partialorder %v7358_v52, %v4368_v40  ;;  %1535 = vst [vmem:[#allocation2 + $0xa8] sm:$0xff] %v1503_v13  ;;  %v1641_v55 = vmul.f32 3.1, %v7369_v18 }
 0x244   : > { %v1505_v5 = vmax.f32 %v7486_v17, %v1473_v11  ;;  %v7489_v22 = vmax.f32 %v7487_v35, %v7488_v44  ;;  %v7493_v1 = vld [vmem:[#allocation156_spill] sm:$0xff]  ;;  %v7497_v11 = vmax.f32 %v7495_v33, %v7496_v2  ;;  %v1671_v35 = vmul.f32 1.442695, %v4889_v36  ;;  %vm5258_vm4 = vmand %vm1383_vm14, %vm1543_vm15 }
 0x245   : > { %v7494_v9 = vmax.f32 %v7492_v41, %v7493_v1  ;;  %v7498_v17 = vld [vmem:[#allocation68_spill] sm:$0xff]  ;;  %v7504_v1 = vmax.f32 %v7502_v30, %v7503_v39  ;;  %v1673_v33 = vmul.f32 1.442695, %v4898_v48  ;;  %v1642_v36 = vmul.f32 3.1, %v7370_v56  ;;  %1536 = vst [vmem:[#allocation2 + $0xd0] sm:$0xff] %v1504_v47 }
 0x246   : > { %v1506_v57 = vmax.f32 %v7489_v22, %v1474_v34  ;;  %v1508_v19 = vmax.f32 %v7497_v11, %v1476_v20  ;;  %v1478_v34 = vsel %vm7045_vm6, %v7498_v17, -inf  ;;  %v7499_v44 = vld [vmem:[#allocation160_spill] sm:$0xff]  ;;  %v7500_v22 = vld [vmem:[#allocation159_spill] sm:$0xff]  ;;  %3371 = vpow2.f32 %v1671_v35  ;;  %1537 = vst [vmem:[#allocation2 + $0x10] sm:$0xff] %v1505_v5 }
 0x247   : > { %v1507_v32 = vmax.f32 %v7494_v9, %v1475_v45  ;;  %v7501_v21 = vmax.f32 %v7499_v44, %v7500_v22  ;;  %v1510_v45 = vmax.f32 %v7504_v1, %v1478_v34  ;;  %vm1544_vm6 = vcmp.gt.f32.partialorder %v7360_v26, %v4368_v40  ;;  %v7509_v11 = vld [vmem:[#allocation163_spill] sm:$0xff]  ;;  %v7512_v22 = vld [vmem:[#allocation74_spill] sm:$0xff] }
 0x248   : > { %3373 = vpow2.f32 %v1673_v33  ;;  %v1675_v39 = vmul.f32 1.442695, %v1641_v55  ;;  %1538 = vst [vmem:[#allocation2 + $0x28] sm:$0xff] %v1506_v57  ;;  %v1644_v13 = vmul.f32 3.1, %v7386_v12  ;;  %vm5272_vm11 = vmand %vm1384_vm10, %vm1544_vm6  ;;  %vm1552_vm14 = vcmp.gt.f32.partialorder %v7401_v4, %v4368_v40 }
 0x249   : > { %v1509_v14 = vmax.f32 %v7501_v21, %v1477_v7  ;;  %v1643_v7 = vmul.f32 3.1, %v7378_v10  ;;  %v1677_v21 = vmul.f32 1.442695, %v1642_v36  ;;  %1539 = vst [vmem:[#allocation2 + $0xa0] sm:$0xff] %v1507_v32  ;;  %vm1553_vm15 = vcmp.gt.f32.partialorder %v7408_v3, %v4368_v40  ;;  %vm5293_vm10 = vmand %vm1385_vm5, %vm1545_vm3  ;;  %v7519_v10 = vld [vmem:[#allocation73_spill] sm:$0xff] }
 0x24a   : > { %3375 = vpow2.f32 %v1675_v39  ;;  %v1645_v47 = vmul.f32 3.1, %v7391_v15  ;;  %v1646_v41 = vmul.f32 3.1, %v7396_v28  ;;  %1540 = vst [vmem:[#allocation2 + $0xf8] sm:$0xff] %v1508_v19  ;;  %vm5316_vm5 = vmand %vm1387_vm12, %vm1547_vm13  ;;  %vm7520_vm12 = vcmp.ne.s32.totalorder %v7519_v10, %v4857_v63 }
 0x24b   : > { %v1679_v48 = vmul.f32 1.442695, %v1643_v7  ;;  %3377 = vpow2.f32 %v1677_v21  ;;  %v1681_v52 = vmul.f32 1.442695, %v1644_v13  ;;  %v1647_v32 = vmul.f32 3.1, %v7400_v8 }
 0x24c   : > { %v3372_v20 = vpop.eup %3371  ;;  %1541 = vst [vmem:[#allocation2 + $0x20] sm:$0xff] %v1509_v14  ;;  %v1683_v30 = vmul.f32 1.442695, %v1645_v47  ;;  %v1685_v57 = vmul.f32 1.442695, %v1646_v41  ;;  %v7523_v41 = vld [vmem:[#allocation75_spill] sm:$0xff]  ;;  %vm7524_vm6 = vcmp.gt.f32.partialorder %v7391_v15, %v4368_v40  ;;  %vm7525_vm13 = vcmp.ne.s32.totalorder %v7256_v38, %v4857_v63 }
 0x24d   : > { %3379 = vpow2.f32 %v1679_v48  ;;  %1542 = vst [vmem:[#allocation2 + $0x98] sm:$0xff] %v1510_v45  ;;  %v1735_v26 = vsel %vm5258_vm4, %v3372_v20, 0.0  ;;  %v1687_v9 = vmul.f32 1.442695, %v1647_v32  ;;  %v1648_v2 = vmul.f32 3.1, %v7401_v4  ;;  %vm5305_vm4 = vmand %vm1386_vm2, %vm1546_vm7 }
 0x24e   : > { %v3374_v25 = vpop.eup %3373  ;;  %3381 = vpow2.f32 %v1681_v52  ;;  %v1767_v19 = vadd.f32 %v1735_v26, %v7509_v11  ;;  %v1649_v44 = vmul.f32 3.1, %v7408_v3  ;;  %v1650_v45 = vmul.f32 3.1, %v7413_v24  ;;  %v7542_v4 = vld [vmem:[#allocation88_spill] sm:$0xff]  ;;  %v7547_v3 = vld [vmem:[#allocation89_spill] sm:$0xff] }
 0x24f   : > { %v1736_v34 = vsel %vm5272_vm11, %v3374_v25, 0.0  ;;  %3383 = vpow2.f32 %v1683_v30  ;;  %v1689_v53 = vmul.f32 1.442695, %v1648_v2  ;;  %vm1554_vm2 = vcmp.gt.f32.partialorder %v7413_v24, %v4368_v40  ;;  %vm5331_vm11 = vmand %vm7520_vm12, %vm1548_vm1  ;;  %v7528_v30 = vld [vmem:[#allocation79_spill] sm:$0xff]  ;;  %v7552_v24 = vld [vmem:[#allocation90_spill] sm:$0xff] }
 0x250   : > { %v1768_v14 = vadd.f32 %v1736_v34, %v7512_v22  ;;  %3385 = vpow2.f32 %v1685_v57  ;;  %v3376_v33 = vpop.eup %3375  ;;  %1799 = vst [vmem:[#allocation3 + $0x80] sm:$0xff] %v1767_v19  ;;  %v1691_v36 = vmul.f32 1.442695, %v1649_v44  ;;  %v1651_v7 = vmul.f32 3.1, %v7417_v60  ;;  %vm5345_vm1 = vmand %vm7525_vm13, %vm7524_vm6  ;;  %v7537_v19 = vld [vmem:[#allocation165_spill] sm:$0xff] }
 0x251   : > { %3387 = vpow2.f32 %v1687_v9  ;;  %v3378_v39 = vpop.eup %3377  ;;  %v1737_v21 = vsel %vm5293_vm10, %v3376_v33, 0.0  ;;  %v1693_v13 = vmul.f32 1.442695, %v1650_v45  ;;  %v1652_v5 = vmul.f32 3.1, %v7418_v62  ;;  %v7533_v9 = vld [vmem:[#allocation164_spill] sm:$0xff] }
 0x252   : > { %1800 = vst [vmem:[#allocation3 + $0xc8] sm:$0xff] %v1768_v14  ;;  %3389 = vpow2.f32 %v1689_v53  ;;  %v1769_v61 = vadd.f32 %v1737_v21, %v7523_v41  ;;  %v1738_v52 = vsel %vm5305_vm4, %v3378_v39, 0.0  ;;  %v1695_v32 = vmul.f32 1.442695, %v1651_v7  ;;  %v7541_v22 = vld [vmem:[#allocation87_spill] sm:$0xff]  ;;  %v7546_v45 = vld [vmem:[#allocation166_spill] sm:$0xff] }
 0x253   : > { %v3380_v47 = vpop.eup %3379  ;;  %3391 = vpow2.f32 %v1691_v36  ;;  %v1770_v57 = vadd.f32 %v1738_v52, %v7528_v30  ;;  %vm7529_vm3 = vcmp.gt.f32.partialorder %v7396_v28, %v4368_v40  ;;  %vm7530_vm7 = vcmp.ne.s32.totalorder %v7260_v27, %v4857_v63  ;;  %v7551_v39 = vld [vmem:[#allocation167_spill] sm:$0xff]  ;;  %v7556_v41 = vld [vmem:[#allocation168_spill] sm:$0xff] }
 0x254   : > { %v3382_v20 = vpop.eup %3381  ;;  %v1739_v25 = vsel %vm5316_vm5, %v3380_v47, 0.0  ;;  %vm5358_vm10 = vmand %vm7530_vm7, %vm7529_vm3  ;;  %3393 = vpow2.f32 %v1693_v13  ;;  %v1697_v38 = vmul.f32 1.442695, %v1652_v5  ;;  %1801 = vst [vmem:[#allocation3 + $0xe8] sm:$0xff] %v1769_v61  ;;  %vm7534_vm4 = vcmp.ne.s32.totalorder %v7264_v42, %v4857_v63  ;;  %v7562_v15 = vld [vmem:[#allocation100_spill] sm:$0xff] }
 0x255   : > { %v3384_v26 = vpop.eup %3383  ;;  %v1771_v2 = vadd.f32 %v1739_v25, %v7533_v9  ;;  %v1740_v11 = vsel %vm5331_vm11, %v3382_v20, 0.0  ;;  %vm5371_vm5 = vmand %vm7534_vm4, %vm1551_vm0  ;;  %vm1555_vm12 = vcmp.gt.f32.partialorder %v7417_v60, %v4368_v40  ;;  %3395 = vpow2.f32 %v1695_v32  ;;  %1802 = vst [vmem:[#allocation3 + $0x78] sm:$0xff] %v1770_v57  ;;  %v7557_v60 = vld [vmem:[#allocation97_spill] sm:$0xff]  ;;  %v7582_v48 = vld [vmem:[#allocation172_spill] sm:$0xff] }
 0x256   : > { %v3386_v28 = vpop.eup %3385  ;;  %v1772_v34 = vadd.f32 %v1740_v11, %v7537_v19  ;;  %v1741_v35 = vsel %vm5345_vm1, %v3384_v26, 0.0  ;;  %vm7538_vm0 = vcmp.ne.s32.totalorder %v7273_v43, %v4857_v63  ;;  %3397 = vpow2.f32 %v1697_v38  ;;  %v7561_v20 = vld [vmem:[#allocation169_spill] sm:$0xff]  ;;  %v7564_v19 = vld [vmem:[#allocation103_spill] sm:$0xff] }
 0x257   : > { %vm5386_vm11 = vmand %vm7538_vm0, %vm1552_vm14  ;;  %v1653_v8 = vmul.f32 3.1, %v7426_v46  ;;  %v3388_v44 = vpop.eup %3387  ;;  %1803 = vst [vmem:[#allocation3 + $0x8] sm:$0xff] %v1771_v2  ;;  %v1773_v14 = vadd.f32 %v1741_v35, %v7541_v22  ;;  %v1742_v1 = vsel %vm5358_vm10, %v3386_v28, 0.0  ;;  %vm7543_vm6 = vcmp.ne.s32.totalorder %v7542_v4, %v4857_v63  ;;  %v7563_v2 = vld [vmem:[#allocation170_spill] sm:$0xff] }
 0x258   : > { %vm5400_vm14 = vmand %vm7543_vm6, %vm1553_vm15  ;;  %vm1556_vm13 = vcmp.gt.f32.partialorder %v7418_v62, %v4368_v40  ;;  %v1654_v18 = vmul.f32 3.1, %v7430_v54  ;;  %v3390_v53 = vpop.eup %3389  ;;  %1804 = vst [vmem:[#allocation3 + $0x90] sm:$0xff] %v1772_v34  ;;  %v1774_v33 = vadd.f32 %v1742_v1, %v7546_v45  ;;  %v1743_v55 = vsel %vm5371_vm5, %v3388_v44, 0.0  ;;  %v7568_v44 = vld [vmem:[#allocation59_spill] sm:$0xff] }
 0x259   : > { %vm7548_vm15 = vcmp.ne.s32.totalorder %v7547_v3, %v4857_v63  ;;  %vm1557_vm3 = vcmp.gt.f32.partialorder %v7426_v46, %v4368_v40  ;;  %v1699_v36 = vmul.f32 1.442695, %v1653_v8  ;;  %v3392_v7 = vpop.eup %3391  ;;  %1805 = vst [vmem:[#allocation3 + $0x58] sm:$0xff] %v1773_v14  ;;  %v1775_v21 = vadd.f32 %v1743_v55, %v7551_v39  ;;  %v7572_v1 = vld [vmem:[#allocation63_spill] sm:$0xff] }
 0x25a   : > { %vm5416_vm1 = vmand %vm7548_vm15, %vm1554_vm2  ;;  %v1744_v10 = vsel %vm5386_vm11, %v3390_v53, 0.0  ;;  %vm7553_vm2 = vcmp.ne.s32.totalorder %v7552_v24, %v4857_v63  ;;  %v1701_v13 = vmul.f32 1.442695, %v1654_v18  ;;  %v1655_v5 = vmul.f32 3.1, %v7434_v50  ;;  %v3394_v47 = vpop.eup %3393  ;;  %1806 = vst [vmem:[#allocation3 + $0xa8] sm:$0xff] %v1774_v33 }
 0x25b   : > { %vm5431_vm7 = vmand %vm7553_vm2, %vm1555_vm12  ;;  %v1776_v61 = vadd.f32 %v1744_v10, %v7556_v41  ;;  %v1745_v52 = vsel %vm5400_vm14, %v3392_v7, 0.0  ;;  %vm7558_vm10 = vcmp.ne.s32.totalorder %v7557_v60, %v4857_v63  ;;  %3399 = vpow2.f32 %v1699_v36  ;;  %v3396_v32 = vpop.eup %3395  ;;  %1807 = vst [vmem:[#allocation3 + $0xd0] sm:$0xff] %v1775_v21  ;;  %v7576_v33 = vld [vmem:[#allocation108_spill] sm:$0xff]  ;;  %v7578_v21 = vld [vmem:[#allocation109_spill] sm:$0xff] }
 0x25c   : > { %vm5445_vm4 = vmand %vm7558_vm10, %vm1556_vm13  ;;  %vm1558_vm5 = vcmp.gt.f32.partialorder %v7430_v54, %v4368_v40  ;;  %v1777_v30 = vadd.f32 %v1745_v52, %v7561_v20  ;;  %v1746_v57 = vsel %vm5416_vm1, %v3394_v47, 0.0  ;;  %3401 = vpow2.f32 %v1701_v13  ;;  %v3398_v25 = vpop.eup %3397  ;;  %v7587_v47 = vld [vmem:[#allocation40_spill] sm:$0xff]  ;;  %v7588_v52 = vld [vmem:[#allocation67_spill] sm:$0xff] }
 0x25d   : > { %v1703_v62 = vmul.f32 1.442695, %v1655_v5  ;;  %1808 = vst [vmem:[#allocation3 + $0xb0] sm:$0xff] %v1776_v61  ;;  %v1778_v38 = vadd.f32 %v1746_v57, %v7562_v15  ;;  %v1747_v26 = vsel %vm5431_vm7, %v3396_v32, 0.0  ;;  %vm1559_vm12 = vcmp.gt.f32.partialorder %v7434_v50, %v4368_v40  ;;  %v7577_v50 = vld [vmem:[#allocation171_spill] sm:$0xff]  ;;  %v7593_v32 = vld [vmem:[#allocation44_spill] sm:$0xff] }
 0x25e   : > { %v1656_v9 = vmul.f32 3.1, %v7435_v49  ;;  %1809 = vst [vmem:[#allocation3 + $0x38] sm:$0xff] %v1777_v30  ;;  %v1779_v11 = vadd.f32 %v1747_v26, %v7563_v2  ;;  %v1748_v27 = vsel %vm5445_vm4, %v3398_v25, 0.0  ;;  %v1657_v28 = vmul.f32 3.1, %v7443_v23 }
 0x25f   : > { %3403 = vpow2.f32 %v1703_v62  ;;  %1810 = vst [vmem:[#allocation3 + $0x40] sm:$0xff] %v1778_v38  ;;  %v1780_v34 = vadd.f32 %v1748_v27, %v7564_v19  ;;  %vm7565_vm0 = vcmp.ne.s32.totalorder %v7299_v51, %v4857_v63  ;;  %vm1560_vm6 = vcmp.gt.f32.partialorder %v7435_v49, %v4368_v40  ;;  %v7583_v49 = vld [vmem:[#allocation112_spill] sm:$0xff]  ;;  %v7595_v25 = vld [vmem:[#allocation123_spill] sm:$0xff] }
 0x260   : > { %vm5471_vm11 = vmand %vm7565_vm0, %vm1557_vm3  ;;  %v1705_v42 = vmul.f32 1.442695, %v1656_v9  ;;  %v1658_v8 = vmul.f32 3.1, %v7447_v29  ;;  %vm1121_vm14 = vcmp.gt.f32.partialorder %v7568_v44, %v4368_v40  ;;  %1811 = vst [vmem:[#allocation3 + $0xe0] sm:$0xff] %v1779_v11  ;;  %vm7569_vm13 = vcmp.ne.s32.totalorder %v7305_v58, %v4857_v63  ;;  %v7594_v30 = vld [vmem:[#allocation48_spill] sm:$0xff] }
 0x261   : > { %vm5486_vm15 = vmand %vm7569_vm13, %vm1558_vm5  ;;  %vm1561_vm1 = vcmp.gt.f32.partialorder %v7443_v23, %v4368_v40  ;;  %v1707_v46 = vmul.f32 1.442695, %v1657_v28  ;;  %vm1562_vm3 = vcmp.gt.f32.partialorder %v7447_v29, %v4368_v40  ;;  %v1659_v22 = vmul.f32 3.1, %v7451_v37  ;;  %v3400_v14 = vpop.eup %3399  ;;  %1812 = vst [vmem:[#allocation3 + $0x60] sm:$0xff] %v1780_v34  ;;  %v7589_v23 = vld [vmem:[#allocation118_spill] sm:$0xff] }
 0x262   : > { %vm1122_vm2 = vcmp.gt.f32.partialorder %v7572_v1, %v4368_v40  ;;  %3405 = vpow2.f32 %v1705_v42  ;;  %v1709_v54 = vmul.f32 1.442695, %v1658_v8  ;;  %vm1563_vm7 = vcmp.gt.f32.partialorder %v7451_v37, %v4368_v40  ;;  %v3402_v4 = vpop.eup %3401  ;;  %v7599_v26 = vld [vmem:[#allocation52_spill] sm:$0xff]  ;;  %v7600_v11 = vld [vmem:[#allocation173_spill] sm:$0xff]  ;;  %v7601_v37 = vld [vmem:[#allocation127_spill] sm:$0xff] }
 0x263   : > { %v1660_v58 = vmul.f32 3.1, %v7452_v31  ;;  %v1749_v43 = vsel %vm5471_vm11, %v3400_v14, 0.0  ;;  %vm7573_vm10 = vcmp.ne.s32.totalorder %v7309_v6, %v4857_v63  ;;  %3407 = vpow2.f32 %v1707_v46  ;;  %v7605_v42 = vld [vmem:[#allocation174_spill] sm:$0xff]  ;;  %v7606_v46 = vld [vmem:[#allocation128_spill] sm:$0xff]  ;;  %v7616_v44 = vld [vmem:[#allocation153_spill] sm:$0xff] }
 0x264   : > { %vm5508_vm4 = vmand %vm7573_vm10, %vm1559_vm12  ;;  %v1711_v53 = vmul.f32 1.442695, %v1659_v22  ;;  %v1661_v45 = vmul.f32 3.1, %v7456_v59  ;;  %v1781_v55 = vadd.f32 %v1749_v43, %v7576_v33  ;;  %v1750_v3 = vsel %vm5486_vm15, %v3402_v4, 0.0  ;;  %v1183_v33 = vld [vmem:[#allocation3 + $0xc0] sm:$0xff] }
 0x265   : > { %3409 = vpow2.f32 %v1709_v54  ;;  %v1713_v56 = vmul.f32 1.442695, %v1660_v58  ;;  %v3404_v36 = vpop.eup %3403  ;;  %v1782_v7 = vadd.f32 %v1750_v3, %v7577_v50  ;;  %vm1564_vm5 = vcmp.gt.f32.partialorder %v7452_v31, %v4368_v40  ;;  %v7610_v54 = vld [vmem:[#allocation150_spill] sm:$0xff]  ;;  %v7620_v3 = vld [vmem:[#allocation176_spill] sm:$0xff]  ;;  %v7621_v50 = vld [vmem:[#allocation69_spill] sm:$0xff] }
 0x266   : > { %3411 = vpow2.f32 %v1711_v53  ;;  %v1715_v6 = vmul.f32 1.442695, %v1661_v45  ;;  %1813 = vst [vmem:[#allocation3 + $0x18] sm:$0xff] %v1781_v55  ;;  %v1751_v39 = vsel %vm5508_vm4, %v3404_v36, 0.0  ;;  %vm7579_vm12 = vcmp.ne.s32.totalorder %v7578_v21, %v4857_v63  ;;  %v7611_v58 = vld [vmem:[#allocation70_spill] sm:$0xff]  ;;  %v7626_v21 = vld [vmem:[#allocation56_spill] sm:$0xff] }
 0x267   : > { %vm5527_vm0 = vmand %vm7579_vm12, %vm1560_vm6  ;;  %3413 = vpow2.f32 %v1713_v56  ;;  %vm1565_vm11 = vcmp.gt.f32.partialorder %v7456_v59, %v4368_v40  ;;  %v1662_v24 = vmul.f32 3.1, %v7459_v0  ;;  %1814 = vst [vmem:[#allocation3 + $0x68] sm:$0xff] %v1782_v7  ;;  %v1783_v13 = vadd.f32 %v1751_v39, %v7582_v48  ;;  %v7615_v59 = vld [vmem:[#allocation175_spill] sm:$0xff]  ;;  %v1184_v31 = vld [vmem:[#allocation3 + $0xb8] sm:$0xff] }
 0x268   : > { %vm7584_vm13 = vcmp.ne.s32.totalorder %v7583_v49, %v4857_v63  ;;  %3415 = vpow2.f32 %v1715_v6  ;;  %vm1566_vm6 = vcmp.gt.f32.partialorder %v7459_v0, %v4368_v40  ;;  %v1663_v41 = vmul.f32 3.1, %v7587_v47  ;;  %v3406_v61 = vpop.eup %3405  ;;  %v7622_v6 = vld [vmem:[#allocation129_spill] sm:$0xff]  ;;  %v7629_v0 = vld [vmem:[#allocation130_spill] sm:$0xff] }
 0x269   : > { %vm5541_vm15 = vmand %vm7584_vm13, %vm1561_vm1  ;;  %vm1123_vm10 = vcmp.gt.f32.partialorder %v7588_v52, %v4368_v40  ;;  %vm7590_vm4 = vcmp.ne.s32.totalorder %v7589_v23, %v4857_v63  ;;  %v1717_v12 = vmul.f32 1.442695, %v1662_v24  ;;  %vm1567_vm12 = vcmp.gt.f32.partialorder %v7587_v47, %v4368_v40  ;;  %v3408_v62 = vpop.eup %3407  ;;  %1815 = vst [vmem:[#allocation3 + $0x10] sm:$0xff] %v1783_v13  ;;  %v7627_v24 = vld [vmem:[#allocation82_spill] sm:$0xff]  ;;  %v7628_v13 = vld [vmem:[#allocation177_spill] sm:$0xff] }
 0x26a   : > { %vm5556_vm1 = vmand %vm7590_vm4, %vm1562_vm3  ;;  %v1664_v20 = vmul.f32 3.1, %v7593_v32  ;;  %v1665_v57 = vmul.f32 3.1, %v7594_v30  ;;  %v1752_v29 = vsel %vm5527_vm0, %v3406_v61, 0.0  ;;  %vm7596_vm3 = vcmp.ne.s32.totalorder %v7595_v25, %v4857_v63 }
 0x26b   : > { %vm5572_vm13 = vmand %vm7596_vm3, %vm1563_vm7  ;;  %v1719_v38 = vmul.f32 1.442695, %v1663_v41  ;;  %vm1568_vm4 = vcmp.gt.f32.partialorder %v7593_v32, %v4368_v40  ;;  %v1666_v9 = vmul.f32 3.1, %v7599_v26  ;;  %v3410_v2 = vpop.eup %3409  ;;  %v1784_v27 = vadd.f32 %v1752_v29, %v7600_v11  ;;  %v7633_v41 = vld [vmem:[#allocation60_spill] sm:$0xff]  ;;  %v7638_v29 = vld [vmem:[#allocation131_spill] sm:$0xff] }
 0x26c   : > { %v1753_v28 = vsel %vm5541_vm15, %v3408_v62, 0.0  ;;  %vm7602_vm7 = vcmp.ne.s32.totalorder %v7601_v37, %v4857_v63  ;;  %3417 = vpow2.f32 %v1717_v12  ;;  %v1721_v34 = vmul.f32 1.442695, %v1664_v20  ;;  %v3412_v35 = vpop.eup %3411  ;;  %v7635_v12 = vld [vmem:[#allocation77_spill] sm:$0xff]  ;;  %v7637_v62 = vld [vmem:[#allocation83_spill] sm:$0xff] }
 0x26d   : > { %vm5588_vm0 = vmand %vm7602_vm7, %vm1564_vm5  ;;  %v1785_v8 = vadd.f32 %v1753_v28, %v7605_v42  ;;  %v1754_v51 = vsel %vm5556_vm1, %v3410_v2, 0.0  ;;  %vm7607_vm15 = vcmp.ne.s32.totalorder %v7606_v46, %v4857_v63  ;;  %3419 = vpow2.f32 %v1719_v38  ;;  %v3414_v14 = vpop.eup %3413  ;;  %1816 = vst [vmem:[#allocation3 + $0x70] sm:$0xff] %v1784_v27  ;;  %v7642_v38 = vld [vmem:[#allocation64_spill] sm:$0xff] }
 0x26e   : > { %vm5601_vm3 = vmand %vm7607_vm15, %vm1565_vm11  ;;  %v1723_v22 = vmul.f32 1.442695, %v1665_v57  ;;  %vm7612_vm5 = vcmp.ne.s32.totalorder %v7610_v54, %v7611_v58  ;;  %v1786_v43 = vadd.f32 %v1754_v51, %v7615_v59  ;;  %v1755_v18 = vsel %vm5572_vm13, %v3412_v35, 0.0  ;;  %v3416_v45 = vpop.eup %3415  ;;  %v7643_v27 = vld [vmem:[#allocation132_spill] sm:$0xff] }
 0x26f   : > { %vm5611_vm1 = vmand %vm7612_vm5, %vm1121_vm14  ;;  %3421 = vpow2.f32 %v1721_v34  ;;  %v1725_v53 = vmul.f32 1.442695, %v1666_v9  ;;  %vm7617_vm11 = vcmp.ne.s32.totalorder %v7616_v44, %v7611_v58  ;;  %1817 = vst [vmem:[#allocation3 + $0x50] sm:$0xff] %v1785_v8  ;;  %v1787_v56 = vadd.f32 %v1755_v18, %v7620_v3  ;;  %v7647_v34 = vld [vmem:[#allocation178_spill] sm:$0xff]  ;;  %v1185_v18 = vld [vmem:[#allocation3] sm:$0xff] }
 0x270   : > { %vm5624_vm14 = vmand %vm7617_vm11, %vm1122_vm2  ;;  %v1756_v36 = vsel %vm5588_vm0, %v3414_v14, 0.0  ;;  %vm1569_vm13 = vcmp.gt.f32.partialorder %v7594_v30, %v4368_v40  ;;  %3423 = vpow2.f32 %v1723_v22  ;;  %1818 = vst [vmem:[#allocation3 + $0xa0] sm:$0xff] %v1786_v43  ;;  %v1757_v7 = vsel %vm5601_vm3, %v3416_v45, 0.0  ;;  %v7648_v30 = vld [vmem:[#allocation133_spill] sm:$0xff] }
 0x271   : > { %v1788_v1 = vadd.f32 %v1756_v36, %v7621_v50  ;;  %vm7623_vm2 = vcmp.ne.s32.totalorder %v7622_v6, %v4857_v63  ;;  %3425 = vpow2.f32 %v1725_v53  ;;  %v1667_v10 = vmul.f32 3.1, %v7626_v21  ;;  %1819 = vst [vmem:[#allocation3 + $0xd8] sm:$0xff] %v1787_v56  ;;  %v7656_v53 = vld [vmem:[#allocation78_spill] sm:$0xff]  ;;  %v7659_v36 = vld [vmem:[#allocation76_spill] sm:$0xff] }
 0x272   : > { %vm5642_vm7 = vmand %vm7623_vm2, %vm1566_vm6  ;;  %v1313_v48 = vsel %vm5611_vm1, %v7627_v24, 0.0  ;;  %v1789_v49 = vadd.f32 %v1757_v7, %v7628_v13  ;;  %vm7630_vm0 = vcmp.ne.s32.totalorder %v7629_v0, %v4857_v63  ;;  %vm1570_vm15 = vcmp.gt.f32.partialorder %v7599_v26, %v4368_v40  ;;  %v3418_v23 = vpop.eup %3417  ;;  %v7655_v26 = vld [vmem:[#allocation179_spill] sm:$0xff]  ;;  %v1187_v7 = vld [vmem:[#allocation3 + $0x98] sm:$0xff] }
 0x273   : > { %vm5657_vm6 = vmand %vm7630_vm0, %vm1567_vm12  ;;  %v1668_v61 = vmul.f32 3.1, %v7633_v41  ;;  %v7636_v20 = vsel %vm4954_vm8, %v7635_v12, 0.0  ;;  %v1314_v47 = vsel %vm5624_vm14, %v7637_v62, 0.0  ;;  %1820 = vst [vmem:[#allocation3 + $0x30] sm:$0xff] %v1788_v1  ;;  %vm7639_vm12 = vcmp.ne.s32.totalorder %v7638_v29, %v4857_v63  ;;  %v3420_v2 = vpop.eup %3419  ;;  %v7661_v6 = vld [vmem:[#allocation86_spill] sm:$0xff] }
 0x274   : > { %v1343_v57 = vadd.f32 %v7636_v20, %v1183_v33  ;;  %vm5677_vm3 = vmand %vm7639_vm12, %vm1568_vm4  ;;  %v1727_v15 = vmul.f32 1.442695, %v1667_v10  ;;  %v1669_v9 = vmul.f32 3.1, %v7642_v38  ;;  %1821 = vst [vmem:[#allocation3 + $0x20] sm:$0xff] %v1789_v49  ;;  %v1758_v11 = vsel %vm5642_vm7, %v3418_v23, 0.0 }
 0x275   : > { %vm7644_vm8 = vcmp.ne.s32.totalorder %v7643_v27, %v4857_v63  ;;  %vm1571_vm4 = vcmp.gt.f32.partialorder %v7626_v21, %v4368_v40  ;;  %v1729_v28 = vmul.f32 1.442695, %v1668_v61  ;;  %v1670_v37 = vmul.f32 3.1, %v7498_v17  ;;  %v3422_v19 = vpop.eup %3421  ;;  %v7657_v33 = vld [vmem:[#allocation81_spill] sm:$0xff] }
 0x276   : > { %vm5690_vm5 = vmand %vm7644_vm8, %vm1569_vm13  ;;  %v1790_v35 = vadd.f32 %v1758_v11, %v7647_v34  ;;  %v1759_v42 = vsel %vm5657_vm6, %v3420_v2, 0.0  ;;  %vm7649_vm1 = vcmp.ne.s32.totalorder %v7648_v30, %v4857_v63  ;;  %3427 = vpow2.f32 %v1727_v15  ;;  %v3424_v46 = vpop.eup %3423  ;;  %v7662_v24 = vld [vmem:[#allocation141_spill] sm:$0xff] }
 0x277   : > { %vm5706_vm11 = vmand %vm7649_vm1, %vm1570_vm15  ;;  %v1731_v51 = vmul.f32 1.442695, %v1669_v9  ;;  %vm7652_vm14 = vcmp.ne.s32.totalorder %v7491_v16, %v7611_v58  ;;  %v1791_v14 = vadd.f32 %v1759_v42, %v7655_v26  ;;  %v1760_v4 = vsel %vm5677_vm3, %v3422_v19, 0.0  ;;  %v3426_v43 = vpop.eup %3425  ;;  %v1186_v58 = vld [vmem:[#allocation3 + $0x28] sm:$0xff] }
 0x278   : > { %vm5716_vm13 = vmand %vm7652_vm14, %vm1123_vm10  ;;  %3429 = vpow2.f32 %v1729_v28  ;;  %v1733_v59 = vmul.f32 1.442695, %v1670_v37  ;;  %1822 = vst [vmem:[#allocation3 + $0xf0] sm:$0xff] %v1790_v35  ;;  %v1792_v45 = vadd.f32 %v1760_v4, %v7656_v53  ;;  %v1761_v52 = vsel %vm5690_vm5, %v3424_v46, 0.0 }
 0x279   : > { %vm1572_vm10 = vcmp.gt.f32.partialorder %v7633_v41, %v4368_v40  ;;  %3431 = vpow2.f32 %v1731_v51  ;;  %1823 = vst [vmem:[#allocation3 + $0x88] sm:$0xff] %v1791_v14  ;;  %v1793_v55 = vadd.f32 %v1761_v52, %v7657_v33  ;;  %v1762_v3 = vsel %vm5706_vm11, %v3426_v43, 0.0 }
 0x27a   : > { %vm1573_vm2 = vcmp.gt.f32.partialorder %v7642_v38, %v4368_v40  ;;  %3433 = vpow2.f32 %v1733_v59  ;;  %v7660_v50 = vsel %vm5091_vm9, %v7659_v36, 0.0  ;;  %v1315_v39 = vsel %vm5716_vm13, %v7661_v6, 0.0  ;;  %1824 = vst [vmem:[#allocation3 + $0x48] sm:$0xff] %v1792_v45 }
 0x27b   : > { %v1344_v1 = vadd.f32 %v7660_v50, %v1184_v31  ;;  %v1794_v10 = vadd.f32 %v1762_v3, %v1343_v57  ;;  %vm7663_vm7 = vcmp.ne.s32.totalorder %v7662_v24, %v4857_v63  ;;  %vm1574_vm6 = vcmp.gt.f32.partialorder %v7498_v17, %v4368_v40  ;;  %1825 = vst [vmem:[#allocation3 + $0xf8] sm:$0xff] %v1793_v55 }
 0x27c   : > { %vm1603_vm0 = vmand %vm7663_vm7, %vm1571_vm4  ;;  %v1345_v13 = vadd.f32 %v1313_v48, %v1185_v18  ;;  %vm7664_vm9 = vcmp.ne.s32.totalorder %v7610_v54, %v4857_v63  ;;  %v3428_v49 = vpop.eup %3427  ;;  %v1346_v0 = vadd.f32 %v1314_v47, %v1186_v58  ;;  %vm7665_vm12 = vcmp.ne.s32.totalorder %v7616_v44, %v4857_v63 }
 0x27d   : > { %vm1604_vm15 = vmand %vm7664_vm9, %vm1572_vm10  ;;  %1826 = vst [vmem:[#allocation3 + $0xc0] sm:$0xff] %v1794_v10  ;;  %v1347_v21 = vadd.f32 %v1315_v39, %v1187_v7  ;;  %v1763_v48 = vsel %vm1603_vm0, %v3428_v49, 0.0  ;;  %vm7666_vm8 = vcmp.ne.s32.totalorder %v7491_v16, %v4857_v63 }
 0x27e   : > { %vm1605_vm3 = vmand %vm7665_vm12, %vm1573_vm2  ;;  %v3430_v17 = vpop.eup %3429  ;;  %v1795_v54 = vadd.f32 %v1763_v48, %v1344_v1 }
 0x27f   : > { %vm1606_vm5 = vmand %vm7666_vm8, %vm1574_vm6  ;;  %v3432_v5 = vpop.eup %3431  ;;  %v1764_v41 = vsel %vm1604_vm15, %v3430_v17, 0.0 }
 0x280   : > { %v3434_v61 = vpop.eup %3433  ;;  %v1796_v23 = vadd.f32 %v1764_v41, %v1345_v13  ;;  %v1765_v60 = vsel %vm1605_vm3, %v3432_v5, 0.0  ;;  %1827 = vst [vmem:[#allocation3 + $0xb8] sm:$0xff] %v1795_v54 }
 0x281   : > { %v1797_v12 = vadd.f32 %v1765_v60, %v1346_v0  ;;  %v1766_v40 = vsel %vm1606_vm5, %v3434_v61, 0.0 }
 0x282   : > { %1828 = vst [vmem:[#allocation3] sm:$0xff] %v1796_v23  ;;  %v1798_v20 = vadd.f32 %v1766_v40, %v1347_v21 }
 0x283   : > { %1829 = vst [vmem:[#allocation3 + $0x28] sm:$0xff] %v1797_v12 }
 0x284   : > { %1830 = vst [vmem:[#allocation3 + $0x98] sm:$0xff] %v1798_v20 }
 0x285 PF: > { %1833 = sbr.rel (!%p857_p10) target bundleno = 788 (0x314), region = 52 }
 0x28a   : > { %v7667_v63 = vld [vmem:[#allocation5_spill] sm:$0xff]  ;;  %v5769_v44 = vld [vmem:[#allocation2 + $0xb0] sm:$0xff]  ;;  %v5773_v62 = vld [vmem:[#allocation2 + $0xd8] sm:$0xff]  ;;  %v5790_v11 = vstv %s3760_s24 }
 0x28b   : > { %v1995_v16 = vmul.f32 3.1, %v7667_v63  ;;  %v5771_v57 = vld [vmem:[#allocation2] sm:$0xff]  ;;  %v5775_v47 = vld [vmem:[#allocation2 + $0x18] sm:$0xff]  ;;  %v5777_v29 = vld [vmem:[#allocation2 + $0x50] sm:$0xff]  ;;  %vm1963_vm4 = vcmp.gt.f32.partialorder %v7667_v63, %v5790_v11 }
 0x28c   : > { %v5779_v25 = vld [vmem:[#allocation2 + $0x68] sm:$0xff]  ;;  %v5781_v15 = vld [vmem:[#allocation2 + $0x30] sm:$0xff]  ;;  %v5785_v9 = vld [vmem:[#allocation2 + $0x80] sm:$0xff] }
 0x28d   : > { %v5783_v38 = vld [vmem:[#allocation2 + $0x48] sm:$0xff]  ;;  %7669 = vst [vmem:[#allocation181_spill] sm:$0xff] %v5785_v9  ;;  %v2027_v27 = vmul.f32 1.442695, %v1995_v16  ;;  %v7671_v28 = vld [vmem:[#allocation9_spill] sm:$0xff]  ;;  %v5798_v34 = vld [vmem:[#allocation2 + $0xb8] sm:$0xff] }
 0x28e   : > { %7668 = vst [vmem:[#allocation180_spill] sm:$0xff] %v5783_v38  ;;  %v5787_v2 = vld [vmem:[#allocation2 + $0x88] sm:$0xff]  ;;  %v5800_v35 = vld [vmem:[#allocation2 + $0x60] sm:$0xff]  ;;  %v1996_v42 = vmul.f32 3.1, %v7671_v28  ;;  %v5811_v4 = vld [vmem:[#allocation2 + $0xf0] sm:$0xff]  ;;  %vm1964_vm1 = vcmp.gt.f32.partialorder %v7671_v28, %v5790_v11 }
 0x28f   : > { %7670 = vst [vmem:[#allocation182_spill] sm:$0xff] %v5787_v2  ;;  %v5796_v19 = vld [vmem:[#allocation2 + $0xe8] sm:$0xff]  ;;  %v7675_v30 = vld [vmem:[#allocation13_spill] sm:$0xff]  ;;  %v5815_v43 = vld [vmem:[#allocation2 + $0x78] sm:$0xff]  ;;  %3435 = vpow2.f32 %v2027_v27 }
 0x290   : > { %7672 = vst [vmem:[#allocation183_spill] sm:$0xff] %v5796_v19  ;;  %v7676_v51 = vld [vmem:[#allocation17_spill] sm:$0xff]  ;;  %v5813_v59 = vld [vmem:[#allocation2 + $0x8] sm:$0xff]  ;;  %v5823_v55 = vld [vmem:[#allocation2 + $0x38] sm:$0xff]  ;;  %v1997_v36 = vmul.f32 3.1, %v7675_v30  ;;  %vm1965_vm11 = vcmp.gt.f32.partialorder %v7675_v30, %v5790_v11 }
 0x291   : > { %7673 = vst [vmem:[#allocation184_spill] sm:$0xff] %v5798_v34  ;;  %v7677_v31 = vld [vmem:[#allocation21_spill] sm:$0xff]  ;;  %v5825_v3 = vld [vmem:[#allocation2 + $0x58] sm:$0xff]  ;;  %v5838_v24 = vld [vmem:[#allocation2 + $0xc8] sm:$0xff]  ;;  %v2029_v61 = vmul.f32 1.442695, %v1996_v42  ;;  %vm1966_vm14 = vcmp.gt.f32.partialorder %v7676_v51, %v5790_v11 }
 0x292   : > { %7674 = vst [vmem:[#allocation185_spill] sm:$0xff] %v5800_v35  ;;  %v7678_v26 = vld [vmem:[#allocation25_spill] sm:$0xff]  ;;  %v5848_v54 = vld [vmem:[#allocation2 + $0x90] sm:$0xff]  ;;  %v5866_v1 = vld [vmem:[#allocation2 + $0xa8] sm:$0xff]  ;;  %v2031_v40 = vmul.f32 1.442695, %v1997_v36  ;;  %vm1967_vm13 = vcmp.gt.f32.partialorder %v7677_v31, %v5790_v11 }
 0x293   : > { %7679 = vst [vmem:[#allocation186_spill] sm:$0xff] %v5811_v4  ;;  %v7682_v18 = vld [vmem:[#allocation29_spill] sm:$0xff]  ;;  %v5850_v41 = vld [vmem:[#allocation2 + $0x70] sm:$0xff]  ;;  %v1998_v16 = vmul.f32 3.1, %v7676_v51  ;;  %v5879_v14 = vld [vmem:[#allocation2 + $0x28] sm:$0xff]  ;;  %3437 = vpow2.f32 %v2029_v61  ;;  %vm1968_vm10 = vcmp.gt.f32.partialorder %v7678_v26, %v5790_v11 }
 0x294   : > { %7680 = vst [vmem:[#allocation187_spill] sm:$0xff] %v5813_v59  ;;  %v7683_v45 = vld [vmem:[#allocation33_spill] sm:$0xff]  ;;  %v7699_v12 = vld [vmem:[#allocation7_spill] sm:$0xff]  ;;  %v1999_v42 = vmul.f32 3.1, %v7677_v31  ;;  %3439 = vpow2.f32 %v2031_v40  ;;  %vm1969_vm2 = vcmp.gt.f32.partialorder %v7682_v18, %v5790_v11 }
 0x295   : > { %7681 = vst [vmem:[#allocation188_spill] sm:$0xff] %v5815_v43  ;;  %v7684_v58 = vld [vmem:[#allocation37_spill] sm:$0xff]  ;;  %v7700_v20 = vld [vmem:[#allocation11_spill] sm:$0xff]  ;;  %v2000_v22 = vmul.f32 3.1, %v7678_v26  ;;  %v3436_v8 = vpop.eup %3435  ;;  %vm1970_vm7 = vcmp.gt.f32.partialorder %v7683_v45, %v5790_v11 }
 0x296   : > { %7685 = vst [vmem:[#allocation189_spill] sm:$0xff] %v5823_v55  ;;  %v5827_v56 = vld [vmem:[#allocation2 + $0x40] sm:$0xff]  ;;  %v7701_v27 = vld [vmem:[#allocation15_spill] sm:$0xff]  ;;  %v2033_v36 = vmul.f32 1.442695, %v1998_v16  ;;  %v2091_v53 = vsel %vm1963_vm4, %v3436_v8, 0.0  ;;  %vm1971_vm0 = vcmp.gt.f32.partialorder %v7684_v58, %v5790_v11  ;;  %vm1979_vm4 = vcmp.gt.f32.partialorder %v7699_v12, %v5790_v11 }
 0x297   : > { %7686 = vst [vmem:[#allocation190_spill] sm:$0xff] %v5825_v3  ;;  %v7688_v50 = vld [vmem:[#allocation41_spill] sm:$0xff]  ;;  %v7703_v5 = vld [vmem:[#allocation19_spill] sm:$0xff]  ;;  %v2001_v46 = vmul.f32 3.1, %v7682_v18 }
 0x298   : > { %7687 = vst [vmem:[#allocation191_spill] sm:$0xff] %v5827_v56  ;;  %v7689_v7 = vld [vmem:[#allocation45_spill] sm:$0xff]  ;;  %v7704_v6 = vld [vmem:[#allocation23_spill] sm:$0xff]  ;;  %v2002_v21 = vmul.f32 3.1, %v7683_v45  ;;  %3441 = vpow2.f32 %v2033_v36  ;;  %vm1972_vm6 = vcmp.gt.f32.partialorder %v7688_v50, %v5790_v11 }
 0x299   : > { %v7690_v39 = vld [vmem:[#allocation49_spill] sm:$0xff]  ;;  %7691 = vst [vmem:[#allocation192_spill] sm:$0xff] %v5838_v24  ;;  %v5868_v60 = vld [vmem:[#allocation2 + $0xd0] sm:$0xff]  ;;  %v2035_v32 = vmul.f32 1.442695, %v1999_v42  ;;  %v5900_v42 = vld [vmem:[#allocation2 + $0xf8] sm:$0xff]  ;;  %vm1973_vm9 = vcmp.gt.f32.partialorder %v7689_v7, %v5790_v11 }
 0x29a   : > { %v5840_v13 = vld [vmem:[#allocation2 + $0xe0] sm:$0xff]  ;;  %7696 = vst [vmem:[#allocation194_spill] sm:$0xff] %v5848_v54  ;;  %v7707_v33 = vld [vmem:[#allocation27_spill] sm:$0xff]  ;;  %v2003_v54 = vmul.f32 3.1, %v7684_v58  ;;  %vm1974_vm15 = vcmp.gt.f32.partialorder %v7690_v39, %v5790_v11 }
 0x29b   : > { %7692 = vst [vmem:[#allocation193_spill] sm:$0xff] %v5840_v13  ;;  %v7693_v49 = vld [vmem:[#allocation53_spill] sm:$0xff]  ;;  %v7708_v52 = vld [vmem:[#allocation31_spill] sm:$0xff]  ;;  %v2039_v16 = vmul.f32 1.442695, %v2001_v46  ;;  %3443 = vpow2.f32 %v2035_v32 }
 0x29c   : > { %v7694_v17 = vld [vmem:[#allocation57_spill] sm:$0xff]  ;;  %7697 = vst [vmem:[#allocation195_spill] sm:$0xff] %v5850_v41  ;;  %v5877_v10 = vld [vmem:[#allocation2 + $0x10] sm:$0xff]  ;;  %v2037_v41 = vmul.f32 1.442695, %v2000_v22  ;;  %vm1975_vm12 = vcmp.gt.f32.partialorder %v7693_v49, %v5790_v11 }
 0x29d   : > { %v7695_v48 = vld [vmem:[#allocation61_spill] sm:$0xff]  ;;  %7705 = vst [vmem:[#allocation197_spill] sm:$0xff] %v5866_v1  ;;  %v7711_v37 = vld [vmem:[#allocation35_spill] sm:$0xff]  ;;  %v2041_v24 = vmul.f32 1.442695, %v2002_v21  ;;  %v3438_v1 = vpop.eup %3437  ;;  %vm1976_vm3 = vcmp.gt.f32.partialorder %v7694_v17, %v5790_v11 }
 0x29e   : > { %v7698_v23 = vld [vmem:[#allocation65_spill] sm:$0xff]  ;;  %7706 = vst [vmem:[#allocation198_spill] sm:$0xff] %v5868_v60  ;;  %v7712_v13 = vld [vmem:[#allocation39_spill] sm:$0xff]  ;;  %v2043_v56 = vmul.f32 1.442695, %v2003_v54  ;;  %3445 = vpow2.f32 %v2037_v41  ;;  %v3440_v41 = vpop.eup %3439  ;;  %v1931_v54 = vld [vmem:[#allocation3 + $0xc8] sm:$0xff]  ;;  %vm1977_vm8 = vcmp.gt.f32.partialorder %v7695_v48, %v5790_v11 }
 0x29f   : > { %v5860_v0 = vld [vmem:[#allocation2 + $0xc0] sm:$0xff]  ;;  %7709 = vst [vmem:[#allocation199_spill] sm:$0xff] %v5877_v10  ;;  %v7713_v61 = vld [vmem:[#allocation43_spill] sm:$0xff]  ;;  %v2004_v60 = vmul.f32 3.1, %v7688_v50  ;;  %3447 = vpow2.f32 %v2039_v16  ;;  %vm1978_vm5 = vcmp.gt.f32.partialorder %v7698_v23, %v5790_v11 }
 0x2a0   : > { %7702 = vst [vmem:[#allocation196_spill] sm:$0xff] %v5860_v0  ;;  %v5894_v3 = vld [vmem:[#allocation2 + $0xa0] sm:$0xff]  ;;  %v7715_v55 = vld [vmem:[#allocation47_spill] sm:$0xff]  ;;  %v5904_v0 = vld [vmem:[#allocation2 + $0x98] sm:$0xff]  ;;  %v2005_v46 = vmul.f32 3.1, %v7689_v7  ;;  %3449 = vpow2.f32 %v2041_v24 }
 0x2a1   : > { %7710 = vst [vmem:[#allocation200_spill] sm:$0xff] %v5879_v14  ;;  %v7716_v59 = vld [vmem:[#allocation51_spill] sm:$0xff]  ;;  %v5902_v22 = vld [vmem:[#allocation2 + $0x20] sm:$0xff]  ;;  %v2006_v14 = vmul.f32 3.1, %v7690_v39  ;;  %3451 = vpow2.f32 %v2043_v56 }
 0x2a2   : > { %7714 = vst [vmem:[#allocation201_spill] sm:$0xff] %v5894_v3  ;;  %v7720_v40 = vld [vmem:[#allocation55_spill] sm:$0xff]  ;;  %v1930_v10 = vld [vmem:[#allocation3 + $0x80] sm:$0xff]  ;;  %v2045_v4 = vmul.f32 1.442695, %v2004_v60  ;;  %v2092_v60 = vsel %vm1964_vm1, %v3438_v1, 0.0  ;;  %vm1980_vm1 = vcmp.gt.f32.partialorder %v7700_v20, %v5790_v11 }
 0x2a3   : > { %7717 = vst [vmem:[#allocation202_spill] sm:$0xff] %v5900_v42  ;;  %v7721_v36 = vld [vmem:[#allocation59_spill] sm:$0xff]  ;;  %v2007_v8 = vmul.f32 3.1, %v7693_v49  ;;  %v5923_v3 = vadd.f32 %v2091_v53, %v1930_v10  ;;  %v2047_v34 = vmul.f32 1.442695, %v2005_v46  ;;  %v3442_v42 = vpop.eup %3441 }
 0x2a4   : > { %7718 = vst [vmem:[#allocation203_spill] sm:$0xff] %v5902_v22  ;;  %v7722_v21 = vld [vmem:[#allocation63_spill] sm:$0xff]  ;;  %v2008_v32 = vmul.f32 3.1, %v7694_v17  ;;  %v2049_v16 = vmul.f32 1.442695, %v2006_v14  ;;  %v3444_v43 = vpop.eup %3443  ;;  %3453 = vpow2.f32 %v2045_v4 }
 0x2a5   : > { %7719 = vst [vmem:[#allocation204_spill] sm:$0xff] %v5904_v0  ;;  %v7723_v35 = vld [vmem:[#allocation67_spill] sm:$0xff]  ;;  %v2009_v24 = vmul.f32 3.1, %v7695_v48  ;;  %v2051_v53 = vmul.f32 1.442695, %v2007_v8  ;;  %v3446_v56 = vpop.eup %3445  ;;  %3455 = vpow2.f32 %v2047_v34 }
 0x2a6   : > { %7724 = vst [vmem:[#allocation205_spill] sm:$0xff] %v5923_v3  ;;  %v1932_v10 = vld [vmem:[#allocation3 + $0xe8] sm:$0xff]  ;;  %v2093_v1 = vsel %vm1965_vm11, %v3440_v41, 0.0  ;;  %v2053_v14 = vmul.f32 1.442695, %v2008_v32  ;;  %v3448_v46 = vpop.eup %3447  ;;  %v5943_v3 = vadd.f32 %v2092_v60, %v1931_v54  ;;  %3457 = vpow2.f32 %v2049_v16  ;;  %v1933_v54 = vld [vmem:[#allocation3 + $0x78] sm:$0xff] }
 0x2a7   : > { %v2055_v4 = vmul.f32 1.442695, %v2009_v24  ;;  %v3450_v8 = vpop.eup %3449  ;;  %v2010_v41 = vmul.f32 3.1, %v7698_v23  ;;  %v5952_v32 = vadd.f32 %v2093_v1, %v1932_v10  ;;  %3459 = vpow2.f32 %v2051_v53  ;;  %v1934_v24 = vld [vmem:[#allocation3 + $0x8] sm:$0xff]  ;;  %v1936_v53 = vld [vmem:[#allocation3 + $0x58] sm:$0xff] }
 0x2a8   : > { %7725 = vst [vmem:[#allocation206_spill] sm:$0xff] %v5943_v3  ;;  %v3452_v0 = vpop.eup %3451  ;;  %v2011_v34 = vmul.f32 3.1, %v7699_v12  ;;  %v2094_v60 = vsel %vm1966_vm14, %v3442_v42, 0.0  ;;  %v2095_v16 = vsel %vm1967_vm13, %v3444_v43, 0.0  ;;  %v1935_v3 = vld [vmem:[#allocation3 + $0x90] sm:$0xff]  ;;  %3461 = vpow2.f32 %v2053_v14 }
 0x2a9   : > { %7726 = vst [vmem:[#allocation207_spill] sm:$0xff] %v5952_v32  ;;  %v2096_v10 = vsel %vm1968_vm10, %v3446_v56, 0.0  ;;  %v2097_v32 = vsel %vm1969_vm2, %v3448_v46, 0.0  ;;  %3463 = vpow2.f32 %v2055_v4  ;;  %v2012_v42 = vmul.f32 3.1, %v7700_v20  ;;  %v1937_v22 = vld [vmem:[#allocation3 + $0xa8] sm:$0xff] }
 0x2aa   : > { %v3454_v1 = vpop.eup %3453  ;;  %v2098_v43 = vsel %vm1970_vm7, %v3450_v8, 0.0  ;;  %v1938_v19 = vld [vmem:[#allocation3 + $0xd0] sm:$0xff]  ;;  %v2099_v56 = vsel %vm1971_vm0, %v3452_v0, 0.0  ;;  %v2057_v14 = vmul.f32 1.442695, %v2010_v41  ;;  %v5980_v2 = vadd.f32 %v2094_v60, %v1933_v54 }
 0x2ab   : > { %v3456_v46 = vpop.eup %3455  ;;  %v5982_v4 = vadd.f32 %v2095_v16, %v1934_v24  ;;  %v5984_v9 = vadd.f32 %v2096_v10, %v1935_v3  ;;  %v2059_v38 = vmul.f32 1.442695, %v2011_v34  ;;  %v5986_v45 = vadd.f32 %v2097_v32, %v1936_v53  ;;  %v1939_v8 = vld [vmem:[#allocation3 + $0xb0] sm:$0xff]  ;;  %v1940_v16 = vld [vmem:[#allocation3 + $0x38] sm:$0xff] }
 0x2ac   : > { %7727 = vst [vmem:[#allocation208_spill] sm:$0xff] %v5980_v2  ;;  %v3458_v18 = vpop.eup %3457  ;;  %v2100_v0 = vsel %vm1972_vm6, %v3454_v1, 0.0  ;;  %v2061_v41 = vmul.f32 1.442695, %v2012_v42  ;;  %v2013_v54 = vmul.f32 3.1, %v7701_v27  ;;  %v5994_v24 = vadd.f32 %v2098_v43, %v1937_v22 }
 0x2ad   : > { %7728 = vst [vmem:[#allocation209_spill] sm:$0xff] %v5982_v4  ;;  %v3460_v60 = vpop.eup %3459  ;;  %v5996_v3 = vadd.f32 %v2099_v56, %v1938_v19  ;;  %v2014_v32 = vmul.f32 3.1, %v7703_v5  ;;  %v2101_v10 = vsel %vm1973_vm9, %v3456_v46, 0.0  ;;  %3465 = vpow2.f32 %v2057_v14  ;;  %v1941_v56 = vld [vmem:[#allocation3 + $0x40] sm:$0xff]  ;;  %v7748_v4 = vld [vmem:[#allocation18_spill] sm:$0xff] }
 0x2ae   : > { %7729 = vst [vmem:[#allocation210_spill] sm:$0xff] %v5984_v9  ;;  %v3462_v34 = vpop.eup %3461  ;;  %v2063_v1 = vmul.f32 1.442695, %v2013_v54  ;;  %v2015_v22 = vmul.f32 3.1, %v7704_v6  ;;  %v6007_v53 = vadd.f32 %v2100_v0, %v1939_v8  ;;  %3467 = vpow2.f32 %v2059_v38  ;;  %v1942_v54 = vld [vmem:[#allocation3 + $0xe0] sm:$0xff] }
 0x2af   : > { %7730 = vst [vmem:[#allocation211_spill] sm:$0xff] %v5986_v45  ;;  %v3464_v19 = vpop.eup %3463  ;;  %v2065_v42 = vmul.f32 1.442695, %v2014_v32  ;;  %v2016_v43 = vmul.f32 3.1, %v7707_v33  ;;  %3469 = vpow2.f32 %v2061_v41  ;;  %v2103_v8 = vsel %vm1975_vm12, %v3460_v60, 0.0 }
 0x2b0   : > { %7731 = vst [vmem:[#allocation212_spill] sm:$0xff] %v5994_v24  ;;  %v2067_v14 = vmul.f32 1.442695, %v2015_v22  ;;  %v2017_v46 = vmul.f32 3.1, %v7708_v52  ;;  %v6014_v24 = vadd.f32 %v2101_v10, %v1940_v16  ;;  %v1943_v32 = vld [vmem:[#allocation3 + $0x60] sm:$0xff]  ;;  %3471 = vpow2.f32 %v2063_v1 }
 0x2b1   : > { %7732 = vst [vmem:[#allocation213_spill] sm:$0xff] %v5996_v3  ;;  %v2102_v3 = vsel %vm1974_vm15, %v3458_v18, 0.0  ;;  %v2069_v38 = vmul.f32 1.442695, %v2016_v43  ;;  %v2018_v0 = vmul.f32 3.1, %v7711_v37  ;;  %vm1981_vm11 = vcmp.gt.f32.partialorder %v7701_v27, %v5790_v11 }
 0x2b2   : > { %7733 = vst [vmem:[#allocation214_spill] sm:$0xff] %v6007_v53  ;;  %v2104_v53 = vsel %vm1976_vm3, %v3462_v34, 0.0  ;;  %v1944_v18 = vld [vmem:[#allocation3 + $0x18] sm:$0xff]  ;;  %v2105_v41 = vsel %vm1977_vm8, %v3464_v19, 0.0  ;;  %v2071_v16 = vmul.f32 1.442695, %v2017_v46  ;;  %v6026_v10 = vadd.f32 %v2102_v3, %v1941_v56 }
 0x2b3   : > { %7734 = vst [vmem:[#allocation215_spill] sm:$0xff] %v6014_v24  ;;  %3473 = vpow2.f32 %v2065_v42  ;;  %v2073_v60 = vmul.f32 1.442695, %v2018_v0  ;;  %v3466_v22 = vpop.eup %3465  ;;  %v6030_v43 = vadd.f32 %v2103_v8, %v1942_v54  ;;  %vm1982_vm14 = vcmp.gt.f32.partialorder %v7703_v5, %v5790_v11  ;;  %v1945_v8 = vld [vmem:[#allocation3 + $0x68] sm:$0xff] }
 0x2b4   : > { %7735 = vst [vmem:[#allocation216_spill] sm:$0xff] %v6026_v10  ;;  %3475 = vpow2.f32 %v2067_v14  ;;  %v2019_v34 = vmul.f32 3.1, %v7712_v13  ;;  %v3468_v24 = vpop.eup %3467  ;;  %v6035_v19 = vadd.f32 %v2104_v53, %v1943_v32  ;;  %v6037_v1 = vadd.f32 %v2105_v41, %v1944_v18  ;;  %v7746_v45 = vld [vmem:[#allocation14_spill] sm:$0xff] }
 0x2b5   : > { %7736 = vst [vmem:[#allocation217_spill] sm:$0xff] %v6030_v43  ;;  %3477 = vpow2.f32 %v2069_v38  ;;  %v2020_v3 = vmul.f32 3.1, %v7713_v61  ;;  %v3470_v56 = vpop.eup %3469  ;;  %v2021_v46 = vmul.f32 3.1, %v7715_v55  ;;  %v2106_v14 = vsel %vm1978_vm5, %v3466_v22, 0.0 }
 0x2b6   : > { %7737 = vst [vmem:[#allocation218_spill] sm:$0xff] %v6035_v19  ;;  %3479 = vpow2.f32 %v2071_v16  ;;  %v2075_v42 = vmul.f32 1.442695, %v2019_v34  ;;  %v2022_v54 = vmul.f32 3.1, %v7716_v59  ;;  %v3472_v32 = vpop.eup %3471  ;;  %v1946_v38 = vld [vmem:[#allocation3 + $0x10] sm:$0xff]  ;;  %vm1983_vm13 = vcmp.gt.f32.partialorder %v7704_v6, %v5790_v11 }
 0x2b7   : > { %7738 = vst [vmem:[#allocation219_spill] sm:$0xff] %v6037_v1  ;;  %3481 = vpow2.f32 %v2073_v60  ;;  %v2077_v53 = vmul.f32 1.442695, %v2020_v3  ;;  %v2023_v0 = vmul.f32 3.1, %v7720_v40  ;;  %v2107_v18 = vsel %vm1979_vm4, %v3468_v24, 0.0 }
 0x2b8   : > { %3483 = vpow2.f32 %v2075_v42  ;;  %v2079_v41 = vmul.f32 1.442695, %v2021_v46  ;;  %v1947_v34 = vld [vmem:[#allocation3 + $0x70] sm:$0xff]  ;;  %v2108_v60 = vsel %vm1980_vm1, %v3470_v56, 0.0  ;;  %vm1984_vm10 = vcmp.gt.f32.partialorder %v7707_v33, %v5790_v11  ;;  %v7744_v19 = vld [vmem:[#allocation10_spill] sm:$0xff] }
 0x2b9   : > { %v3474_v16 = vpop.eup %3473  ;;  %3485 = vpow2.f32 %v2077_v53  ;;  %v2081_v22 = vmul.f32 1.442695, %v2022_v54  ;;  %v6056_v1 = vadd.f32 %v2106_v14, %v1945_v8  ;;  %vm1985_vm2 = vcmp.gt.f32.partialorder %v7708_v52, %v5790_v11  ;;  %v1948_v53 = vld [vmem:[#allocation3 + $0x50] sm:$0xff] }
 0x2ba   : > { %v3476_v3 = vpop.eup %3475  ;;  %vm1986_vm7 = vcmp.gt.f32.partialorder %v7711_v37, %v5790_v11  ;;  %3487 = vpow2.f32 %v2079_v41  ;;  %v6062_v42 = vadd.f32 %v2107_v18, %v1946_v38  ;;  %vm1987_vm0 = vcmp.gt.f32.partialorder %v7712_v13, %v5790_v11  ;;  %v1949_v18 = vld [vmem:[#allocation3 + $0xa0] sm:$0xff]  ;;  %v1950_v41 = vld [vmem:[#allocation3 + $0xd8] sm:$0xff] }
 0x2bb   : > { %7739 = vst [vmem:[#allocation220_spill] sm:$0xff] %v6056_v1  ;;  %v3478_v24 = vpop.eup %3477  ;;  %3489 = vpow2.f32 %v2081_v22  ;;  %v2083_v56 = vmul.f32 1.442695, %v2023_v0  ;;  %v6066_v54 = vadd.f32 %v2108_v60, %v1947_v34  ;;  %vm1988_vm6 = vcmp.gt.f32.partialorder %v7713_v61, %v5790_v11 }
 0x2bc   : > { %7740 = vst [vmem:[#allocation221_spill] sm:$0xff] %v6062_v42  ;;  %v3480_v46 = vpop.eup %3479  ;;  %vm1989_vm9 = vcmp.gt.f32.partialorder %v7715_v55, %v5790_v11  ;;  %v2024_v8 = vmul.f32 3.1, %v7721_v36  ;;  %v2109_v38 = vsel %vm1981_vm11, %v3472_v32, 0.0  ;;  %v2110_v0 = vsel %vm1982_vm14, %v3474_v16, 0.0  ;;  %v7742_v42 = vld [vmem:[#allocation6_spill] sm:$0xff] }
 0x2bd   : > { %7741 = vst [vmem:[#allocation222_spill] sm:$0xff] %v6066_v54  ;;  %v3482_v14 = vpop.eup %3481  ;;  %v2111_v34 = vsel %vm1983_vm13, %v3476_v3, 0.0  ;;  %vm1990_vm15 = vcmp.gt.f32.partialorder %v7716_v59, %v5790_v11  ;;  %v2025_v54 = vmul.f32 3.1, %v7722_v21  ;;  %v7743_v32 = vmax.f32 %v5769_v44, %v7667_v63 }
 0x2be   : > { %v3484_v60 = vpop.eup %3483  ;;  %v2085_v22 = vmul.f32 1.442695, %v2024_v8  ;;  %v7745_v16 = vmax.f32 %v5771_v57, %v7671_v28  ;;  %3491 = vpow2.f32 %v2083_v56  ;;  %v2026_v3 = vmul.f32 3.1, %v7723_v35  ;;  %v1951_v56 = vld [vmem:[#allocation3 + $0x30] sm:$0xff] }
 0x2bf   : > { %v2219_v1 = vmax.f32 %v7743_v32, %v7742_v42  ;;  %v3486_v10 = vpop.eup %3485  ;;  %v7747_v8 = vmax.f32 %v5773_v62, %v7675_v30  ;;  %v7749_v2 = vmax.f32 %v5775_v47, %v7676_v51  ;;  %v6102_v32 = vadd.f32 %v2109_v38, %v1948_v53  ;;  %v1952_v30 = vld [vmem:[#allocation3 + $0x20] sm:$0xff]  ;;  %v1953_v38 = vld [vmem:[#allocation3 + $0xf0] sm:$0xff] }
 0x2c0   : > { %v2220_v43 = vmax.f32 %v7745_v16, %v7744_v19  ;;  %v3488_v44 = vpop.eup %3487  ;;  %v6104_v21 = vadd.f32 %v2110_v0, %v1949_v18  ;;  %v6106_v57 = vadd.f32 %v2111_v34, %v1950_v41  ;;  %vm1991_vm12 = vcmp.gt.f32.partialorder %v7720_v40, %v5790_v11  ;;  %v7754_v0 = vld [vmem:[#allocation26_spill] sm:$0xff] }
 0x2c1   : > { %v2221_v9 = vmax.f32 %v7747_v8, %v7746_v45  ;;  %v2222_v63 = vmax.f32 %v7749_v2, %v7748_v4  ;;  %2251 = vst [vmem:[#allocation2 + $0xb0] sm:$0xff] %v2219_v1  ;;  %v3490_v28 = vpop.eup %3489  ;;  %v2112_v62 = vsel %vm1984_vm10, %v3478_v24, 0.0  ;;  %v2113_v47 = vsel %vm1985_vm2, %v3480_v46, 0.0  ;;  %v7752_v2 = vld [vmem:[#allocation22_spill] sm:$0xff]  ;;  %v7761_v8 = vld [vmem:[#allocation33_spill] sm:$0xff] }
 0x2c2   : > { %7750 = vst [vmem:[#allocation223_spill] sm:$0xff] %v6104_v21  ;;  %3493 = vpow2.f32 %v2085_v22  ;;  %v7753_v51 = vmax.f32 %v5777_v29, %v7677_v31  ;;  %v2114_v1 = vsel %vm1986_vm7, %v3482_v14, 0.0  ;;  %v2115_v24 = vsel %vm1987_vm0, %v3484_v60, 0.0  ;;  %v1954_v41 = vld [vmem:[#allocation3 + $0x88] sm:$0xff]  ;;  %v7757_v22 = vld [vmem:[#allocation29_spill] sm:$0xff] }
 0x2c3   : > { %7751 = vst [vmem:[#allocation224_spill] sm:$0xff] %v6106_v57  ;;  %v2087_v18 = vmul.f32 1.442695, %v2025_v54  ;;  %v1955_v34 = vld [vmem:[#allocation3 + $0x48] sm:$0xff]  ;;  %v2116_v29 = vsel %vm1988_vm6, %v3486_v10, 0.0  ;;  %v7758_v16 = vmax.f32 %v5781_v15, %v7757_v22  ;;  %v1957_v10 = vld [vmem:[#allocation3 + $0xc0] sm:$0xff]  ;;  %vm1992_vm3 = vcmp.gt.f32.partialorder %v7721_v36, %v5790_v11 }
 0x2c4   : > { %2252 = vst [vmem:[#allocation2] sm:$0xff] %v2220_v43  ;;  %v2223_v53 = vmax.f32 %v7753_v51, %v7752_v2  ;;  %v7755_v43 = vmax.f32 %v5779_v25, %v7678_v26  ;;  %v2089_v31 = vmul.f32 1.442695, %v2026_v3  ;;  %v7756_v14 = vld [vmem:[#allocation30_spill] sm:$0xff]  ;;  %v6141_v25 = vadd.f32 %v2112_v62, %v1951_v56  ;;  %v1956_v26 = vld [vmem:[#allocation3 + $0xf8] sm:$0xff]  ;;  %v7770_v62 = vld [vmem:[#allocation182_spill] sm:$0xff] }
 0x2c5   : > { %2253 = vst [vmem:[#allocation2 + $0xd8] sm:$0xff] %v2221_v9  ;;  %v2225_v60 = vmax.f32 %v7758_v16, %v7756_v14  ;;  %v7759_v54 = vld [vmem:[#allocation34_spill] sm:$0xff]  ;;  %v7760_v9 = vld [vmem:[#allocation180_spill] sm:$0xff]  ;;  %v2118_v3 = vsel %vm1990_vm15, %v3490_v28, 0.0  ;;  %v6155_v56 = vadd.f32 %v2114_v1, %v1953_v38  ;;  %3495 = vpow2.f32 %v2087_v18 }
 0x2c6   : > { %v2224_v46 = vmax.f32 %v7755_v43, %v7754_v0  ;;  %2254 = vst [vmem:[#allocation2 + $0x18] sm:$0xff] %v2222_v63  ;;  %v7762_v51 = vmax.f32 %v7760_v9, %v7761_v8  ;;  %v2117_v43 = vsel %vm1989_vm9, %v3488_v44, 0.0  ;;  %v7764_v15 = vld [vmem:[#allocation38_spill] sm:$0xff]  ;;  %v3492_v9 = vpop.eup %3491  ;;  %v6153_v8 = vadd.f32 %v2113_v47, %v1952_v30  ;;  %v7775_v30 = vld [vmem:[#allocation183_spill] sm:$0xff] }
 0x2c7   : > { %7763 = vst [vmem:[#allocation180_spill] sm:$0xff] %v6141_v25  ;;  %v7765_v63 = vld [vmem:[#allocation181_spill] sm:$0xff]  ;;  %v6165_v25 = vadd.f32 %v2116_v29, %v1955_v34  ;;  %v7776_v47 = vmax.f32 %v7775_v30, %v7689_v7  ;;  %3497 = vpow2.f32 %v2089_v31  ;;  %v6182_v18 = vsel %vm1991_vm12, %v3492_v9, 0.0  ;;  %v7793_v9 = vld [vmem:[#allocation188_spill] sm:$0xff] }
 0x2c8   : > { %v2226_v57 = vmax.f32 %v7762_v51, %v7759_v54  ;;  %2255 = vst [vmem:[#allocation2 + $0x50] sm:$0xff] %v2223_v53  ;;  %v7766_v22 = vmax.f32 %v7765_v63, %v7684_v58  ;;  %v7769_v44 = vld [vmem:[#allocation42_spill] sm:$0xff]  ;;  %v7771_v51 = vmax.f32 %v7770_v62, %v7688_v50  ;;  %v6163_v53 = vadd.f32 %v2115_v24, %v1954_v41  ;;  %v3494_v1 = vpop.eup %3493 }
 0x2c9   : > { %7767 = vst [vmem:[#allocation181_spill] sm:$0xff] %v6153_v8  ;;  %v7774_v58 = vld [vmem:[#allocation46_spill] sm:$0xff]  ;;  %v6171_v63 = vadd.f32 %v2117_v43, %v1956_v26  ;;  %v7787_v43 = vld [vmem:[#allocation186_spill] sm:$0xff]  ;;  %vm2315_vm8 = vcmp.gt.f32.partialorder %v7742_v42, %v5790_v11  ;;  %vm2316_vm5 = vcmp.gt.f32.partialorder %v7744_v19, %v5790_v11  ;;  %vm2317_vm4 = vcmp.gt.f32.partialorder %v7746_v45, %v5790_v11 }
 0x2ca   : > { %v2227_v16 = vmax.f32 %v7766_v22, %v7764_v15  ;;  %7768 = vst [vmem:[#allocation225_spill] sm:$0xff] %v6155_v56  ;;  %v2228_v28 = vmax.f32 %v7771_v51, %v7769_v44  ;;  %v2229_v38 = vmax.f32 %v7776_v47, %v7774_v58  ;;  %v7779_v50 = vld [vmem:[#allocation50_spill] sm:$0xff]  ;;  %v7780_v22 = vld [vmem:[#allocation184_spill] sm:$0xff]  ;;  %v7795_v47 = vld [vmem:[#allocation8_spill] sm:$0xff]  ;;  %vm2318_vm1 = vcmp.gt.f32.partialorder %v7748_v4, %v5790_v11 }
 0x2cb   : > { %2256 = vst [vmem:[#allocation2 + $0x68] sm:$0xff] %v2224_v46  ;;  %v6173_v46 = vadd.f32 %v2118_v3, %v1957_v10  ;;  %v7781_v24 = vmax.f32 %v7780_v22, %v7690_v39  ;;  %v7783_v7 = vld [vmem:[#allocation54_spill] sm:$0xff]  ;;  %v7790_v3 = vld [vmem:[#allocation187_spill] sm:$0xff]  ;;  %vm2319_vm11 = vcmp.gt.f32.partialorder %v7752_v2, %v5790_v11  ;;  %vm2320_vm14 = vcmp.gt.f32.partialorder %v7754_v0, %v5790_v11 }
 0x2cc   : > { %7772 = vst [vmem:[#allocation182_spill] sm:$0xff] %v6163_v53  ;;  %v7784_v34 = vld [vmem:[#allocation185_spill] sm:$0xff]  ;;  %v7791_v39 = vmax.f32 %v7790_v3, %v7695_v48  ;;  %v7805_v3 = vld [vmem:[#allocation20_spill] sm:$0xff]  ;;  %vm2321_vm13 = vcmp.gt.f32.partialorder %v7756_v14, %v5790_v11  ;;  %vm2322_vm10 = vcmp.gt.f32.partialorder %v7759_v54, %v5790_v11  ;;  %vm2323_vm2 = vcmp.gt.f32.partialorder %v7764_v15, %v5790_v11 }
 0x2cd   : > { %7773 = vst [vmem:[#allocation226_spill] sm:$0xff] %v6165_v25  ;;  %v2230_v41 = vmax.f32 %v7781_v24, %v7779_v50  ;;  %v7785_v29 = vmax.f32 %v7784_v34, %v7693_v49  ;;  %v7786_v26 = vld [vmem:[#allocation58_spill] sm:$0xff]  ;;  %v7798_v34 = vld [vmem:[#allocation12_spill] sm:$0xff]  ;;  %vm2324_vm7 = vcmp.gt.f32.partialorder %v7769_v44, %v5790_v11  ;;  %vm2325_vm0 = vcmp.gt.f32.partialorder %v7774_v58, %v5790_v11 }
 0x2ce   : > { %2257 = vst [vmem:[#allocation2 + $0x30] sm:$0xff] %v2225_v60  ;;  %v7789_v10 = vld [vmem:[#allocation62_spill] sm:$0xff]  ;;  %v7840_v56 = vld [vmem:[#allocation64_spill] sm:$0xff]  ;;  %vm2326_vm6 = vcmp.gt.f32.partialorder %v7779_v50, %v5790_v11  ;;  %vm2327_vm9 = vcmp.gt.f32.partialorder %v7783_v7, %v5790_v11  ;;  %vm2328_vm15 = vcmp.gt.f32.partialorder %v7786_v26, %v5790_v11 }
 0x2cf   : > { %7777 = vst [vmem:[#allocation183_spill] sm:$0xff] %v6171_v63  ;;  %v2231_v60 = vmax.f32 %v7785_v29, %v7783_v7  ;;  %v2233_v62 = vmax.f32 %v7791_v39, %v7789_v10  ;;  %v7792_v51 = vld [vmem:[#allocation66_spill] sm:$0xff]  ;;  %v7799_v29 = vld [vmem:[#allocation190_spill] sm:$0xff]  ;;  %v7806_v39 = vld [vmem:[#allocation192_spill] sm:$0xff]  ;;  %vm2329_vm12 = vcmp.gt.f32.partialorder %v7789_v10, %v5790_v11 }
 0x2d0   : > { %7778 = vst [vmem:[#allocation227_spill] sm:$0xff] %v6173_v46  ;;  %v7796_v22 = vld [vmem:[#allocation189_spill] sm:$0xff]  ;;  %v7802_v46 = vld [vmem:[#allocation191_spill] sm:$0xff] }
 0x2d1   : > { %2258 = vst [vmem:[#allocation2 + $0x48] sm:$0xff] %v2226_v57  ;;  %v7788_v57 = vmax.f32 %v7787_v43, %v7694_v17  ;;  %v7797_v49 = vmax.f32 %v7796_v22, %v7699_v12  ;;  %v7800_v17 = vmax.f32 %v7799_v29, %v7700_v20  ;;  %v7803_v48 = vmax.f32 %v7802_v46, %v7701_v27  ;;  %v7809_v22 = vld [vmem:[#allocation193_spill] sm:$0xff]  ;;  %v7811_v29 = vld [vmem:[#allocation28_spill] sm:$0xff] }
 0x2d2   : > { %7782 = vst [vmem:[#allocation184_spill] sm:$0xff] %v6182_v18  ;;  %v7807_v12 = vmax.f32 %v7806_v39, %v7703_v5  ;;  %v7810_v20 = vmax.f32 %v7809_v22, %v7704_v6  ;;  %v7817_v63 = vld [vmem:[#allocation36_spill] sm:$0xff]  ;;  %v7818_v18 = vld [vmem:[#allocation196_spill] sm:$0xff]  ;;  %v7821_v25 = vld [vmem:[#allocation197_spill] sm:$0xff] }
 0x2d3   : > { %2259 = vst [vmem:[#allocation2 + $0x80] sm:$0xff] %v2227_v16  ;;  %v2232_v31 = vmax.f32 %v7788_v57, %v7786_v26  ;;  %v7794_v16 = vmax.f32 %v7793_v9, %v7698_v23  ;;  %v2235_v24 = vmax.f32 %v7797_v49, %v7795_v47  ;;  %v2236_v43 = vmax.f32 %v7800_v17, %v7798_v34  ;;  %v7801_v57 = vld [vmem:[#allocation16_spill] sm:$0xff]  ;;  %v7812_v17 = vld [vmem:[#allocation194_spill] sm:$0xff] }
 0x2d4   : > { %2260 = vst [vmem:[#allocation2 + $0x88] sm:$0xff] %v2228_v28  ;;  %v2237_v28 = vmax.f32 %v7803_v48, %v7801_v57  ;;  %v6215_v23 = vsel %vm1992_vm3, %v3494_v1, 0.0  ;;  %v2238_v9 = vmax.f32 %v7807_v12, %v7805_v3  ;;  %v7813_v27 = vmax.f32 %v7812_v17, %v7707_v33  ;;  %v7814_v48 = vld [vmem:[#allocation32_spill] sm:$0xff]  ;;  %v7824_v33 = vld [vmem:[#allocation198_spill] sm:$0xff] }
 0x2d5   : > { %v2234_v30 = vmax.f32 %v7794_v16, %v7792_v51  ;;  %7804 = vst [vmem:[#allocation185_spill] sm:$0xff] %v6215_v23  ;;  %v7808_v16 = vld [vmem:[#allocation24_spill] sm:$0xff]  ;;  %v7819_v5 = vmax.f32 %v7818_v18, %v7711_v37  ;;  %v7822_v6 = vmax.f32 %v7821_v25, %v7712_v13  ;;  %vm2330_vm3 = vcmp.gt.f32.partialorder %v7792_v51, %v5790_v11 }
 0x2d6   : > { %2261 = vst [vmem:[#allocation2 + $0xe8] sm:$0xff] %v2229_v38  ;;  %v2239_v49 = vmax.f32 %v7810_v20, %v7808_v16  ;;  %v2240_v46 = vmax.f32 %v7813_v27, %v7811_v29  ;;  %v7815_v1 = vld [vmem:[#allocation195_spill] sm:$0xff]  ;;  %v6249_v27 = vpop.eup %3495 }
 0x2d7   : > { %2262 = vst [vmem:[#allocation2 + $0xb8] sm:$0xff] %v2230_v41  ;;  %v7816_v38 = vmax.f32 %v7815_v1, %v7708_v52  ;;  %v2242_v39 = vmax.f32 %v7819_v5, %v7817_v63  ;;  %v7820_v12 = vld [vmem:[#allocation40_spill] sm:$0xff]  ;;  %v7825_v41 = vmax.f32 %v7824_v33, %v7713_v61  ;;  %v7831_v5 = vld [vmem:[#allocation200_spill] sm:$0xff]  ;;  %v2348_v61 = vmul.f32 3.1, %v7744_v19  ;;  %v6265_v33 = vpop.eup %3497 }
 0x2d8   : > { %v6241_v22 = vmax.f32 %v7822_v6, %v7820_v12  ;;  %v7823_v20 = vld [vmem:[#allocation44_spill] sm:$0xff]  ;;  %7826 = vst [vmem:[#allocation186_spill] sm:$0xff] %v6249_v27  ;;  %v7832_v13 = vmax.f32 %v7831_v5, %v7716_v59  ;;  %v2347_v6 = vmul.f32 3.1, %v7742_v42  ;;  %v2349_v5 = vmul.f32 3.1, %v7746_v45 }
 0x2d9   : > { %v2241_v23 = vmax.f32 %v7816_v38, %v7814_v48  ;;  %v6247_v17 = vmax.f32 %v7825_v41, %v7823_v20  ;;  %2263 = vst [vmem:[#allocation2 + $0x60] sm:$0xff] %v2231_v60  ;;  %v7827_v52 = vld [vmem:[#allocation48_spill] sm:$0xff]  ;;  %v7835_v41 = vld [vmem:[#allocation201_spill] sm:$0xff]  ;;  %v2361_v45 = vmul.f32 3.1, %v7789_v10 }
 0x2da   : > { %v7828_v1 = vld [vmem:[#allocation199_spill] sm:$0xff]  ;;  %7833 = vst [vmem:[#allocation187_spill] sm:$0xff] %v6265_v33  ;;  %v7836_v27 = vmax.f32 %v7835_v41, %v7720_v40  ;;  %v2369_v10 = vmul.f32 3.1, %v7814_v48 }
 0x2db   : > { %v7829_v37 = vmax.f32 %v7828_v1, %v7715_v55  ;;  %v7830_v38 = vld [vmem:[#allocation52_spill] sm:$0xff]  ;;  %2264 = vst [vmem:[#allocation2 + $0xf0] sm:$0xff] %v2232_v31  ;;  %v7842_v31 = vld [vmem:[#allocation63_spill] sm:$0xff] }
 0x2dc   : > { %v6261_v25 = vmax.f32 %v7832_v13, %v7830_v38  ;;  %v7834_v60 = vld [vmem:[#allocation56_spill] sm:$0xff]  ;;  %v2350_v13 = vmul.f32 3.1, %v7748_v4  ;;  %2265 = vst [vmem:[#allocation2 + $0x8] sm:$0xff] %v2233_v62  ;;  %v2383_v62 = vmul.f32 1.442695, %v2349_v5 }
 0x2dd   : > { %v6255_v18 = vmax.f32 %v7829_v37, %v7827_v52  ;;  %v6271_v55 = vmax.f32 %v7836_v27, %v7834_v60  ;;  %v7837_v1 = vld [vmem:[#allocation60_spill] sm:$0xff]  ;;  %v7838_v37 = vld [vmem:[#allocation202_spill] sm:$0xff]  ;;  %v7845_v27 = vld [vmem:[#allocation204_spill] sm:$0xff]  ;;  %2266 = vst [vmem:[#allocation2 + $0x78] sm:$0xff] %v2234_v30  ;;  %v2353_v30 = vmul.f32 3.1, %v7756_v14 }
 0x2de   : > { %v7839_v53 = vmax.f32 %v7838_v37, %v7721_v36  ;;  %v7841_v33 = vld [vmem:[#allocation203_spill] sm:$0xff]  ;;  %v7846_v41 = vmax.f32 %v7845_v27, %v7723_v35  ;;  %v2379_v36 = vmul.f32 1.442695, %v2347_v6  ;;  %v2385_v37 = vmul.f32 1.442695, %v2350_v13  ;;  %2267 = vst [vmem:[#allocation2 + $0x38] sm:$0xff] %v2235_v24 }
 0x2df   : > { %v7843_v8 = vmax.f32 %v7841_v33, %v7842_v31  ;;  %v7844_v40 = vld [vmem:[#allocation68_spill] sm:$0xff]  ;;  %v2352_v33 = vmul.f32 3.1, %v7754_v0  ;;  %2268 = vst [vmem:[#allocation2 + $0x58] sm:$0xff] %v2236_v43  ;;  %v2354_v6 = vmul.f32 3.1, %v7759_v54 }
 0x2e0   : > { %v6277_v59 = vmax.f32 %v7839_v53, %v7837_v1  ;;  %v6291_v60 = vmax.f32 %v7846_v41, %v7844_v40  ;;  %v2381_v53 = vmul.f32 1.442695, %v2348_v61  ;;  %3499 = vpow2.f32 %v2379_v36  ;;  %2269 = vst [vmem:[#allocation2 + $0x40] sm:$0xff] %v2237_v28 }
 0x2e1   : > { %v6285_v21 = vmax.f32 %v7843_v8, %v7840_v56  ;;  %v2351_v8 = vmul.f32 3.1, %v7752_v2  ;;  %v2389_v61 = vmul.f32 1.442695, %v2352_v33  ;;  %2270 = vst [vmem:[#allocation2 + $0xc8] sm:$0xff] %v2238_v9 }
 0x2e2   : > { %3501 = vpow2.f32 %v2381_v53  ;;  %v2391_v43 = vmul.f32 1.442695, %v2353_v30  ;;  %v2393_v5 = vmul.f32 1.442695, %v2354_v6  ;;  %2271 = vst [vmem:[#allocation2 + $0xe0] sm:$0xff] %v2239_v49  ;;  %v7847_v30 = vld [vmem:[#allocation205_spill] sm:$0xff] }
 0x2e3   : > { %3503 = vpow2.f32 %v2383_v62  ;;  %v2387_v24 = vmul.f32 1.442695, %v2351_v8  ;;  %v2355_v28 = vmul.f32 3.1, %v7764_v15  ;;  %v2356_v13 = vmul.f32 3.1, %v7769_v44 }
 0x2e4   : > { %3505 = vpow2.f32 %v2385_v37  ;;  %2272 = vst [vmem:[#allocation2 + $0x90] sm:$0xff] %v2240_v46  ;;  %v2357_v9 = vmul.f32 3.1, %v7774_v58  ;;  %v2358_v27 = vmul.f32 3.1, %v7779_v50  ;;  %v7857_v50 = vld [vmem:[#allocation215_spill] sm:$0xff] }
 0x2e5   : > { %3507 = vpow2.f32 %v2387_v24  ;;  %2273 = vst [vmem:[#allocation2 + $0x70] sm:$0xff] %v2241_v23  ;;  %v2395_v49 = vmul.f32 1.442695, %v2355_v28  ;;  %v2397_v36 = vmul.f32 1.442695, %v2356_v13 }
 0x2e6   : > { %3509 = vpow2.f32 %v2389_v61  ;;  %v3500_v41 = vpop.eup %3499  ;;  %2274 = vst [vmem:[#allocation2 + $0xc0] sm:$0xff] %v2242_v39  ;;  %v2399_v62 = vmul.f32 1.442695, %v2357_v9  ;;  %v2401_v37 = vmul.f32 1.442695, %v2358_v27  ;;  %v7849_v27 = vld [vmem:[#allocation207_spill] sm:$0xff] }
 0x2e7   : > { %3511 = vpow2.f32 %v2391_v43  ;;  %v2443_v46 = vsel %vm2315_vm8, %v3500_v41, 0.0  ;;  %2275 = vst [vmem:[#allocation2 + $0xa8] sm:$0xff] %v6241_v22  ;;  %v2359_v23 = vmul.f32 3.1, %v7783_v7  ;;  %v2360_v22 = vmul.f32 3.1, %v7786_v26 }
 0x2e8   : > { %v3502_v53 = vpop.eup %3501  ;;  %3513 = vpow2.f32 %v2393_v5  ;;  %2276 = vst [vmem:[#allocation2 + $0xd0] sm:$0xff] %v6247_v17  ;;  %v2475_v6 = vadd.f32 %v2443_v46, %v7847_v30  ;;  %v7848_v5 = vld [vmem:[#allocation206_spill] sm:$0xff]  ;;  %v2362_v2 = vmul.f32 3.1, %v7792_v51  ;;  %vm2331_vm8 = vcmp.gt.f32.partialorder %v7795_v47, %v5790_v11 }
 0x2e9   : > { %v3504_v8 = vpop.eup %3503  ;;  %3515 = vpow2.f32 %v2395_v49  ;;  %v2444_v42 = vsel %vm2316_vm5, %v3502_v53, 0.0  ;;  %2277 = vst [vmem:[#allocation2 + $0x10] sm:$0xff] %v6255_v18  ;;  %v2403_v17 = vmul.f32 1.442695, %v2359_v23  ;;  %v2405_v18 = vmul.f32 1.442695, %v2360_v22 }
 0x2ea   : > { %v3506_v39 = vpop.eup %3505  ;;  %3517 = vpow2.f32 %v2397_v36  ;;  %2278 = vst [vmem:[#allocation2 + $0x28] sm:$0xff] %v6261_v25  ;;  %v2445_v19 = vsel %vm2317_vm4, %v3504_v8, 0.0  ;;  %v2476_v28 = vadd.f32 %v2444_v42, %v7848_v5  ;;  %v7850_v49 = vld [vmem:[#allocation208_spill] sm:$0xff]  ;;  %v2407_v53 = vmul.f32 1.442695, %v2361_v45  ;;  %v7852_v8 = vld [vmem:[#allocation210_spill] sm:$0xff] }
 0x2eb   : > { %v3508_v33 = vpop.eup %3507  ;;  %3519 = vpow2.f32 %v2399_v62  ;;  %v2446_v61 = vsel %vm2318_vm1, %v3506_v39, 0.0  ;;  %2279 = vst [vmem:[#allocation2 + $0xa0] sm:$0xff] %v6271_v55  ;;  %v2477_v41 = vadd.f32 %v2445_v19, %v7849_v27  ;;  %v2409_v62 = vmul.f32 1.442695, %v2362_v2  ;;  %v7853_v39 = vld [vmem:[#allocation211_spill] sm:$0xff] }
 0x2ec   : > { %v3510_v24 = vpop.eup %3509  ;;  %3521 = vpow2.f32 %v2401_v37  ;;  %v2447_v25 = vsel %vm2319_vm11, %v3508_v33, 0.0  ;;  %2280 = vst [vmem:[#allocation2 + $0xf8] sm:$0xff] %v6277_v59  ;;  %v2478_v36 = vadd.f32 %v2446_v61, %v7850_v49  ;;  %v7851_v59 = vld [vmem:[#allocation209_spill] sm:$0xff]  ;;  %v2364_v44 = vmul.f32 3.1, %v7798_v34 }
 0x2ed   : > { %v3512_v43 = vpop.eup %3511  ;;  %3523 = vpow2.f32 %v2403_v17  ;;  %v2448_v13 = vsel %vm2320_vm14, %v3510_v24, 0.0  ;;  %2281 = vst [vmem:[#allocation2 + $0x20] sm:$0xff] %v6285_v21  ;;  %v2479_v14 = vadd.f32 %v2447_v25, %v7851_v59  ;;  %v2363_v21 = vmul.f32 3.1, %v7795_v47  ;;  %v7854_v17 = vld [vmem:[#allocation212_spill] sm:$0xff]  ;;  %v7855_v61 = vld [vmem:[#allocation213_spill] sm:$0xff] }
 0x2ee   : > { %v3514_v4 = vpop.eup %3513  ;;  %v2449_v55 = vsel %vm2321_vm13, %v3512_v43, 0.0  ;;  %3525 = vpow2.f32 %v2405_v18  ;;  %2282 = vst [vmem:[#allocation2 + $0x98] sm:$0xff] %v6291_v60  ;;  %v2480_v23 = vadd.f32 %v2448_v13, %v7852_v8  ;;  %vm2332_vm5 = vcmp.gt.f32.partialorder %v7798_v34, %v5790_v11  ;;  %v7856_v43 = vld [vmem:[#allocation214_spill] sm:$0xff]  ;;  %v7861_v8 = vld [vmem:[#allocation219_spill] sm:$0xff] }
 0x2ef   : > { %v3516_v9 = vpop.eup %3515  ;;  %v2450_v46 = vsel %vm2322_vm10, %v3514_v4, 0.0  ;;  %2507 = vst [vmem:[#allocation3 + $0x80] sm:$0xff] %v2475_v6  ;;  %v2481_v42 = vadd.f32 %v2449_v55, %v7853_v39  ;;  %3527 = vpow2.f32 %v2407_v53  ;;  %v2411_v30 = vmul.f32 1.442695, %v2363_v21  ;;  %v7858_v4 = vld [vmem:[#allocation216_spill] sm:$0xff]  ;;  %v7860_v21 = vld [vmem:[#allocation218_spill] sm:$0xff] }
 0x2f0   : > { %v3518_v0 = vpop.eup %3517  ;;  %v2451_v22 = vsel %vm2323_vm2, %v3516_v9, 0.0  ;;  %2508 = vst [vmem:[#allocation3 + $0xc8] sm:$0xff] %v2476_v28  ;;  %3529 = vpow2.f32 %v2409_v62  ;;  %v2482_v24 = vadd.f32 %v2450_v46, %v7854_v17  ;;  %v2365_v18 = vmul.f32 3.1, %v7801_v57 }
 0x2f1   : > { %v3520_v37 = vpop.eup %3519  ;;  %v2452_v54 = vsel %vm2324_vm7, %v3518_v0, 0.0  ;;  %2509 = vst [vmem:[#allocation3 + $0xe8] sm:$0xff] %v2477_v41  ;;  %v2483_v58 = vadd.f32 %v2451_v22, %v7855_v61  ;;  %3531 = vpow2.f32 %v2411_v30  ;;  %v2413_v45 = vmul.f32 1.442695, %v2364_v44  ;;  %v7863_v30 = vld [vmem:[#allocation221_spill] sm:$0xff]  ;;  %v7864_v61 = vld [vmem:[#allocation222_spill] sm:$0xff] }
 0x2f2   : > { %v3522_v60 = vpop.eup %3521  ;;  %v2453_v33 = vsel %vm2325_vm0, %v3520_v37, 0.0  ;;  %2510 = vst [vmem:[#allocation3 + $0x78] sm:$0xff] %v2478_v36  ;;  %v2484_v5 = vadd.f32 %v2452_v54, %v7856_v43  ;;  %vm2333_vm4 = vcmp.gt.f32.partialorder %v7801_v57, %v5790_v11  ;;  %v2415_v55 = vmul.f32 1.442695, %v2365_v18  ;;  %v7859_v36 = vld [vmem:[#allocation217_spill] sm:$0xff] }
 0x2f3   : > { %v3524_v6 = vpop.eup %3523  ;;  %v2454_v15 = vsel %vm2326_vm6, %v3522_v60, 0.0  ;;  %2511 = vst [vmem:[#allocation3 + $0x8] sm:$0xff] %v2479_v14  ;;  %v2485_v28 = vadd.f32 %v2453_v33, %v7857_v50  ;;  %v2366_v2 = vmul.f32 3.1, %v7805_v3  ;;  %3533 = vpow2.f32 %v2413_v45  ;;  %v7865_v45 = vld [vmem:[#allocation223_spill] sm:$0xff] }
 0x2f4   : > { %v3526_v19 = vpop.eup %3525  ;;  %v2455_v25 = vsel %vm2327_vm9, %v3524_v6, 0.0  ;;  %2512 = vst [vmem:[#allocation3 + $0x90] sm:$0xff] %v2480_v23  ;;  %v2486_v13 = vadd.f32 %v2454_v15, %v7858_v4  ;;  %v2367_v7 = vmul.f32 3.1, %v7808_v16  ;;  %v2368_v41 = vmul.f32 3.1, %v7811_v29 }
 0x2f5   : > { %v3528_v9 = vpop.eup %3527  ;;  %2513 = vst [vmem:[#allocation3 + $0x58] sm:$0xff] %v2481_v42  ;;  %v2456_v27 = vsel %vm2328_vm15, %v3526_v19, 0.0  ;;  %v2487_v53 = vadd.f32 %v2455_v25, %v7859_v36  ;;  %3535 = vpow2.f32 %v2415_v55  ;;  %v2417_v59 = vmul.f32 1.442695, %v2366_v2  ;;  %v7862_v42 = vld [vmem:[#allocation220_spill] sm:$0xff]  ;;  %v7866_v55 = vld [vmem:[#allocation56_spill] sm:$0xff] }
 0x2f6   : > { %v3530_v49 = vpop.eup %3529  ;;  %2514 = vst [vmem:[#allocation3 + $0xa8] sm:$0xff] %v2482_v24  ;;  %v2457_v0 = vsel %vm2329_vm12, %v3528_v9, 0.0  ;;  %vm2334_vm1 = vcmp.gt.f32.partialorder %v7805_v3, %v5790_v11  ;;  %v2419_v14 = vmul.f32 1.442695, %v2367_v7  ;;  %v2421_v46 = vmul.f32 1.442695, %v2368_v41 }
 0x2f7   : > { %2515 = vst [vmem:[#allocation3 + $0xd0] sm:$0xff] %v2483_v58  ;;  %v2458_v26 = vsel %vm2330_vm3, %v3530_v49, 0.0  ;;  %v3532_v62 = vpop.eup %3531  ;;  %v2488_v37 = vadd.f32 %v2456_v27, %v7860_v21  ;;  %3537 = vpow2.f32 %v2417_v59  ;;  %vm2335_vm11 = vcmp.gt.f32.partialorder %v7808_v16, %v5790_v11  ;;  %v7867_v3 = vld [vmem:[#allocation224_spill] sm:$0xff] }
 0x2f8   : > { %2516 = vst [vmem:[#allocation3 + $0xb0] sm:$0xff] %v2484_v5  ;;  %v2489_v23 = vadd.f32 %v2457_v0, %v7861_v8  ;;  %v2459_v51 = vsel %vm2331_vm8, %v3532_v62, 0.0  ;;  %3539 = vpow2.f32 %v2419_v14  ;;  %v2370_v39 = vmul.f32 3.1, %v7817_v63  ;;  %v7868_v49 = vld [vmem:[#allocation180_spill] sm:$0xff]  ;;  %v7869_v14 = vld [vmem:[#allocation181_spill] sm:$0xff] }
 0x2f9   : > { %2517 = vst [vmem:[#allocation3 + $0x38] sm:$0xff] %v2485_v28  ;;  %v2490_v22 = vadd.f32 %v2458_v26, %v7862_v42  ;;  %3541 = vpow2.f32 %v2421_v46  ;;  %v2423_v60 = vmul.f32 1.442695, %v2369_v10  ;;  %v2371_v54 = vmul.f32 3.1, %v7820_v12  ;;  %v3534_v33 = vpop.eup %3533  ;;  %v1958_v10 = vld [vmem:[#allocation3 + $0xb8] sm:$0xff] }
 0x2fa   : > { %2518 = vst [vmem:[#allocation3 + $0x40] sm:$0xff] %v2486_v13  ;;  %v2491_v6 = vadd.f32 %v2459_v51, %v7863_v30  ;;  %vm2336_vm14 = vcmp.gt.f32.partialorder %v7811_v29, %v5790_v11  ;;  %v2425_v17 = vmul.f32 1.442695, %v2370_v39  ;;  %v2372_v47 = vmul.f32 3.1, %v7823_v20 }
 0x2fb   : > { %2519 = vst [vmem:[#allocation3 + $0xe0] sm:$0xff] %v2487_v53  ;;  %v3536_v24 = vpop.eup %3535  ;;  %v2460_v15 = vsel %vm2332_vm5, %v3534_v33, 0.0  ;;  %3543 = vpow2.f32 %v2423_v60  ;;  %v2427_v44 = vmul.f32 1.442695, %v2371_v54  ;;  %v2373_v19 = vmul.f32 3.1, %v7827_v52 }
 0x2fc   : > { %2520 = vst [vmem:[#allocation3 + $0x60] sm:$0xff] %v2488_v37  ;;  %vm1993_vm13 = vcmp.gt.f32.partialorder %v7842_v31, %v5790_v11  ;;  %v2492_v58 = vadd.f32 %v2460_v15, %v7864_v61  ;;  %v2461_v18 = vsel %vm2333_vm4, %v3536_v24, 0.0  ;;  %3545 = vpow2.f32 %v2425_v17  ;;  %v1959_v54 = vld [vmem:[#allocation3] sm:$0xff]  ;;  %v7872_v33 = vld [vmem:[#allocation226_spill] sm:$0xff]  ;;  %v1960_v24 = vld [vmem:[#allocation3 + $0x28] sm:$0xff] }
 0x2fd   : > { %2521 = vst [vmem:[#allocation3 + $0x18] sm:$0xff] %v2489_v23  ;;  %v2429_v43 = vmul.f32 1.442695, %v2372_v47  ;;  %v3538_v5 = vpop.eup %3537  ;;  %v2493_v34 = vadd.f32 %v2461_v18, %v6102_v32  ;;  %vm2337_vm10 = vcmp.gt.f32.partialorder %v7814_v48, %v5790_v11  ;;  %3547 = vpow2.f32 %v2427_v44  ;;  %v7870_v48 = vld [vmem:[#allocation225_spill] sm:$0xff]  ;;  %v7873_v17 = vld [vmem:[#allocation184_spill] sm:$0xff]  ;;  %v7874_v15 = vld [vmem:[#allocation186_spill] sm:$0xff] }
 0x2fe   : > { %2522 = vst [vmem:[#allocation3 + $0x68] sm:$0xff] %v2490_v22  ;;  %v2431_v50 = vmul.f32 1.442695, %v2373_v19  ;;  %v3540_v28 = vpop.eup %3539  ;;  %vm1994_vm2 = vcmp.gt.f32.partialorder %v7723_v35, %v5790_v11  ;;  %v2462_v57 = vsel %vm2334_vm1, %v3538_v5, 0.0  ;;  %vm2338_vm7 = vcmp.gt.f32.partialorder %v7817_v63, %v5790_v11  ;;  %v7871_v22 = vld [vmem:[#allocation182_spill] sm:$0xff]  ;;  %v7875_v44 = vld [vmem:[#allocation183_spill] sm:$0xff] }
 0x2ff   : > { %2523 = vst [vmem:[#allocation3 + $0x10] sm:$0xff] %v2491_v6  ;;  %3549 = vpow2.f32 %v2429_v43  ;;  %v2374_v32 = vmul.f32 3.1, %v7830_v38  ;;  %v3542_v25 = vpop.eup %3541  ;;  %v2494_v4 = vadd.f32 %v2462_v57, %v7865_v45  ;;  %v2463_v13 = vsel %vm2335_vm11, %v3540_v28, 0.0  ;;  %v1961_v43 = vld [vmem:[#allocation3 + $0x98] sm:$0xff] }
 0x300   : > { %2524 = vst [vmem:[#allocation3 + $0x70] sm:$0xff] %v2492_v58  ;;  %3551 = vpow2.f32 %v2431_v50  ;;  %v2375_v2 = vmul.f32 3.1, %v7866_v55  ;;  %v2495_v9 = vadd.f32 %v2463_v13, %v7867_v3  ;;  %v2464_v27 = vsel %vm2336_vm14, %v3542_v25, 0.0  ;;  %v7876_v58 = vld [vmem:[#allocation185_spill] sm:$0xff]  ;;  %v7877_v5 = vld [vmem:[#allocation187_spill] sm:$0xff] }
 0x301   : > { %2525 = vst [vmem:[#allocation3 + $0x50] sm:$0xff] %v2493_v34  ;;  %vm2339_vm0 = vcmp.gt.f32.partialorder %v7820_v12, %v5790_v11  ;;  %v2433_v7 = vmul.f32 1.442695, %v2374_v32  ;;  %v3544_v41 = vpop.eup %3543  ;;  %v2496_v36 = vadd.f32 %v2464_v27, %v7868_v49  ;;  %vm2340_vm6 = vcmp.gt.f32.partialorder %v7823_v20, %v5790_v11  ;;  %v7878_v28 = vld [vmem:[#allocation227_spill] sm:$0xff] }
 0x302   : > { %2526 = vst [vmem:[#allocation3 + $0xa0] sm:$0xff] %v2494_v4  ;;  %v2435_v16 = vmul.f32 1.442695, %v2375_v2  ;;  %v2376_v53 = vmul.f32 3.1, %v7837_v1  ;;  %v3546_v0 = vpop.eup %3545  ;;  %v2465_v29 = vsel %vm2337_vm10, %v3544_v41, 0.0  ;;  %vm2341_vm9 = vcmp.gt.f32.partialorder %v7827_v52, %v5790_v11 }
 0x303   : > { %2527 = vst [vmem:[#allocation3 + $0xd8] sm:$0xff] %v2495_v9  ;;  %3553 = vpow2.f32 %v2433_v7  ;;  %v2377_v59 = vmul.f32 3.1, %v7840_v56  ;;  %v3548_v26 = vpop.eup %3547  ;;  %v2497_v46 = vadd.f32 %v2465_v29, %v7869_v14  ;;  %v2466_v62 = vsel %vm2338_vm7, %v3546_v0, 0.0 }
 0x304   : > { %2528 = vst [vmem:[#allocation3 + $0x30] sm:$0xff] %v2496_v36  ;;  %3555 = vpow2.f32 %v2435_v16  ;;  %v2437_v21 = vmul.f32 1.442695, %v2376_v53  ;;  %v2498_v8 = vadd.f32 %v2466_v62, %v7870_v48  ;;  %v2467_v23 = vsel %vm2339_vm0, %v3548_v26, 0.0 }
 0x305   : > { %v3550_v37 = vpop.eup %3549  ;;  %v2439_v51 = vmul.f32 1.442695, %v2377_v59  ;;  %v2378_v39 = vmul.f32 3.1, %v7844_v40  ;;  %2529 = vst [vmem:[#allocation3 + $0x20] sm:$0xff] %v2497_v46  ;;  %v2499_v60 = vadd.f32 %v2467_v23, %v7871_v22  ;;  %vm2342_vm15 = vcmp.gt.f32.partialorder %v7830_v38, %v5790_v11 }
 0x306   : > { %v3552_v42 = vpop.eup %3551  ;;  %v2468_v63 = vsel %vm2340_vm6, %v3550_v37, 0.0  ;;  %3557 = vpow2.f32 %v2437_v21  ;;  %2530 = vst [vmem:[#allocation3 + $0xf0] sm:$0xff] %v2498_v8  ;;  %v2151_v47 = vadd.f32 %v7873_v17, %v1958_v10  ;;  %v2121_v20 = vsel %vm1993_vm13, %v7874_v15, 0.0 }
 0x307   : > { %v2500_v12 = vadd.f32 %v2468_v63, %v7872_v33  ;;  %v2469_v30 = vsel %vm2341_vm9, %v3552_v42, 0.0  ;;  %3559 = vpow2.f32 %v2439_v51  ;;  %v2441_v6 = vmul.f32 1.442695, %v2378_v39  ;;  %2531 = vst [vmem:[#allocation3 + $0x88] sm:$0xff] %v2499_v60 }
 0x308   : > { %v2501_v19 = vadd.f32 %v2469_v30, %v7875_v44  ;;  %vm2343_vm12 = vcmp.gt.f32.partialorder %v7866_v55, %v5790_v11  ;;  %v2152_v18 = vadd.f32 %v7876_v58, %v1959_v54  ;;  %v2122_v34 = vsel %vm1994_vm2, %v7877_v5, 0.0 }
 0x309   : > { %v3554_v61 = vpop.eup %3553  ;;  %2532 = vst [vmem:[#allocation3 + $0x48] sm:$0xff] %v2500_v12  ;;  %3561 = vpow2.f32 %v2441_v6  ;;  %vm2344_vm3 = vcmp.gt.f32.partialorder %v7837_v1, %v5790_v11  ;;  %v2153_v50 = vadd.f32 %v2121_v20, %v1960_v24  ;;  %vm2345_vm8 = vcmp.gt.f32.partialorder %v7840_v56, %v5790_v11 }
 0x30a   : > { %v3556_v52 = vpop.eup %3555  ;;  %2533 = vst [vmem:[#allocation3 + $0xf8] sm:$0xff] %v2501_v19  ;;  %v2470_v31 = vsel %vm2342_vm15, %v3554_v61, 0.0  ;;  %v2154_v35 = vadd.f32 %v2122_v34, %v1961_v43  ;;  %vm2346_vm5 = vcmp.gt.f32.partialorder %v7844_v40, %v5790_v11 }
 0x30b   : > { %v2502_v57 = vadd.f32 %v2470_v31, %v7878_v28  ;;  %v2471_v32 = vsel %vm2343_vm12, %v3556_v52, 0.0 }
 0x30c   : > { %v3558_v25 = vpop.eup %3557  ;;  %v2503_v45 = vadd.f32 %v2471_v32, %v2151_v47 }
 0x30d   : > { %v3560_v4 = vpop.eup %3559  ;;  %2534 = vst [vmem:[#allocation3 + $0xc0] sm:$0xff] %v2502_v57  ;;  %v2472_v13 = vsel %vm2344_vm3, %v3558_v25, 0.0 }
 0x30e   : > { %2535 = vst [vmem:[#allocation3 + $0xb8] sm:$0xff] %v2503_v45  ;;  %v2504_v38 = vadd.f32 %v2472_v13, %v2152_v18  ;;  %v2473_v55 = vsel %vm2345_vm8, %v3560_v4, 0.0 }
 0x30f   : > { %v3562_v1 = vpop.eup %3561  ;;  %v2505_v2 = vadd.f32 %v2473_v55, %v2153_v50 }
 0x310   : > { %2536 = vst [vmem:[#allocation3] sm:$0xff] %v2504_v38  ;;  %v2474_v3 = vsel %vm2346_vm5, %v3562_v1, 0.0 }
 0x311   : > { %2537 = vst [vmem:[#allocation3 + $0x28] sm:$0xff] %v2505_v2  ;;  %v2506_v9 = vadd.f32 %v2474_v3, %v2154_v35 }
 0x313   : > { %2538 = vst [vmem:[#allocation3 + $0x98] sm:$0xff] %v2506_v9 }
 0x314 PF: > { %p3214_p11 = scmp.ne.s32.totalorder %s3585_s23, 1 }
 0x316   : > { %2542 = sbr.rel (%p3214_p11) target bundleno = 1081 (0x439), region = 56 }
 0x31b   : > { %v2543_v56 = vld [vmem:[#allocation2 + $0xb0] sm:$0xff]  ;;  %v2545_v7 = vld [vmem:[#allocation2 + $0xd8] sm:$0xff]  ;;  %v2544_v11 = vld [vmem:[#allocation2] sm:$0xff]  ;;  %vm2767_vm4 = vcmask 7168  }
 0x31c   : > { %v2547_v27 = vld [vmem:[#allocation2 + $0x50] sm:$0xff]  ;;  %2575 = vmax.xlane.f32.xlu0 %v2543_v56  ;;  %2579 = vmax.xlane.f32.xlu1 %v2545_v7  ;;  %v2548_v40 = vld [vmem:[#allocation2 + $0x68] sm:$0xff]  ;;  %v2546_v41 = vld [vmem:[#allocation2 + $0x18] sm:$0xff] }
 0x31d   : > { %2583 = vmax.xlane.f32.xlu2 %v2547_v27  ;;  %v2549_v49 = vld [vmem:[#allocation2 + $0x30] sm:$0xff]  ;;  %v2551_v36 = vld [vmem:[#allocation2 + $0x80] sm:$0xff]  ;;  %v2550_v16 = vld [vmem:[#allocation2 + $0x48] sm:$0xff] }
 0x31e   : > { %v2552_v53 = vld [vmem:[#allocation2 + $0x88] sm:$0xff]  ;;  %v2554_v0 = vld [vmem:[#allocation2 + $0xb8] sm:$0xff]  ;;  %v2555_v59 = vld [vmem:[#allocation2 + $0x60] sm:$0xff] }
 0x31f   : > { %v2553_v29 = vld [vmem:[#allocation2 + $0xe8] sm:$0xff]  ;;  %v2556_v14 = vld [vmem:[#allocation2 + $0xf0] sm:$0xff]  ;;  %v2558_v46 = vld [vmem:[#allocation2 + $0x78] sm:$0xff] }
 0x320   : > { %v2557_v26 = vld [vmem:[#allocation2 + $0x8] sm:$0xff]  ;;  %v2560_v62 = vld [vmem:[#allocation2 + $0x58] sm:$0xff]  ;;  %v2561_v37 = vld [vmem:[#allocation2 + $0x40] sm:$0xff] }
 0x321   : > { %v2559_v21 = vld [vmem:[#allocation2 + $0x38] sm:$0xff]  ;;  %v2563_v10 = vld [vmem:[#allocation2 + $0xe0] sm:$0xff]  ;;  %v2562_v48 = vld [vmem:[#allocation2 + $0xc8] sm:$0xff] }
 0x322   : > { %v2564_v8 = vld [vmem:[#allocation2 + $0x90] sm:$0xff]  ;;  %v2566_v23 = vld [vmem:[#allocation2 + $0xc0] sm:$0xff]  ;;  %v2567_v39 = vld [vmem:[#allocation2 + $0xa8] sm:$0xff] }
 0x323   : > { %v2565_v51 = vld [vmem:[#allocation2 + $0x70] sm:$0xff]  ;;  %v2570_v60 = vld [vmem:[#allocation2 + $0x28] sm:$0xff]  ;;  %v2572_v63 = vld [vmem:[#allocation2 + $0xf8] sm:$0xff] }
 0x324   : > { %2577 = vmax.xlane.f32.xlu0 %v2544_v11  ;;  %2581 = vmax.xlane.f32.xlu1 %v2546_v41  ;;  %v2569_v42 = vld [vmem:[#allocation2 + $0x10] sm:$0xff]  ;;  %v2571_v54 = vld [vmem:[#allocation2 + $0xa0] sm:$0xff]  ;;  %v2574_v30 = vld [vmem:[#allocation2 + $0x98] sm:$0xff] }
 0x325   : > { %2585 = vmax.xlane.f32.xlu2 %v2548_v40  ;;  %v2568_v22 = vld [vmem:[#allocation2 + $0xd0] sm:$0xff]  ;;  %v2573_v33 = vld [vmem:[#allocation2 + $0x20] sm:$0xff]  ;;  %v2801_v6 = vld [vmem:[#allocation3 + $0xc8] sm:$0xff] }
 0x326   : > { %v2800_v12 = vld [vmem:[#allocation3 + $0x80] sm:$0xff]  ;;  %v2803_v17 = vld [vmem:[#allocation3 + $0x78] sm:$0xff]  ;;  %v2802_v47 = vld [vmem:[#allocation3 + $0xe8] sm:$0xff] }
 0x327   : > { %v2804_v24 = vld [vmem:[#allocation3 + $0x8] sm:$0xff]  ;;  %v2806_v15 = vld [vmem:[#allocation3 + $0x58] sm:$0xff]  ;;  %v2805_v20 = vld [vmem:[#allocation3 + $0x90] sm:$0xff] }
 0x328   : > { %v2807_v44 = vld [vmem:[#allocation3 + $0xa8] sm:$0xff]  ;;  %v2809_v19 = vld [vmem:[#allocation3 + $0xb0] sm:$0xff]  ;;  %v2810_v52 = vld [vmem:[#allocation3 + $0x38] sm:$0xff] }
 0x329   : > { %v2808_v61 = vld [vmem:[#allocation3 + $0xd0] sm:$0xff]  ;;  %v2812_v58 = vld [vmem:[#allocation3 + $0xe0] sm:$0xff]  ;;  %v2815_v13 = vld [vmem:[#allocation3 + $0x68] sm:$0xff] }
 0x32a   : > { %v2811_v18 = vld [vmem:[#allocation3 + $0x40] sm:$0xff]  ;;  %v2641_v50 = vld [vmem:[%s3697_s21 + $0x10] sm:$0xff]  ;;  %v2814_v55 = vld [vmem:[#allocation3 + $0x18] sm:$0xff] }
 0x32b   : > { %v2639_v43 = vld [vmem:[%s3697_s21] sm:$0xff]  ;;  %v2705_v32 = vld [vmem:[%s3692_s18 + $0x10] sm:$0xff]  ;;  %v2640_v1 = vld [vmem:[%s3697_s21 + $0x8] sm:$0xff] }
 0x32c   : > { %2587 = vmax.xlane.f32.xlu0 %v2549_v49  ;;  %2589 = vmax.xlane.f32.xlu1 %v2550_v16  ;;  %v2643_v5 = vld [vmem:[%s3697_s21 + $0x20] sm:$0xff]  ;;  %v2644_v2 = vld [vmem:[%s3697_s21 + $0x28] sm:$0xff]  ;;  %v2642_v56 = vld [vmem:[%s3697_s21 + $0x18] sm:$0xff] }
 0x32d   : > { %2591 = vmax.xlane.f32.xlu2 %v2551_v36  ;;  %v2703_v34 = vld [vmem:[%s3692_s18] sm:$0xff]  ;;  %v2704_v3 = vld [vmem:[%s3692_s18 + $0x8] sm:$0xff]  ;;  %v2706_v11 = vld [vmem:[%s3692_s18 + $0x18] sm:$0xff] }
 0x32e   : > { %v2707_v31 = vld [vmem:[%s3692_s18 + $0x20] sm:$0xff]  ;;  %v2708_v9 = vld [vmem:[%s3692_s18 + $0x28] sm:$0xff]  ;;  %v2816_v49 = vld [vmem:[#allocation3 + $0x10] sm:$0xff] }
 0x32f   : > { %v2813_v4 = vld [vmem:[#allocation3 + $0x60] sm:$0xff]  ;;  %v2818_v16 = vld [vmem:[#allocation3 + $0x50] sm:$0xff] }
 0x334   : > { %2593 = vmax.xlane.f32.xlu0 %v2552_v53  ;;  %2595 = vmax.xlane.f32.xlu1 %v2553_v29  ;;  %v2645_v29 = vld [vmem:[%s3697_s21 + $0x30] sm:$0xff] }
 0x335   : > { %2597 = vmax.xlane.f32.xlu2 %v2554_v0  ;;  %v2817_v0 = vld [vmem:[#allocation3 + $0x70] sm:$0xff] }
 0x33c   : > { %2599 = vmax.xlane.f32.xlu0 %v2555_v59  ;;  %2601 = vmax.xlane.f32.xlu1 %v2556_v14  ;;  %v2647_v59 = vld [vmem:[%s3697_s21 + $0x40] sm:$0xff] }
 0x33d   : > { %2603 = vmax.xlane.f32.xlu2 %v2557_v26  ;;  %v2709_v26 = vld [vmem:[%s3692_s18 + $0x30] sm:$0xff]  ;;  %v2711_v14 = vld [vmem:[%s3692_s18 + $0x40] sm:$0xff] }
 0x344   : > { %2605 = vmax.xlane.f32.xlu0 %v2558_v46  ;;  %2607 = vmax.xlane.f32.xlu1 %v2559_v21  ;;  %v2646_v46 = vld [vmem:[%s3697_s21 + $0x38] sm:$0xff] }
 0x345   : > { %2609 = vmax.xlane.f32.xlu2 %v2560_v62 }
 0x34c   : > { %2611 = vmax.xlane.f32.xlu0 %v2561_v37  ;;  %2613 = vmax.xlane.f32.xlu1 %v2562_v48  ;;  %v2710_v37 = vld [vmem:[%s3692_s18 + $0x38] sm:$0xff] }
 0x34d   : > { %2615 = vmax.xlane.f32.xlu2 %v2563_v10 }
 0x354   : > { %2617 = vmax.xlane.f32.xlu0 %v2564_v8  ;;  %2619 = vmax.xlane.f32.xlu1 %v2565_v51  ;;  %v2819_v8 = vld [vmem:[#allocation3 + $0xa0] sm:$0xff]  ;;  %v2821_v51 = vld [vmem:[#allocation3 + $0x30] sm:$0xff] }
 0x355   : > { %2621 = vmax.xlane.f32.xlu2 %v2566_v23 }
 0x35c   : > { %2623 = vmax.xlane.f32.xlu0 %v2567_v39  ;;  %2625 = vmax.xlane.f32.xlu1 %v2568_v22  ;;  %v2648_v22 = vld [vmem:[%s3697_s21 + $0x48] sm:$0xff] }
 0x35d   : > { %2627 = vmax.xlane.f32.xlu2 %v2569_v42  ;;  %v2820_v42 = vld [vmem:[#allocation3 + $0xd8] sm:$0xff] }
 0x364   : > { %2629 = vmax.xlane.f32.xlu0 %v2570_v60  ;;  %2631 = vmax.xlane.f32.xlu1 %v2571_v54  ;;  %v2650_v60 = vld [vmem:[%s3697_s21 + $0x58] sm:$0xff] }
 0x365   : > { %2633 = vmax.xlane.f32.xlu2 %v2572_v63  ;;  %v2712_v63 = vld [vmem:[%s3692_s18 + $0x48] sm:$0xff]  ;;  %v2714_v54 = vld [vmem:[%s3692_s18 + $0x58] sm:$0xff] }
 0x36c   : > { %2635 = vmax.xlane.f32.xlu0 %v2573_v33  ;;  %2637 = vmax.xlane.f32.xlu1 %v2574_v30  ;;  %v2649_v33 = vld [vmem:[%s3697_s21 + $0x50] sm:$0xff] }
 0x36d   : > { %2832 = vadd.xlane.f32.xlu2 %v2800_v12 }
 0x374   : > { %2834 = vadd.xlane.f32.xlu0 %v2801_v6  ;;  %2836 = vadd.xlane.f32.xlu1 %v2802_v47  ;;  %v2713_v6 = vld [vmem:[%s3692_s18 + $0x50] sm:$0xff] }
 0x375   : > { %2838 = vadd.xlane.f32.xlu2 %v2803_v17 }
 0x37c   : > { %2840 = vadd.xlane.f32.xlu0 %v2804_v24  ;;  %2842 = vadd.xlane.f32.xlu1 %v2805_v20  ;;  %v2822_v24 = vld [vmem:[#allocation3 + $0x20] sm:$0xff]  ;;  %v2824_v20 = vld [vmem:[#allocation3 + $0x88] sm:$0xff] }
 0x37d   : > { %2844 = vadd.xlane.f32.xlu2 %v2806_v15 }
 0x384   : > { %2846 = vadd.xlane.f32.xlu0 %v2807_v44  ;;  %2848 = vadd.xlane.f32.xlu1 %v2808_v61  ;;  %v2651_v61 = vld [vmem:[%s3697_s21 + $0x60] sm:$0xff] }
 0x385   : > { %2850 = vadd.xlane.f32.xlu2 %v2809_v19  ;;  %v2823_v19 = vld [vmem:[#allocation3 + $0xf0] sm:$0xff] }
 0x38c   : > { %2852 = vadd.xlane.f32.xlu0 %v2810_v52  ;;  %2854 = vadd.xlane.f32.xlu1 %v2811_v18  ;;  %v2653_v52 = vld [vmem:[%s3697_s21 + $0x70] sm:$0xff] }
 0x38d   : > { %2856 = vadd.xlane.f32.xlu2 %v2812_v58  ;;  %v2715_v58 = vld [vmem:[%s3692_s18 + $0x60] sm:$0xff]  ;;  %v2717_v18 = vld [vmem:[%s3692_s18 + $0x70] sm:$0xff] }
 0x38f   : > { %v2576_v28 = vpop.xlane.xlu0 %2575  ;;  %v2580_v25 = vpop.xlane.xlu1 %2579 }
 0x390   : > { %v2584_v57 = vpop.xlane.xlu2 %2583  ;;  %vm2671_vm1 = vcmp.lt.f32.partialorder %v2639_v43, %v2576_v28  ;;  %vm2673_vm14 = vcmp.lt.f32.partialorder %v2641_v50, %v2580_v25  ;;  %v2652_v43 = vld [vmem:[%s3697_s21 + $0x68] sm:$0xff]  ;;  %v2827_v25 = vld [vmem:[#allocation3 + $0xc0] sm:$0xff] }
 0x391   : > { %vm2675_vm11 = vcmp.lt.f32.partialorder %v2643_v5, %v2584_v57  ;;  %v2735_v45 = vsel %vm2671_vm1, %v2703_v34, 0.0  ;;  %v2737_v38 = vsel %vm2673_vm14, %v2705_v32, 0.0  ;;  %v2825_v57 = vld [vmem:[#allocation3 + $0x48] sm:$0xff] }
 0x392   : > { %v2739_v35 = vsel %vm2675_vm11, %v2707_v31, 0.0  ;;  %2768 = vst.msk [vmem:[%s3702_s7] sm:$0xff] %vm2767_vm4, %v2735_v45  ;;  %v2716_v31 = vld [vmem:[%s3692_s18 + $0x68] sm:$0xff] }
 0x393   : > { %2772 = vst.msk [vmem:[%s3702_s7 + $0x20] sm:$0xff] %vm2767_vm4, %v2739_v35  ;;  %v2654_v35 = vld [vmem:[%s3697_s21 + $0x78] sm:$0xff] }
 0x394   : > { %2858 = vadd.xlane.f32.xlu0 %v2813_v4  ;;  %2770 = vst.msk [vmem:[%s3702_s7 + $0x10] sm:$0xff] %vm2767_vm4, %v2737_v38  ;;  %2860 = vadd.xlane.f32.xlu1 %v2814_v55  ;;  %v2826_v4 = vld [vmem:[#allocation3 + $0xf8] sm:$0xff]  ;;  %v2720_v55 = vld [vmem:[%s3692_s18 + $0x88] sm:$0xff] }
 0x395   : > { %2862 = vadd.xlane.f32.xlu2 %v2815_v13  ;;  %v2656_v13 = vld [vmem:[%s3697_s21 + $0x88] sm:$0xff]  ;;  %v2718_v38 = vld [vmem:[%s3692_s18 + $0x78] sm:$0xff] }
 0x397   : > { %v2578_v27 = vpop.xlane.xlu0 %2577  ;;  %v2582_v40 = vpop.xlane.xlu1 %2581 }
 0x398   : > { %v2586_v7 = vpop.xlane.xlu2 %2585  ;;  %vm2672_vm13 = vcmp.lt.f32.partialorder %v2640_v1, %v2578_v27  ;;  %vm2674_vm2 = vcmp.lt.f32.partialorder %v2642_v56, %v2582_v40  ;;  %v2655_v1 = vld [vmem:[%s3697_s21 + $0x80] sm:$0xff]  ;;  %v2830_v40 = vld [vmem:[#allocation3 + $0x28] sm:$0xff] }
 0x399   : > { %vm2676_vm10 = vcmp.lt.f32.partialorder %v2644_v2, %v2586_v7  ;;  %v2736_v41 = vsel %vm2672_vm13, %v2704_v3, 0.0  ;;  %v2738_v53 = vsel %vm2674_vm2, %v2706_v11, 0.0  ;;  %v2828_v7 = vld [vmem:[#allocation3 + $0xb8] sm:$0xff] }
 0x39a   : > { %v2740_v36 = vsel %vm2676_vm10, %v2708_v9, 0.0  ;;  %2769 = vst.msk [vmem:[%s3702_s7 + $0x8] sm:$0xff] %vm2767_vm4, %v2736_v41  ;;  %v2719_v9 = vld [vmem:[%s3692_s18 + $0x80] sm:$0xff] }
 0x39b   : > { %2773 = vst.msk [vmem:[%s3702_s7 + $0x28] sm:$0xff] %vm2767_vm4, %v2740_v36  ;;  %v2657_v36 = vld [vmem:[%s3697_s21 + $0x90] sm:$0xff] }
 0x39c   : > { %2864 = vadd.xlane.f32.xlu0 %v2816_v49  ;;  %2771 = vst.msk [vmem:[%s3702_s7 + $0x18] sm:$0xff] %vm2767_vm4, %v2738_v53  ;;  %2866 = vadd.xlane.f32.xlu1 %v2817_v0  ;;  %v2829_v49 = vld [vmem:[#allocation3] sm:$0xff]  ;;  %v2721_v53 = vld [vmem:[%s3692_s18 + $0x90] sm:$0xff] }
 0x39d   : > { %2868 = vadd.xlane.f32.xlu2 %v2818_v16  ;;  %v2659_v16 = vld [vmem:[%s3697_s21 + $0xa0] sm:$0xff] }
 0x39e   : > { %v2723_v0 = vld [vmem:[%s3692_s18 + $0xa0] sm:$0xff] }
 0x39f   : > { %v2588_v62 = vpop.xlane.xlu0 %2587  ;;  %v2590_v10 = vpop.xlane.xlu1 %2589 }
 0x3a0   : > { %v2592_v21 = vpop.xlane.xlu2 %2591  ;;  %vm2677_vm7 = vcmp.lt.f32.partialorder %v2645_v29, %v2588_v62  ;;  %vm2678_vm6 = vcmp.lt.f32.partialorder %v2646_v46, %v2590_v10  ;;  %v2658_v29 = vld [vmem:[%s3697_s21 + $0x98] sm:$0xff] }
 0x3a1   : > { %vm2679_vm0 = vcmp.lt.f32.partialorder %v2647_v59, %v2592_v21  ;;  %v2741_v48 = vsel %vm2677_vm7, %v2709_v26, 0.0  ;;  %v2742_v39 = vsel %vm2678_vm6, %v2710_v37, 0.0  ;;  %v2831_v21 = vld [vmem:[#allocation3 + $0x98] sm:$0xff] }
 0x3a2   : > { %v2743_v23 = vsel %vm2679_vm0, %v2711_v14, 0.0  ;;  %2774 = vst.msk [vmem:[%s3702_s7 + $0x30] sm:$0xff] %vm2767_vm4, %v2741_v48  ;;  %v2722_v14 = vld [vmem:[%s3692_s18 + $0x98] sm:$0xff]  ;;  %v2660_v48 = vld [vmem:[%s3697_s21 + $0xa8] sm:$0xff] }
 0x3a3   : > { %2776 = vst.msk [vmem:[%s3702_s7 + $0x40] sm:$0xff] %vm2767_vm4, %v2743_v23  ;;  %v2724_v23 = vld [vmem:[%s3692_s18 + $0xa8] sm:$0xff] }
 0x3a4   : > { %2870 = vadd.xlane.f32.xlu0 %v2819_v8  ;;  %2775 = vst.msk [vmem:[%s3702_s7 + $0x38] sm:$0xff] %vm2767_vm4, %v2742_v39  ;;  %2872 = vadd.xlane.f32.xlu1 %v2820_v42  ;;  %v2662_v8 = vld [vmem:[%s3697_s21 + $0xb8] sm:$0xff]  ;;  %v2661_v39 = vld [vmem:[%s3697_s21 + $0xb0] sm:$0xff] }
 0x3a5   : > { %2874 = vadd.xlane.f32.xlu2 %v2821_v51  ;;  %v2726_v51 = vld [vmem:[%s3692_s18 + $0xb8] sm:$0xff] }
 0x3a7   : > { %v2594_v12 = vpop.xlane.xlu0 %2593  ;;  %v2596_v17 = vpop.xlane.xlu1 %2595 }
 0x3a8   : > { %v2598_v30 = vpop.xlane.xlu2 %2597  ;;  %vm2680_vm9 = vcmp.lt.f32.partialorder %v2648_v22, %v2594_v12  ;;  %vm2681_vm12 = vcmp.lt.f32.partialorder %v2649_v33, %v2596_v17  ;;  %v2727_v17 = vld [vmem:[%s3692_s18 + $0xc0] sm:$0xff] }
 0x3a9   : > { %vm2682_vm15 = vcmp.lt.f32.partialorder %v2650_v60, %v2598_v30  ;;  %v2744_v47 = vsel %vm2680_vm9, %v2712_v63, 0.0  ;;  %v2745_v44 = vsel %vm2681_vm12, %v2713_v6, 0.0  ;;  %v2725_v60 = vld [vmem:[%s3692_s18 + $0xb0] sm:$0xff]  ;;  %v2663_v30 = vld [vmem:[%s3697_s21 + $0xc0] sm:$0xff] }
 0x3aa   : > { %v2746_v15 = vsel %vm2682_vm15, %v2714_v54, 0.0  ;;  %2777 = vst.msk [vmem:[%s3702_s7 + $0x48] sm:$0xff] %vm2767_vm4, %v2744_v47  ;;  %v2665_v6 = vld [vmem:[%s3697_s21 + $0xd0] sm:$0xff] }
 0x3ab   : > { %2779 = vst.msk [vmem:[%s3702_s7 + $0x58] sm:$0xff] %vm2767_vm4, %v2746_v15  ;;  %v2729_v47 = vld [vmem:[%s3692_s18 + $0xd0] sm:$0xff] }
 0x3ac   : > { %2876 = vadd.xlane.f32.xlu0 %v2822_v24  ;;  %2778 = vst.msk [vmem:[%s3702_s7 + $0x50] sm:$0xff] %vm2767_vm4, %v2745_v44  ;;  %2878 = vadd.xlane.f32.xlu1 %v2823_v19  ;;  %v2664_v24 = vld [vmem:[%s3697_s21 + $0xc8] sm:$0xff] }
 0x3ad   : > { %2880 = vadd.xlane.f32.xlu2 %v2824_v20  ;;  %v2728_v44 = vld [vmem:[%s3692_s18 + $0xc8] sm:$0xff] }
 0x3af   : > { %v2600_v5 = vpop.xlane.xlu0 %2599  ;;  %v2602_v50 = vpop.xlane.xlu1 %2601 }
 0x3b0   : > { %v2604_v34 = vpop.xlane.xlu2 %2603  ;;  %vm2683_vm3 = vcmp.lt.f32.partialorder %v2651_v61, %v2600_v5  ;;  %vm2684_vm5 = vcmp.lt.f32.partialorder %v2652_v43, %v2602_v50  ;;  %v2668_v43 = vld [vmem:[%s3697_s21 + $0xe8] sm:$0xff]  ;;  %v2730_v5 = vld [vmem:[%s3692_s18 + $0xd8] sm:$0xff] }
 0x3b1   : > { %vm2685_vm8 = vcmp.lt.f32.partialorder %v2653_v52, %v2604_v34  ;;  %v2747_v28 = vsel %vm2683_vm3, %v2715_v58, 0.0  ;;  %v2748_v45 = vsel %vm2684_vm5, %v2716_v31, 0.0  ;;  %v2732_v34 = vld [vmem:[%s3692_s18 + $0xe8] sm:$0xff]  ;;  %v2667_v31 = vld [vmem:[%s3697_s21 + $0xe0] sm:$0xff] }
 0x3b2   : > { %v2749_v32 = vsel %vm2685_vm8, %v2717_v18, 0.0  ;;  %2780 = vst.msk [vmem:[%s3702_s7 + $0x60] sm:$0xff] %vm2767_vm4, %v2747_v28  ;;  %v2666_v18 = vld [vmem:[%s3697_s21 + $0xd8] sm:$0xff] }
 0x3b3   : > { %2782 = vst.msk [vmem:[%s3702_s7 + $0x70] sm:$0xff] %vm2767_vm4, %v2749_v32 }
 0x3b4   : > { %2882 = vadd.xlane.f32.xlu0 %v2825_v57  ;;  %2781 = vst.msk [vmem:[%s3702_s7 + $0x68] sm:$0xff] %vm2767_vm4, %v2748_v45  ;;  %2884 = vadd.xlane.f32.xlu1 %v2826_v4  ;;  %v2731_v57 = vld [vmem:[%s3692_s18 + $0xe0] sm:$0xff] }
 0x3b5   : > { %2886 = vadd.xlane.f32.xlu2 %v2827_v25 }
 0x3b7   : > { %v2606_v2 = vpop.xlane.xlu0 %2605  ;;  %v2608_v56 = vpop.xlane.xlu1 %2607 }
 0x3b8   : > { %v2610_v3 = vpop.xlane.xlu2 %2609  ;;  %vm2686_vm1 = vcmp.lt.f32.partialorder %v2654_v35, %v2606_v2  ;;  %vm2687_vm14 = vcmp.lt.f32.partialorder %v2655_v1, %v2608_v56  ;;  %v2669_v35 = vld [vmem:[%s3697_s21 + $0xf0] sm:$0xff]  ;;  %v2734_v2 = vld [vmem:[%s3692_s18 + $0xf8] sm:$0xff] }
 0x3b9   : > { %vm2688_vm11 = vcmp.lt.f32.partialorder %v2656_v13, %v2610_v3  ;;  %v2750_v27 = vsel %vm2686_vm1, %v2718_v38, 0.0  ;;  %v2751_v41 = vsel %vm2687_vm14, %v2719_v9, 0.0  ;;  %v2733_v13 = vld [vmem:[%s3692_s18 + $0xf0] sm:$0xff]  ;;  %v2670_v38 = vld [vmem:[%s3697_s21 + $0xf8] sm:$0xff] }
 0x3ba   : > { %v2752_v11 = vsel %vm2688_vm11, %v2720_v55, 0.0  ;;  %2783 = vst.msk [vmem:[%s3702_s7 + $0x78] sm:$0xff] %vm2767_vm4, %v2750_v27 }
 0x3bb   : > { %2785 = vst.msk [vmem:[%s3702_s7 + $0x88] sm:$0xff] %vm2767_vm4, %v2752_v11 }
 0x3bc   : > { %2888 = vadd.xlane.f32.xlu0 %v2828_v7  ;;  %2784 = vst.msk [vmem:[%s3702_s7 + $0x80] sm:$0xff] %vm2767_vm4, %v2751_v41  ;;  %2890 = vadd.xlane.f32.xlu1 %v2829_v49 }
 0x3bd   : > { %2892 = vadd.xlane.f32.xlu2 %v2830_v40 }
 0x3bf   : > { %v2612_v59 = vpop.xlane.xlu0 %2611  ;;  %v2614_v46 = vpop.xlane.xlu1 %2613 }
 0x3c0   : > { %v2616_v26 = vpop.xlane.xlu2 %2615  ;;  %vm2689_vm13 = vcmp.lt.f32.partialorder %v2657_v36, %v2612_v59  ;;  %vm2690_vm2 = vcmp.lt.f32.partialorder %v2658_v29, %v2614_v46 }
 0x3c1   : > { %vm2691_vm10 = vcmp.lt.f32.partialorder %v2659_v16, %v2616_v26  ;;  %v2753_v62 = vsel %vm2689_vm13, %v2721_v53, 0.0  ;;  %v2754_v10 = vsel %vm2690_vm2, %v2722_v14, 0.0 }
 0x3c2   : > { %v2755_v37 = vsel %vm2691_vm10, %v2723_v0, 0.0  ;;  %2786 = vst.msk [vmem:[%s3702_s7 + $0x90] sm:$0xff] %vm2767_vm4, %v2753_v62 }
 0x3c3   : > { %2788 = vst.msk [vmem:[%s3702_s7 + $0xa0] sm:$0xff] %vm2767_vm4, %v2755_v37 }
 0x3c4   : > { %2894 = vadd.xlane.f32.xlu0 %v2831_v21  ;;  %2787 = vst.msk [vmem:[%s3702_s7 + $0x98] sm:$0xff] %vm2767_vm4, %v2754_v10 }
 0x3c7   : > { %v2618_v42 = vpop.xlane.xlu0 %2617  ;;  %v2620_v63 = vpop.xlane.xlu1 %2619 }
 0x3c8   : > { %v2622_v22 = vpop.xlane.xlu2 %2621  ;;  %vm2692_vm7 = vcmp.lt.f32.partialorder %v2660_v48, %v2618_v42  ;;  %vm2693_vm6 = vcmp.lt.f32.partialorder %v2661_v39, %v2620_v63 }
 0x3c9   : > { %vm2694_vm0 = vcmp.lt.f32.partialorder %v2662_v8, %v2622_v22  ;;  %v2756_v54 = vsel %vm2692_vm7, %v2724_v23, 0.0  ;;  %v2757_v12 = vsel %vm2693_vm6, %v2725_v60, 0.0 }
 0x3ca   : > { %v2758_v33 = vsel %vm2694_vm0, %v2726_v51, 0.0  ;;  %2789 = vst.msk [vmem:[%s3702_s7 + $0xa8] sm:$0xff] %vm2767_vm4, %v2756_v54 }
 0x3cb   : > { %2791 = vst.msk [vmem:[%s3702_s7 + $0xb8] sm:$0xff] %vm2767_vm4, %v2758_v33 }
 0x3cc   : > { %2790 = vst.msk [vmem:[%s3702_s7 + $0xb0] sm:$0xff] %vm2767_vm4, %v2757_v12 }
 0x3cf   : > { %v2624_v15 = vpop.xlane.xlu0 %2623  ;;  %v2626_v19 = vpop.xlane.xlu1 %2625 }
 0x3d0   : > { %v2628_v20 = vpop.xlane.xlu2 %2627  ;;  %vm2695_vm9 = vcmp.lt.f32.partialorder %v2663_v30, %v2624_v15  ;;  %vm2696_vm12 = vcmp.lt.f32.partialorder %v2664_v24, %v2626_v19 }
 0x3d1   : > { %vm2697_vm15 = vcmp.lt.f32.partialorder %v2665_v6, %v2628_v20  ;;  %v2759_v61 = vsel %vm2695_vm9, %v2727_v17, 0.0  ;;  %v2760_v58 = vsel %vm2696_vm12, %v2728_v44, 0.0 }
 0x3d2   : > { %v2761_v52 = vsel %vm2697_vm15, %v2729_v47, 0.0  ;;  %2792 = vst.msk [vmem:[%s3702_s7 + $0xc0] sm:$0xff] %vm2767_vm4, %v2759_v61 }
 0x3d3   : > { %2794 = vst.msk [vmem:[%s3702_s7 + $0xd0] sm:$0xff] %vm2767_vm4, %v2761_v52 }
 0x3d4   : > { %2793 = vst.msk [vmem:[%s3702_s7 + $0xc8] sm:$0xff] %vm2767_vm4, %v2760_v58 }
 0x3d7   : > { %v2630_v50 = vpop.xlane.xlu0 %2629  ;;  %v2632_v32 = vpop.xlane.xlu1 %2631 }
 0x3d8   : > { %v2634_v28 = vpop.xlane.xlu2 %2633  ;;  %vm2698_vm3 = vcmp.lt.f32.partialorder %v2666_v18, %v2630_v50  ;;  %vm2699_vm5 = vcmp.lt.f32.partialorder %v2667_v31, %v2632_v32 }
 0x3d9   : > { %vm2700_vm8 = vcmp.lt.f32.partialorder %v2668_v43, %v2634_v28  ;;  %v2762_v25 = vsel %vm2698_vm3, %v2730_v5, 0.0  ;;  %v2763_v4 = vsel %vm2699_vm5, %v2731_v57, 0.0 }
 0x3da   : > { %v2764_v45 = vsel %vm2700_vm8, %v2732_v34, 0.0  ;;  %2795 = vst.msk [vmem:[%s3702_s7 + $0xd8] sm:$0xff] %vm2767_vm4, %v2762_v25 }
 0x3db   : > { %2797 = vst.msk [vmem:[%s3702_s7 + $0xe8] sm:$0xff] %vm2767_vm4, %v2764_v45 }
 0x3dc   : > { %2796 = vst.msk [vmem:[%s3702_s7 + $0xe0] sm:$0xff] %vm2767_vm4, %v2763_v4 }
 0x3df   : > { %v2636_v55 = vpop.xlane.xlu0 %2635  ;;  %v2638_v3 = vpop.xlane.xlu1 %2637 }
 0x3e0   : > { %v2833_v1 = vpop.xlane.xlu2 %2832  ;;  %vm2701_vm1 = vcmp.lt.f32.partialorder %v2669_v35, %v2636_v55  ;;  %vm2702_vm11 = vcmp.lt.f32.partialorder %v2670_v38, %v2638_v3 }
 0x3e1   : > { %2896 = vst.msk [vmem:[%s3707_s10] sm:$0xff] %vm2767_vm4, %v2833_v1  ;;  %v2765_v9 = vsel %vm2701_vm1, %v2733_v13, 0.0  ;;  %v2766_v56 = vsel %vm2702_vm11, %v2734_v2, 0.0 }
 0x3e2   : > { %2798 = vst.msk [vmem:[%s3702_s7 + $0xf0] sm:$0xff] %vm2767_vm4, %v2765_v9 }
 0x3e3   : > { %2799 = vst.msk [vmem:[%s3702_s7 + $0xf8] sm:$0xff] %vm2767_vm4, %v2766_v56 }
 0x3e7   : > { %v2835_v27 = vpop.xlane.xlu0 %2834  ;;  %v2837_v11 = vpop.xlane.xlu1 %2836 }
 0x3e8   : > { %v2839_v7 = vpop.xlane.xlu2 %2838  ;;  %2897 = vst.msk [vmem:[%s3707_s10 + $0x8] sm:$0xff] %vm2767_vm4, %v2835_v27 }
 0x3e9   : > { %2899 = vst.msk [vmem:[%s3707_s10 + $0x18] sm:$0xff] %vm2767_vm4, %v2839_v7 }
 0x3ea   : > { %2898 = vst.msk [vmem:[%s3707_s10 + $0x10] sm:$0xff] %vm2767_vm4, %v2837_v11 }
 0x3ef   : > { %v2841_v40 = vpop.xlane.xlu0 %2840  ;;  %v2843_v49 = vpop.xlane.xlu1 %2842 }
 0x3f0   : > { %v2845_v41 = vpop.xlane.xlu2 %2844  ;;  %2900 = vst.msk [vmem:[%s3707_s10 + $0x20] sm:$0xff] %vm2767_vm4, %v2841_v40 }
 0x3f1   : > { %2902 = vst.msk [vmem:[%s3707_s10 + $0x30] sm:$0xff] %vm2767_vm4, %v2845_v41 }
 0x3f2   : > { %2901 = vst.msk [vmem:[%s3707_s10 + $0x28] sm:$0xff] %vm2767_vm4, %v2843_v49 }
 0x3f7   : > { %v2847_v36 = vpop.xlane.xlu0 %2846  ;;  %v2849_v53 = vpop.xlane.xlu1 %2848 }
 0x3f8   : > { %v2851_v16 = vpop.xlane.xlu2 %2850  ;;  %2903 = vst.msk [vmem:[%s3707_s10 + $0x38] sm:$0xff] %vm2767_vm4, %v2847_v36 }
 0x3f9   : > { %2905 = vst.msk [vmem:[%s3707_s10 + $0x48] sm:$0xff] %vm2767_vm4, %v2851_v16 }
 0x3fa   : > { %2904 = vst.msk [vmem:[%s3707_s10 + $0x40] sm:$0xff] %vm2767_vm4, %v2849_v53 }
 0x3ff   : > { %v2853_v0 = vpop.xlane.xlu0 %2852  ;;  %v2855_v59 = vpop.xlane.xlu1 %2854 }
 0x400   : > { %v2857_v29 = vpop.xlane.xlu2 %2856  ;;  %2906 = vst.msk [vmem:[%s3707_s10 + $0x50] sm:$0xff] %vm2767_vm4, %v2853_v0 }
 0x401   : > { %2908 = vst.msk [vmem:[%s3707_s10 + $0x60] sm:$0xff] %vm2767_vm4, %v2857_v29 }
 0x402   : > { %2907 = vst.msk [vmem:[%s3707_s10 + $0x58] sm:$0xff] %vm2767_vm4, %v2855_v59 }
 0x407   : > { %v2859_v26 = vpop.xlane.xlu0 %2858  ;;  %v2861_v46 = vpop.xlane.xlu1 %2860 }
 0x408   : > { %v2863_v14 = vpop.xlane.xlu2 %2862  ;;  %2909 = vst.msk [vmem:[%s3707_s10 + $0x68] sm:$0xff] %vm2767_vm4, %v2859_v26 }
 0x409   : > { %2911 = vst.msk [vmem:[%s3707_s10 + $0x78] sm:$0xff] %vm2767_vm4, %v2863_v14 }
 0x40a   : > { %2910 = vst.msk [vmem:[%s3707_s10 + $0x70] sm:$0xff] %vm2767_vm4, %v2861_v46 }
 0x40f   : > { %v2865_v62 = vpop.xlane.xlu0 %2864  ;;  %v2867_v37 = vpop.xlane.xlu1 %2866 }
 0x410   : > { %v2869_v21 = vpop.xlane.xlu2 %2868  ;;  %2912 = vst.msk [vmem:[%s3707_s10 + $0x80] sm:$0xff] %vm2767_vm4, %v2865_v62 }
 0x411   : > { %2914 = vst.msk [vmem:[%s3707_s10 + $0x90] sm:$0xff] %vm2767_vm4, %v2869_v21 }
 0x412   : > { %2913 = vst.msk [vmem:[%s3707_s10 + $0x88] sm:$0xff] %vm2767_vm4, %v2867_v37 }
 0x417   : > { %v2871_v10 = vpop.xlane.xlu0 %2870  ;;  %v2873_v8 = vpop.xlane.xlu1 %2872 }
 0x418   : > { %v2875_v48 = vpop.xlane.xlu2 %2874  ;;  %2915 = vst.msk [vmem:[%s3707_s10 + $0x98] sm:$0xff] %vm2767_vm4, %v2871_v10 }
 0x419   : > { %2917 = vst.msk [vmem:[%s3707_s10 + $0xa8] sm:$0xff] %vm2767_vm4, %v2875_v48 }
 0x41a   : > { %2916 = vst.msk [vmem:[%s3707_s10 + $0xa0] sm:$0xff] %vm2767_vm4, %v2873_v8 }
 0x41f   : > { %v2877_v23 = vpop.xlane.xlu0 %2876  ;;  %v2879_v39 = vpop.xlane.xlu1 %2878 }
 0x420   : > { %v2881_v51 = vpop.xlane.xlu2 %2880  ;;  %2918 = vst.msk [vmem:[%s3707_s10 + $0xb0] sm:$0xff] %vm2767_vm4, %v2877_v23 }
 0x421   : > { %2920 = vst.msk [vmem:[%s3707_s10 + $0xc0] sm:$0xff] %vm2767_vm4, %v2881_v51 }
 0x422   : > { %2919 = vst.msk [vmem:[%s3707_s10 + $0xb8] sm:$0xff] %vm2767_vm4, %v2879_v39 }
 0x427   : > { %v2883_v42 = vpop.xlane.xlu0 %2882  ;;  %v2885_v60 = vpop.xlane.xlu1 %2884 }
 0x428   : > { %v2887_v22 = vpop.xlane.xlu2 %2886  ;;  %2921 = vst.msk [vmem:[%s3707_s10 + $0xc8] sm:$0xff] %vm2767_vm4, %v2883_v42 }
 0x429   : > { %2923 = vst.msk [vmem:[%s3707_s10 + $0xd8] sm:$0xff] %vm2767_vm4, %v2887_v22 }
 0x42a   : > { %2922 = vst.msk [vmem:[%s3707_s10 + $0xd0] sm:$0xff] %vm2767_vm4, %v2885_v60 }
 0x42f   : > { %v2889_v63 = vpop.xlane.xlu0 %2888  ;;  %v2891_v33 = vpop.xlane.xlu1 %2890 }
 0x430   : > { %v2893_v54 = vpop.xlane.xlu2 %2892  ;;  %2924 = vst.msk [vmem:[%s3707_s10 + $0xe0] sm:$0xff] %vm2767_vm4, %v2889_v63 }
 0x431   : > { %2926 = vst.msk [vmem:[%s3707_s10 + $0xf0] sm:$0xff] %vm2767_vm4, %v2893_v54 }
 0x432   : > { %2925 = vst.msk [vmem:[%s3707_s10 + $0xe8] sm:$0xff] %vm2767_vm4, %v2891_v33 }
 0x437   : > { %v2895_v12 = vpop.xlane.xlu0 %2894 }
 0x438   : > { %2927 = vst.msk [vmem:[%s3707_s10 + $0xf8] sm:$0xff] %vm2767_vm4, %v2895_v12 }
 0x439 PF: > { %s18_s27 = sadd.s32 1, %s3601_s27   ;;  %s7879_s23 = smov %s3593_s25 }
 0x43a   : > { %p15_p12 = scmp.ge.s32.totalorder %s18_s27, 6   ;;  %s7880_s24 = smov %s3597_s26 }
 0x43b   : > { %s7881_s25 = smov %s7884_s4  ;;  %s7882_s26 = smov %s7888_s28 }
 0x43c   :  { %17 = sbr.rel (!%p15_p12) target bundleno = 3 (0x3), region = 107 }

</bundles_post_ra>
